<compile_context>
chip_gen: v7x
topology: tpu7x:2x2x1
jax: 0.10.0
libtpu: 0.0.40
codegen_flags: <defaults>
</compile_context>

<pallas_src>
import jax
import jax.numpy as jnp
from jax import lax
from jax.experimental import pallas as pl
from jax.experimental.pallas import tpu as pltpu
import numpy as np

# ----- block configuration (mirrors BlockArgs / GlobalParams) -----
N_IMG, H, W = 2, 16, 16
HW = H * W
LANES = N_IMG * HW                     # batch folded into the lane axis
C_IN = 8                               # block_args.input_filters
EXPAND_RATIO = 6
C_MID = C_IN * EXPAND_RATIO            # 48
KSIZE = 3                              # block_args.kernel_size
STRIDE = 1                             # block_args.stride (1 -> id_skip active)
SE_RATIO = 0.25
C_SQ = max(1, int(C_IN * SE_RATIO))    # 2
C_OUT = C_IN                           # output_filters == input_filters
BN_EPS = 1e-3
PAD = KSIZE // 2

assert W & (W - 1) == 0 and H & (H - 1) == 0, "roll/mask depthwise assumes power-of-two H, W"
W_SHIFT = W.bit_length() - 1
HW_SHIFT = HW.bit_length() - 1

# Column layout of the packed "A" parameter array (C_MID rows, f32).
OFF_WEXP = 0                           # w_expand * bn0_scale  ++ b0 column  -> C_IN+1 cols
OFF_WDW = OFF_WEXP + C_IN + 1          # depthwise taps * bn1_scale          -> K*K cols
OFF_WSEE = OFF_WDW + KSIZE * KSIZE     # w_se_expand                         -> C_SQ cols
OFF_WSER = OFF_WSEE + C_SQ             # w_se_reduce (transposed)            -> C_SQ cols
OFF_BSR = OFF_WSER + C_SQ              # b_se_reduce replicated across rows  -> C_SQ cols
OFF_B1 = OFF_BSR + C_SQ                # bn1 folded bias
OFF_BSE = OFF_B1 + 1                   # b_se_expand
OFF_B2 = OFF_BSE + 1                   # bn2 folded bias (first C_OUT rows)
A_COLS = OFF_B2 + 1                    # 27


def sigmoid_t(x):
    # single EUP op instead of exp + reciprocal
    return 0.5 * jnp.tanh(0.5 * x) + 0.5


def swish_t(x):
    return x * sigmoid_t(x)


def mbconv_kernel(x_ref, a_ref, b_ref, out_ref):
    """Whole (folded) batch in one step. Values live in (channels, N*HW) layout."""
    x = x_ref[...]                                   # (C_IN+1, LANES) f32, last row = ones
    A = a_ref[...]                                   # (C_MID, A_COLS) f32
    w_proj = b_ref[...]                              # (C_OUT, C_MID)  bf16, bn2 scale folded

    w_exp = A[:, OFF_WEXP:OFF_WEXP + C_IN + 1].astype(jnp.bfloat16)   # bn0 scale + b0 folded
    w_dw = A[:, OFF_WDW:OFF_WDW + KSIZE * KSIZE]     # (C_MID, K*K), bn1 scale folded
    w_se_e = A[:, OFF_WSEE:OFF_WSEE + C_SQ]          # (C_MID, C_SQ)
    w_se_rT = A[:, OFF_WSER:OFF_WSER + C_SQ]         # (C_MID, C_SQ)  (= w_se_reduce.T)
    b_sr = A[0:1, OFF_BSR:OFF_BSR + C_SQ]            # (1, C_SQ)
    b1 = A[:, OFF_B1:OFF_B1 + 1]                     # (C_MID, 1)
    b_se = A[:, OFF_BSE:OFF_BSE + 1]                 # (C_MID, 1)
    b2 = A[:C_OUT, OFF_B2:OFF_B2 + 1]                # (C_OUT, 1)

    # ---- expand 1x1 conv (BN0 scale + bias folded) + swish ----
    h = jnp.dot(w_exp, x.astype(jnp.bfloat16), preferred_element_type=jnp.float32)
    h = swish_t(h)                                   # (C_MID, LANES)

    # ---- depthwise KxK conv (SAME, stride 1, BN1 scale folded) + bias + swish ----
    lane = lax.broadcasted_iota(jnp.int32, (1, LANES), 1)
    row = (lane >> W_SHIFT) & (H - 1)                # per-image h coordinate
    col = lane & (W - 1)                             # per-image w coordinate

    # hoisted base edge masks (computed once, reused by all taps)
    row_masks = {0: None}
    col_masks = {0: None}
    for off in range(1, PAD + 1):
        row_masks[-off] = row >= off
        row_masks[off] = row < H - off
        col_masks[-off] = col >= off
        col_masks[off] = col < W - off

    center = PAD * KSIZE + PAD
    acc = h * w_dw[:, center:center + 1]             # center tap: no shift, no mask
    for kh in range(KSIZE):
        dh = kh - PAD
        for kw in range(KSIZE):
            dw = kw - PAD
            if dh == 0 and dw == 0:
                continue
            s = dh * W + dw                          # flattened neighbour offset
            # shifted[c, i] = h[c, i + s]  (jnp.roll convention: out[i] = in[i - shift])
            shifted = pltpu.roll(h, shift=(-s) % LANES, axis=1)
            tap = w_dw[:, kh * KSIZE + kw:kh * KSIZE + kw + 1]   # (C_MID, 1)
            valid = None
            for m in (row_masks[dh], col_masks[dw]):
                if m is not None:
                    valid = m if valid is None else (valid & m)
            acc = acc + jnp.where(valid, shifted * tap, 0.0)
    d = swish_t(acc + b1)                            # (C_MID, LANES)

    # ---- squeeze & excitation (per image, kept off the MXU) ----
    img = lane >> HW_SHIFT                           # which folded image each lane belongs to
    inv_hw = jnp.float32(1.0 / HW)
    gate = None
    for n in range(N_IMG):
        m_img = img == n
        pooled = jnp.sum(jnp.where(m_img, d, 0.0), axis=1, keepdims=True) * inv_hw  # (C_MID,1)
        hid = jnp.sum(w_se_rT * pooled, axis=0, keepdims=True) + b_sr               # (1,C_SQ)
        hid = swish_t(hid)
        se = jnp.sum(w_se_e * hid, axis=1, keepdims=True) + b_se                    # (C_MID,1)
        g = sigmoid_t(se)                                                           # (C_MID,1)
        gate = g if gate is None else jnp.where(m_img, g, gate)
    d = d * gate

    # ---- project 1x1 conv (BN2 scale folded) + bias, then identity skip ----
    p = jnp.dot(w_proj, d.astype(jnp.bfloat16), preferred_element_type=jnp.float32) + b2
    out_ref[...] = p + x[:C_OUT, :]


def fold_bn(gamma, beta, mean, var):
    scale = gamma / jnp.sqrt(var + BN_EPS)
    return scale, beta - mean * scale


def pack_params(p):
    """Fold BN scales into conv weights and pack everything into two arrays."""
    s0, b0 = fold_bn(**p["bn0"])
    s1, b1 = fold_bn(**p["bn1"])
    s2, b2 = fold_bn(**p["bn2"])
    w_exp = jnp.concatenate([p["w_expand"] * s0[:, None], b0[:, None]], axis=1)  # (C_MID, C_IN+1)
    w_dw = p["w_dw"].reshape(C_MID, KSIZE * KSIZE) * s1[:, None]                 # (C_MID, K*K)
    matA = jnp.concatenate([
        w_exp,
        w_dw,
        p["w_se_e"],                                   # (C_MID, C_SQ)
        p["w_se_r"].T,                                 # (C_MID, C_SQ)
        jnp.tile(p["b_sr"][None, :], (C_MID, 1)),      # (C_MID, C_SQ)
        b1[:, None],
        p["b_se"][:, None],
        jnp.pad(b2, (0, C_MID - C_OUT))[:, None],
    ], axis=1).astype(jnp.float32)                     # (C_MID, A_COLS)
    matB = (p["w_proj"] * s2[:, None]).astype(jnp.bfloat16)   # (C_OUT, C_MID), MXU operand
    return matA, matB


def mbconv_block(x_nchw, params):
    """x_nchw: (N, C_IN, H, W) float32 (PyTorch layout). Returns (N, C_OUT, H, W)."""
    n = x_nchw.shape[0]
    assert n == N_IMG and x_nchw.shape[1:] == (C_IN, H, W)
    # Identity-skip path assumes stride == 1 and input_filters == output_filters.
    assert STRIDE == 1 and C_IN == C_OUT

    matA, matB = pack_params(params)
    # channels -> sublanes, (image, spatial) -> lanes (tiny host-side relayout, fused by XLA);
    # append a ones row so the expand bias rides in the MXU contraction.
    x2d = x_nchw.reshape(n, C_IN, HW).transpose(1, 0, 2).reshape(C_IN, n * HW)
    x_aug = jnp.concatenate([x2d, jnp.ones((1, n * HW), jnp.float32)], axis=0)

    out2d = pl.pallas_call(
        mbconv_kernel,
        out_shape=jax.ShapeDtypeStruct((C_OUT, n * HW), jnp.float32),
        grid_spec=pltpu.PrefetchScalarGridSpec(
            num_scalar_prefetch=0,
            grid=(1,),
            in_specs=[
                pl.BlockSpec((C_IN + 1, n * HW), lambda i: (0, 0)),
                pl.BlockSpec((C_MID, A_COLS), lambda i: (0, 0)),
                pl.BlockSpec((C_OUT, C_MID), lambda i: (0, 0)),
            ],
            out_specs=pl.BlockSpec((C_OUT, n * HW), lambda i: (0, 0)),
        ),
        compiler_params=pltpu.CompilerParams(dimension_semantics=("arbitrary",)),
    )(x_aug, matA, matB)
    return out2d.reshape(C_OUT, n, H, W).transpose(1, 0, 2, 3)


# ----------------------------- pure-JAX reference -----------------------------
def ref_swish(x):
    return x * jax.nn.sigmoid(x)


def mbconv_reference(x_nchw, p):
    """Pure-JAX NCHW reference with un-folded eval-mode BatchNorm."""
    def bn(v, b):
        inv = 1.0 / jnp.sqrt(b["var"] + BN_EPS)
        return ((v - b["mean"][None, :, None, None])
                * (b["gamma"] * inv)[None, :, None, None]
                + b["beta"][None, :, None, None])

    h = jnp.einsum("nchw,oc->nohw", x_nchw, p["w_expand"])
    h = ref_swish(bn(h, p["bn0"]))
    dw = p["w_dw"].reshape(C_MID, 1, KSIZE, KSIZE)
    d = lax.conv_general_dilated(h, dw, window_strides=(1, 1), padding="SAME",
                                 dimension_numbers=("NCHW", "OIHW", "NCHW"),
                                 feature_group_count=C_MID)
    d = ref_swish(bn(d, p["bn1"]))
    se = jnp.mean(d, axis=(2, 3), keepdims=True)
    se = ref_swish(jnp.einsum("nchw,sc->nshw", se, p["w_se_r"]) + p["b_sr"][None, :, None, None])
    se = jnp.einsum("nshw,cs->nchw", se, p["w_se_e"]) + p["b_se"][None, :, None, None]
    d = d * jax.nn.sigmoid(se)
    o = jnp.einsum("nchw,oc->nohw", d, p["w_proj"])
    o = bn(o, p["bn2"])
    return o + x_nchw


def make_params(key):
    ks = jax.random.split(key, 12)
    p = {}
    p["w_expand"] = 0.1 * jax.random.normal(ks[0], (C_MID, C_IN), jnp.float32)
    p["w_dw"] = 0.1 * jax.random.normal(ks[1], (C_MID, KSIZE, KSIZE), jnp.float32)
    p["w_se_r"] = 0.1 * jax.random.normal(ks[2], (C_SQ, C_MID), jnp.float32)
    p["b_sr"] = 0.1 * jax.random.normal(ks[3], (C_SQ,), jnp.float32)
    p["w_se_e"] = 0.1 * jax.random.normal(ks[4], (C_MID, C_SQ), jnp.float32)
    p["b_se"] = 0.1 * jax.random.normal(ks[5], (C_MID,), jnp.float32)
    p["w_proj"] = 0.1 * jax.random.normal(ks[6], (C_OUT, C_MID), jnp.float32)

    def bn(k, c):
        k1, k2, k3, k4 = jax.random.split(k, 4)
        return dict(gamma=jax.random.uniform(k1, (c,), jnp.float32, 0.5, 1.5),
                    beta=0.1 * jax.random.normal(k2, (c,), jnp.float32),
                    mean=0.1 * jax.random.normal(k3, (c,), jnp.float32),
                    var=jax.random.uniform(k4, (c,), jnp.float32, 0.5, 1.5))

    p["bn0"] = bn(ks[7], C_MID)
    p["bn1"] = bn(ks[8], C_MID)
    p["bn2"] = bn(ks[9], C_OUT)
    return p


if __name__ == "__main__":
    key = jax.random.PRNGKey(0)
    kx, kp = jax.random.split(key)
    # PyTorch NCHW input: (2, 8, 16, 16)
    x_nchw = jax.random.normal(kx, (N_IMG, C_IN, H, W), jnp.float32)
    params = make_params(kp)

    out = jax.block_until_ready(mbconv_block(x_nchw, params))
    ref = jax.block_until_ready(mbconv_reference(x_nchw, params))
    # Tolerance relaxed vs the pure-f32 reference because the expand/project
    # matmul operands are cast to bf16 (f32 accumulate) per the perf review.
    np.testing.assert_allclose(np.asarray(out), np.asarray(ref), rtol=3e-2, atol=3e-2)

    print("KERNEL_OK")
</pallas_src>

<mosaic_0001>
module attributes {stable_mosaic.version = 11 : i64} {
  func.func @mbconv_kernel(%arg0: i32, %arg1: memref<9x512xf32, #tpu.memory_space<vmem>>, %arg2: memref<48x27xf32, #tpu.memory_space<vmem>>, %arg3: memref<8x48xbf16, #tpu.memory_space<vmem>>, %arg4: memref<8x512xf32, #tpu.memory_space<vmem>>) attributes {dimension_semantics = [#tpu.dimension_semantics<arbitrary>], iteration_bounds = array<i64: 1>, scalar_prefetch = 0 : i64, scratch_operands = 0 : i64, tpu.core_type = #tpu.core_type<tc>, window_params = [{pipeline_mode = #tpu.pipeline_mode<synchronous>, transform_indices = @transform_0, window_bounds = array<i64: 9, 512>}, {pipeline_mode = #tpu.pipeline_mode<synchronous>, transform_indices = @transform_1, window_bounds = array<i64: 48, 27>}, {pipeline_mode = #tpu.pipeline_mode<synchronous>, transform_indices = @transform_2, window_bounds = array<i64: 8, 48>}, {pipeline_mode = #tpu.pipeline_mode<synchronous>, transform_indices = @transform_3, window_bounds = array<i64: 8, 512>}]} {
    %c0 = arith.constant 0 : index
    %c0_0 = arith.constant 0 : index
    %0 = vector.load %arg1[%c0, %c0_0] : memref<9x512xf32, #tpu.memory_space<vmem>>, vector<9x512xf32>
    %c0_1 = arith.constant 0 : index
    %c0_2 = arith.constant 0 : index
    %1 = vector.load %arg2[%c0_1, %c0_2] : memref<48x27xf32, #tpu.memory_space<vmem>>, vector<48x27xf32>
    %c0_3 = arith.constant 0 : index
    %c0_4 = arith.constant 0 : index
    %2 = vector.load %arg3[%c0_3, %c0_4] : memref<8x48xbf16, #tpu.memory_space<vmem>>, vector<8x48xbf16>
    %3 = vector.extract_strided_slice %1 {offsets = [0, 0], sizes = [48, 9], strides = [1, 1]} : vector<48x27xf32> to vector<48x9xf32>
    %4 = arith.truncf %3 : vector<48x9xf32> to vector<48x9xbf16>
    %5 = vector.extract_strided_slice %1 {offsets = [0, 9], sizes = [48, 9], strides = [1, 1]} : vector<48x27xf32> to vector<48x9xf32>
    %6 = vector.extract_strided_slice %1 {offsets = [0, 18], sizes = [48, 2], strides = [1, 1]} : vector<48x27xf32> to vector<48x2xf32>
    %7 = vector.extract_strided_slice %1 {offsets = [0, 20], sizes = [48, 2], strides = [1, 1]} : vector<48x27xf32> to vector<48x2xf32>
    %8 = vector.extract_strided_slice %1 {offsets = [0, 22], sizes = [1, 2], strides = [1, 1]} : vector<48x27xf32> to vector<1x2xf32>
    %9 = vector.extract_strided_slice %1 {offsets = [0, 24], sizes = [48, 1], strides = [1, 1]} : vector<48x27xf32> to vector<48x1xf32>
    %10 = vector.extract_strided_slice %1 {offsets = [0, 25], sizes = [48, 1], strides = [1, 1]} : vector<48x27xf32> to vector<48x1xf32>
    %11 = vector.extract_strided_slice %1 {offsets = [0, 26], sizes = [8, 1], strides = [1, 1]} : vector<48x27xf32> to vector<8x1xf32>
    %12 = arith.truncf %0 : vector<9x512xf32> to vector<9x512xbf16>
    %cst = arith.constant dense<0.000000e+00> : vector<48x512xf32>
    %13 = tpu.matmul %4, %12, %cst {dimension_numbers = #tpu.dot_dimension_numbers<[1], [0], [0], [1], [0, 0, 1, 1], [], []>} : vector<48x9xbf16>, vector<9x512xbf16>, vector<48x512xf32> -> vector<48x512xf32>
    %cst_5 = arith.constant 5.000000e-01 : f32
    %14 = vector.broadcast %cst_5 : f32 to vector<48x512xf32>
    %15 = arith.mulf %14, %13 : vector<48x512xf32>
    %16 = math.tanh %15 : vector<48x512xf32>
    %cst_6 = arith.constant 5.000000e-01 : f32
    %17 = vector.broadcast %cst_6 : f32 to vector<48x512xf32>
    %18 = arith.mulf %17, %16 : vector<48x512xf32>
    %cst_7 = arith.constant 5.000000e-01 : f32
    %19 = vector.broadcast %cst_7 : f32 to vector<48x512xf32>
    %20 = arith.addf %18, %19 : vector<48x512xf32>
    %21 = arith.mulf %13, %20 : vector<48x512xf32>
    %22 = tpu.iota {dimensions = array<i32: 1>} : vector<1x512xi32>
    %c4_i32 = arith.constant 4 : i32
    %23 = vector.broadcast %c4_i32 : i32 to vector<1x512xi32>
    %24 = arith.shrsi %22, %23 : vector<1x512xi32>
    %c15_i32 = arith.constant 15 : i32
    %25 = vector.broadcast %c15_i32 : i32 to vector<1x512xi32>
    %26 = arith.andi %24, %25 : vector<1x512xi32>
    %c15_i32_8 = arith.constant 15 : i32
    %27 = vector.broadcast %c15_i32_8 : i32 to vector<1x512xi32>
    %28 = arith.andi %22, %27 : vector<1x512xi32>
    %c1_i32 = arith.constant 1 : i32
    %29 = vector.broadcast %c1_i32 : i32 to vector<1x512xi32>
    %30 = arith.cmpi sge, %26, %29 : vector<1x512xi32>
    %c15_i32_9 = arith.constant 15 : i32
    %31 = vector.broadcast %c15_i32_9 : i32 to vector<1x512xi32>
    %32 = arith.cmpi slt, %26, %31 : vector<1x512xi32>
    %c1_i32_10 = arith.constant 1 : i32
    %33 = vector.broadcast %c1_i32_10 : i32 to vector<1x512xi32>
    %34 = arith.cmpi sge, %28, %33 : vector<1x512xi32>
    %c15_i32_11 = arith.constant 15 : i32
    %35 = vector.broadcast %c15_i32_11 : i32 to vector<1x512xi32>
    %36 = arith.cmpi slt, %28, %35 : vector<1x512xi32>
    %37 = vector.extract_strided_slice %5 {offsets = [0, 4], sizes = [48, 1], strides = [1, 1]} : vector<48x9xf32> to vector<48x1xf32>
    %38 = vector.broadcast %37 : vector<48x1xf32> to vector<48x512xf32>
    %39 = arith.mulf %21, %38 : vector<48x512xf32>
    %c17_i32 = arith.constant 17 : i32
    %40 = tpu.dynamic_rotate %21 by %c17_i32 dim 1 : vector<48x512xf32>, i32 -> vector<48x512xf32>
    %41 = vector.extract_strided_slice %5 {offsets = [0, 0], sizes = [48, 1], strides = [1, 1]} : vector<48x9xf32> to vector<48x1xf32>
    %42 = arith.andi %30, %34 : vector<1x512xi1>
    %43 = vector.broadcast %41 : vector<48x1xf32> to vector<48x512xf32>
    %44 = arith.mulf %40, %43 : vector<48x512xf32>
    %cst_12 = arith.constant 0.000000e+00 : f32
    %45 = vector.shape_cast %42 : vector<1x512xi1> to vector<1x512xi1>
    %46 = vector.broadcast %45 : vector<1x512xi1> to vector<48x512xi1>
    %47 = vector.broadcast %cst_12 : f32 to vector<48x512xf32>
    %48 = arith.select %46, %44, %47 : vector<48x512xi1>, vector<48x512xf32>
    %49 = arith.addf %39, %48 : vector<48x512xf32>
    %c16_i32 = arith.constant 16 : i32
    %50 = tpu.dynamic_rotate %21 by %c16_i32 dim 1 : vector<48x512xf32>, i32 -> vector<48x512xf32>
    %51 = vector.extract_strided_slice %5 {offsets = [0, 1], sizes = [48, 1], strides = [1, 1]} : vector<48x9xf32> to vector<48x1xf32>
    %52 = vector.broadcast %51 : vector<48x1xf32> to vector<48x512xf32>
    %53 = arith.mulf %50, %52 : vector<48x512xf32>
    %cst_13 = arith.constant 0.000000e+00 : f32
    %54 = vector.shape_cast %30 : vector<1x512xi1> to vector<1x512xi1>
    %55 = vector.broadcast %54 : vector<1x512xi1> to vector<48x512xi1>
    %56 = vector.broadcast %cst_13 : f32 to vector<48x512xf32>
    %57 = arith.select %55, %53, %56 : vector<48x512xi1>, vector<48x512xf32>
    %58 = arith.addf %49, %57 : vector<48x512xf32>
    %c15_i32_14 = arith.constant 15 : i32
    %59 = tpu.dynamic_rotate %21 by %c15_i32_14 dim 1 : vector<48x512xf32>, i32 -> vector<48x512xf32>
    %60 = vector.extract_strided_slice %5 {offsets = [0, 2], sizes = [48, 1], strides = [1, 1]} : vector<48x9xf32> to vector<48x1xf32>
    %61 = arith.andi %30, %36 : vector<1x512xi1>
    %62 = vector.broadcast %60 : vector<48x1xf32> to vector<48x512xf32>
    %63 = arith.mulf %59, %62 : vector<48x512xf32>
    %cst_15 = arith.constant 0.000000e+00 : f32
    %64 = vector.shape_cast %61 : vector<1x512xi1> to vector<1x512xi1>
    %65 = vector.broadcast %64 : vector<1x512xi1> to vector<48x512xi1>
    %66 = vector.broadcast %cst_15 : f32 to vector<48x512xf32>
    %67 = arith.select %65, %63, %66 : vector<48x512xi1>, vector<48x512xf32>
    %68 = arith.addf %58, %67 : vector<48x512xf32>
    %c1_i32_16 = arith.constant 1 : i32
    %69 = tpu.dynamic_rotate %21 by %c1_i32_16 dim 1 : vector<48x512xf32>, i32 -> vector<48x512xf32>
    %70 = vector.extract_strided_slice %5 {offsets = [0, 3], sizes = [48, 1], strides = [1, 1]} : vector<48x9xf32> to vector<48x1xf32>
    %71 = vector.broadcast %70 : vector<48x1xf32> to vector<48x512xf32>
    %72 = arith.mulf %69, %71 : vector<48x512xf32>
    %cst_17 = arith.constant 0.000000e+00 : f32
    %73 = vector.shape_cast %34 : vector<1x512xi1> to vector<1x512xi1>
    %74 = vector.broadcast %73 : vector<1x512xi1> to vector<48x512xi1>
    %75 = vector.broadcast %cst_17 : f32 to vector<48x512xf32>
    %76 = arith.select %74, %72, %75 : vector<48x512xi1>, vector<48x512xf32>
    %77 = arith.addf %68, %76 : vector<48x512xf32>
    %c511_i32 = arith.constant 511 : i32
    %78 = tpu.dynamic_rotate %21 by %c511_i32 dim 1 : vector<48x512xf32>, i32 -> vector<48x512xf32>
    %79 = vector.extract_strided_slice %5 {offsets = [0, 5], sizes = [48, 1], strides = [1, 1]} : vector<48x9xf32> to vector<48x1xf32>
    %80 = vector.broadcast %79 : vector<48x1xf32> to vector<48x512xf32>
    %81 = arith.mulf %78, %80 : vector<48x512xf32>
    %cst_18 = arith.constant 0.000000e+00 : f32
    %82 = vector.shape_cast %36 : vector<1x512xi1> to vector<1x512xi1>
    %83 = vector.broadcast %82 : vector<1x512xi1> to vector<48x512xi1>
    %84 = vector.broadcast %cst_18 : f32 to vector<48x512xf32>
    %85 = arith.select %83, %81, %84 : vector<48x512xi1>, vector<48x512xf32>
    %86 = arith.addf %77, %85 : vector<48x512xf32>
    %c497_i32 = arith.constant 497 : i32
    %87 = tpu.dynamic_rotate %21 by %c497_i32 dim 1 : vector<48x512xf32>, i32 -> vector<48x512xf32>
    %88 = vector.extract_strided_slice %5 {offsets = [0, 6], sizes = [48, 1], strides = [1, 1]} : vector<48x9xf32> to vector<48x1xf32>
    %89 = arith.andi %32, %34 : vector<1x512xi1>
    %90 = vector.broadcast %88 : vector<48x1xf32> to vector<48x512xf32>
    %91 = arith.mulf %87, %90 : vector<48x512xf32>
    %cst_19 = arith.constant 0.000000e+00 : f32
    %92 = vector.shape_cast %89 : vector<1x512xi1> to vector<1x512xi1>
    %93 = vector.broadcast %92 : vector<1x512xi1> to vector<48x512xi1>
    %94 = vector.broadcast %cst_19 : f32 to vector<48x512xf32>
    %95 = arith.select %93, %91, %94 : vector<48x512xi1>, vector<48x512xf32>
    %96 = arith.addf %86, %95 : vector<48x512xf32>
    %c496_i32 = arith.constant 496 : i32
    %97 = tpu.dynamic_rotate %21 by %c496_i32 dim 1 : vector<48x512xf32>, i32 -> vector<48x512xf32>
    %98 = vector.extract_strided_slice %5 {offsets = [0, 7], sizes = [48, 1], strides = [1, 1]} : vector<48x9xf32> to vector<48x1xf32>
    %99 = vector.broadcast %98 : vector<48x1xf32> to vector<48x512xf32>
    %100 = arith.mulf %97, %99 : vector<48x512xf32>
    %cst_20 = arith.constant 0.000000e+00 : f32
    %101 = vector.shape_cast %32 : vector<1x512xi1> to vector<1x512xi1>
    %102 = vector.broadcast %101 : vector<1x512xi1> to vector<48x512xi1>
    %103 = vector.broadcast %cst_20 : f32 to vector<48x512xf32>
    %104 = arith.select %102, %100, %103 : vector<48x512xi1>, vector<48x512xf32>
    %105 = arith.addf %96, %104 : vector<48x512xf32>
    %c495_i32 = arith.constant 495 : i32
    %106 = tpu.dynamic_rotate %21 by %c495_i32 dim 1 : vector<48x512xf32>, i32 -> vector<48x512xf32>
    %107 = vector.extract_strided_slice %5 {offsets = [0, 8], sizes = [48, 1], strides = [1, 1]} : vector<48x9xf32> to vector<48x1xf32>
    %108 = arith.andi %32, %36 : vector<1x512xi1>
    %109 = vector.broadcast %107 : vector<48x1xf32> to vector<48x512xf32>
    %110 = arith.mulf %106, %109 : vector<48x512xf32>
    %cst_21 = arith.constant 0.000000e+00 : f32
    %111 = vector.shape_cast %108 : vector<1x512xi1> to vector<1x512xi1>
    %112 = vector.broadcast %111 : vector<1x512xi1> to vector<48x512xi1>
    %113 = vector.broadcast %cst_21 : f32 to vector<48x512xf32>
    %114 = arith.select %112, %110, %113 : vector<48x512xi1>, vector<48x512xf32>
    %115 = arith.addf %105, %114 : vector<48x512xf32>
    %116 = vector.broadcast %9 : vector<48x1xf32> to vector<48x512xf32>
    %117 = arith.addf %115, %116 : vector<48x512xf32>
    %cst_22 = arith.constant 5.000000e-01 : f32
    %118 = vector.broadcast %cst_22 : f32 to vector<48x512xf32>
    %119 = arith.mulf %118, %117 : vector<48x512xf32>
    %120 = math.tanh %119 : vector<48x512xf32>
    %cst_23 = arith.constant 5.000000e-01 : f32
    %121 = vector.broadcast %cst_23 : f32 to vector<48x512xf32>
    %122 = arith.mulf %121, %120 : vector<48x512xf32>
    %cst_24 = arith.constant 5.000000e-01 : f32
    %123 = vector.broadcast %cst_24 : f32 to vector<48x512xf32>
    %124 = arith.addf %122, %123 : vector<48x512xf32>
    %125 = arith.mulf %117, %124 : vector<48x512xf32>
    %c8_i32 = arith.constant 8 : i32
    %126 = vector.broadcast %c8_i32 : i32 to vector<1x512xi32>
    %127 = arith.shrsi %22, %126 : vector<1x512xi32>
    %c0_i32 = arith.constant 0 : i32
    %128 = vector.broadcast %c0_i32 : i32 to vector<1x512xi32>
    %129 = arith.cmpi eq, %127, %128 : vector<1x512xi32>
    %cst_25 = arith.constant 0.000000e+00 : f32
    %130 = vector.shape_cast %129 : vector<1x512xi1> to vector<1x512xi1>
    %131 = vector.broadcast %130 : vector<1x512xi1> to vector<48x512xi1>
    %132 = vector.broadcast %cst_25 : f32 to vector<48x512xf32>
    %133 = arith.select %131, %125, %132 : vector<48x512xi1>, vector<48x512xf32>
    %cst_26 = arith.constant dense<0.000000e+00> : vector<48xf32>
    %134 = vector.multi_reduction <add>, %133, %cst_26 [1] : vector<48x512xf32> to vector<48xf32>
    %135 = vector.shape_cast %134 : vector<48xf32> to vector<48x1xf32>
    %cst_27 = arith.constant 3.906250e-03 : f32
    %136 = vector.broadcast %cst_27 : f32 to vector<48x1xf32>
    %137 = arith.mulf %135, %136 : vector<48x1xf32>
    %138 = vector.broadcast %137 : vector<48x1xf32> to vector<48x2xf32>
    %139 = arith.mulf %7, %138 : vector<48x2xf32>
    %cst_28 = arith.constant dense<0.000000e+00> : vector<2xf32>
    %140 = vector.multi_reduction <add>, %139, %cst_28 [0] : vector<48x2xf32> to vector<2xf32>
    %141 = vector.shape_cast %140 : vector<2xf32> to vector<1x2xf32>
    %142 = arith.addf %141, %8 : vector<1x2xf32>
    %cst_29 = arith.constant 5.000000e-01 : f32
    %143 = vector.broadcast %cst_29 : f32 to vector<1x2xf32>
    %144 = arith.mulf %143, %142 : vector<1x2xf32>
    %145 = math.tanh %144 : vector<1x2xf32>
    %cst_30 = arith.constant 5.000000e-01 : f32
    %146 = vector.broadcast %cst_30 : f32 to vector<1x2xf32>
    %147 = arith.mulf %146, %145 : vector<1x2xf32>
    %cst_31 = arith.constant 5.000000e-01 : f32
    %148 = vector.broadcast %cst_31 : f32 to vector<1x2xf32>
    %149 = arith.addf %147, %148 : vector<1x2xf32>
    %150 = arith.mulf %142, %149 : vector<1x2xf32>
    %151 = vector.broadcast %150 : vector<1x2xf32> to vector<48x2xf32>
    %152 = arith.mulf %6, %151 : vector<48x2xf32>
    %cst_32 = arith.constant dense<0.000000e+00> : vector<48xf32>
    %153 = vector.multi_reduction <add>, %152, %cst_32 [1] : vector<48x2xf32> to vector<48xf32>
    %154 = vector.shape_cast %153 : vector<48xf32> to vector<48x1xf32>
    %155 = arith.addf %154, %10 : vector<48x1xf32>
    %cst_33 = arith.constant 5.000000e-01 : f32
    %156 = vector.broadcast %cst_33 : f32 to vector<48x1xf32>
    %157 = arith.mulf %156, %155 : vector<48x1xf32>
    %158 = math.tanh %157 : vector<48x1xf32>
    %cst_34 = arith.constant 5.000000e-01 : f32
    %159 = vector.broadcast %cst_34 : f32 to vector<48x1xf32>
    %160 = arith.mulf %159, %158 : vector<48x1xf32>
    %cst_35 = arith.constant 5.000000e-01 : f32
    %161 = vector.broadcast %cst_35 : f32 to vector<48x1xf32>
    %162 = arith.addf %160, %161 : vector<48x1xf32>
    %c1_i32_36 = arith.constant 1 : i32
    %163 = vector.broadcast %c1_i32_36 : i32 to vector<1x512xi32>
    %164 = arith.cmpi eq, %127, %163 : vector<1x512xi32>
    %cst_37 = arith.constant 0.000000e+00 : f32
    %165 = vector.shape_cast %164 : vector<1x512xi1> to vector<1x512xi1>
    %166 = vector.broadcast %165 : vector<1x512xi1> to vector<48x512xi1>
    %167 = vector.broadcast %cst_37 : f32 to vector<48x512xf32>
    %168 = arith.select %166, %125, %167 : vector<48x512xi1>, vector<48x512xf32>
    %cst_38 = arith.constant dense<0.000000e+00> : vector<48xf32>
    %169 = vector.multi_reduction <add>, %168, %cst_38 [1] : vector<48x512xf32> to vector<48xf32>
    %170 = vector.shape_cast %169 : vector<48xf32> to vector<48x1xf32>
    %cst_39 = arith.constant 3.906250e-03 : f32
    %171 = vector.broadcast %cst_39 : f32 to vector<48x1xf32>
    %172 = arith.mulf %170, %171 : vector<48x1xf32>
    %173 = vector.broadcast %172 : vector<48x1xf32> to vector<48x2xf32>
    %174 = arith.mulf %7, %173 : vector<48x2xf32>
    %cst_40 = arith.constant dense<0.000000e+00> : vector<2xf32>
    %175 = vector.multi_reduction <add>, %174, %cst_40 [0] : vector<48x2xf32> to vector<2xf32>
    %176 = vector.shape_cast %175 : vector<2xf32> to vector<1x2xf32>
    %177 = arith.addf %176, %8 : vector<1x2xf32>
    %cst_41 = arith.constant 5.000000e-01 : f32
    %178 = vector.broadcast %cst_41 : f32 to vector<1x2xf32>
    %179 = arith.mulf %178, %177 : vector<1x2xf32>
    %180 = math.tanh %179 : vector<1x2xf32>
    %cst_42 = arith.constant 5.000000e-01 : f32
    %181 = vector.broadcast %cst_42 : f32 to vector<1x2xf32>
    %182 = arith.mulf %181, %180 : vector<1x2xf32>
    %cst_43 = arith.constant 5.000000e-01 : f32
    %183 = vector.broadcast %cst_43 : f32 to vector<1x2xf32>
    %184 = arith.addf %182, %183 : vector<1x2xf32>
    %185 = arith.mulf %177, %184 : vector<1x2xf32>
    %186 = vector.broadcast %185 : vector<1x2xf32> to vector<48x2xf32>
    %187 = arith.mulf %6, %186 : vector<48x2xf32>
    %cst_44 = arith.constant dense<0.000000e+00> : vector<48xf32>
    %188 = vector.multi_reduction <add>, %187, %cst_44 [1] : vector<48x2xf32> to vector<48xf32>
    %189 = vector.shape_cast %188 : vector<48xf32> to vector<48x1xf32>
    %190 = arith.addf %189, %10 : vector<48x1xf32>
    %cst_45 = arith.constant 5.000000e-01 : f32
    %191 = vector.broadcast %cst_45 : f32 to vector<48x1xf32>
    %192 = arith.mulf %191, %190 : vector<48x1xf32>
    %193 = math.tanh %192 : vector<48x1xf32>
    %cst_46 = arith.constant 5.000000e-01 : f32
    %194 = vector.broadcast %cst_46 : f32 to vector<48x1xf32>
    %195 = arith.mulf %194, %193 : vector<48x1xf32>
    %cst_47 = arith.constant 5.000000e-01 : f32
    %196 = vector.broadcast %cst_47 : f32 to vector<48x1xf32>
    %197 = arith.addf %195, %196 : vector<48x1xf32>
    %198 = vector.shape_cast %164 : vector<1x512xi1> to vector<1x512xi1>
    %199 = vector.broadcast %198 : vector<1x512xi1> to vector<48x512xi1>
    %200 = vector.shape_cast %197 : vector<48x1xf32> to vector<48x1xf32>
    %201 = vector.broadcast %200 : vector<48x1xf32> to vector<48x512xf32>
    %202 = vector.shape_cast %162 : vector<48x1xf32> to vector<48x1xf32>
    %203 = vector.broadcast %202 : vector<48x1xf32> to vector<48x512xf32>
    %204 = arith.select %199, %201, %203 : vector<48x512xi1>, vector<48x512xf32>
    %205 = arith.mulf %125, %204 : vector<48x512xf32>
    %206 = arith.truncf %205 : vector<48x512xf32> to vector<48x512xbf16>
    %cst_48 = arith.constant dense<0.000000e+00> : vector<8x512xf32>
    %207 = tpu.matmul %2, %206, %cst_48 {dimension_numbers = #tpu.dot_dimension_numbers<[1], [0], [0], [1], [0, 0, 1, 1], [], []>} : vector<8x48xbf16>, vector<48x512xbf16>, vector<8x512xf32> -> vector<8x512xf32>
    %208 = vector.broadcast %11 : vector<8x1xf32> to vector<8x512xf32>
    %209 = arith.addf %207, %208 : vector<8x512xf32>
    %210 = vector.extract_strided_slice %0 {offsets = [0, 0], sizes = [8, 512], strides = [1, 1]} : vector<9x512xf32> to vector<8x512xf32>
    %211 = arith.addf %209, %210 : vector<8x512xf32>
    %c0_49 = arith.constant 0 : index
    %c0_50 = arith.constant 0 : index
    %212 = vector.load %arg4[%c0_49, %c0_50] : memref<8x512xf32, #tpu.memory_space<vmem>>, vector<8x512xf32>
    tpu.vector_store %arg4[%c0_49, %c0_50], %211 {strides = array<i32>} : memref<8x512xf32, #tpu.memory_space<vmem>>, vector<8x512xf32>,
    return
  }
  func.func @transform_0(%arg0: i32) -> (i32, i32) {
    %c0_i32 = arith.constant 0 : i32
    %c0_i32_0 = arith.constant 0 : i32
    %c0_i32_1 = arith.constant 0 : i32
    return %c0_i32, %c0_i32_0 : i32, i32
  }
  func.func @transform_1(%arg0: i32) -> (i32, i32) {
    %c0_i32 = arith.constant 0 : i32
    %c0_i32_0 = arith.constant 0 : i32
    %c0_i32_1 = arith.constant 0 : i32
    return %c0_i32, %c0_i32_0 : i32, i32
  }
  func.func @transform_2(%arg0: i32) -> (i32, i32) {
    %c0_i32 = arith.constant 0 : i32
    %c0_i32_0 = arith.constant 0 : i32
    %c0_i32_1 = arith.constant 0 : i32
    return %c0_i32, %c0_i32_0 : i32, i32
  }
  func.func @transform_3(%arg0: i32) -> (i32, i32) {
    %c0_i32 = arith.constant 0 : i32
    %c0_i32_0 = arith.constant 0 : i32
    %c0_i32_1 = arith.constant 0 : i32
    return %c0_i32, %c0_i32_0 : i32, i32
  }
}

</mosaic_0001>

<bundles_post_ra>
// kernel: tpu_custom_call.1
= control target key start
LH: loop header
LB: loop body
LE: loop exit
PB: predicated region body
PF: predicated region fallthrough
CT: control target
= control target key end

     0   :  { %vm48_vm0 = vcmask 1043456   ;;  %vm49_vm1 = vcmask 1044480   ;;  %v2850_v3 = vmov 65535   ;;  %v2851_v13 = vmov 0   ;;  %s6568_s0 = inlined_call_operand.vmem [shape: f32[9,512], index: 0, kind: input, shape index: {}]   ;;  %s6569_s1 = inlined_call_operand.vmem [shape: f32[48,27], index: 1, kind: input, shape index: {}]   ;;  %s6570_s2 = inlined_call_operand.vmem [shape: bf16[8,48], index: 2, kind: input, shape index: {}]   ;;  %s6571_s3 = inlined_call_operand.hbm [shape: f32[8,512], index: 3, kind: output, shape index: {}]  }
   0x1   :  { %v17_v0 = vld [vmem:[%s6568_s0 + $0x8] sm:$0xff]  ;;  %v50_v4 = vsel %vm48_vm0, 4294967295, %v2850_v3  ;;  %v19_v5 = vld [vmem:[%s6568_s0 + $0x18] sm:$0xff]  ;;  %v16_v7 = vld [vmem:[%s6568_s0] sm:$0xff]  ;;  %96 = vmatprep.mubr.bf16.mxu0 %v2851_v13  ;;  %159 = vmatprep.mubr.bf16.mxu1 %v2851_v13 }
   0x2   :  { %v21_v1 = vld [vmem:[%s6568_s0 + $0x28] sm:$0x1]  ;;  %v23_v6 = vld [vmem:[%s6568_s0 + $0x38] sm:$0x1]  ;;  %v51_v8 = vsel %vm49_vm1, %v50_v4, 0  ;;  %v18_v11 = vld [vmem:[%s6568_s0 + $0x10] sm:$0xff] }
   0x3   :  { %v35_v2 = vpack.c.bf16 %v21_v1, %v17_v0  ;;  %v37_v9 = vpack.c.bf16 %v23_v6, %v19_v5  ;;  %v20_v10 = vld [vmem:[%s6568_s0 + $0x20] sm:$0x1]  ;;  %v22_v12 = vld [vmem:[%s6568_s0 + $0x30] sm:$0x1]  ;;  %v2927_v18 = vld [vmem:[%s6569_s1 + $0x8] sm:$0xff] }
   0x4   :  { %v34_v15 = vpack.c.bf16 %v20_v10, %v16_v7  ;;  %v36_v16 = vpack.c.bf16 %v22_v12, %v18_v11  ;;  %v2922_v17 = vld [vmem:[%s6569_s1] sm:$0xff] }
   0x5   :  { %v56_v14 = vand.u32 %v51_v8, %v35_v2  ;;  %v62_v19 = vand.u32 %v51_v8, %v37_v9 }
   0x6   :  { %v53_v20 = vand.u32 %v51_v8, %v34_v15  ;;  %v59_v21 = vand.u32 %v51_v8, %v36_v16 }
   0x7   :  { %64 = vmatprep.subr.bf16.mxu0 %v56_v14 }
   0x8   :  { %8 = vsyncpa [#allocation3], 0  ;;  %127 = vmatprep.subr.bf16.mxu1 %v62_v19  ;;  %v31_v22 = vpack.c.bf16 %v2927_v18, %v2922_v17  ;;  %v2852_v23 = vmov 13   ;;  %65 = vmatpush1.bf16.msra.mxu0 %v53_v20  ;;  %vm38_vm2 = vcmask 72704   ;;  %v2934_v24 = vld [vmem:[%s6569_s1 + $0x10] sm:$0xff]  ;;  %v2943_v25 = vld [vmem:[%s6569_s1 + $0x18] sm:$0xff] }
   0x9   :  { %2645 = vset.pattern.permute.xlu0 %v2852_v23  ;;  %128 = vmatpush1.bf16.msra.mxu1 %v59_v21  ;;  %v32_v26 = vpack.c.bf16 %v2943_v25, %v2934_v24  ;;  %v2952_v27 = vld [vmem:[%s6569_s1 + $0x20] sm:$0xff]  ;;  %v2957_v28 = vld [vmem:[%s6569_s1 + $0x28] sm:$0xff]  ;;  %v2853_v29 = vmov 9   ;;  %v2854_v31 = vmov 10   ;;  %v2855_v32 = vmov 11   ;;  %s2860_s13 = smov 16  }
   0xa   :  { %345 = vperm.xlu0 %2645, %v2922_v17   ;;  %2646 = vset.pattern.permute.xlu1 %v2852_v23  ;;  %v33_v30 = vpack.c.bf16 %v2957_v28, %v2952_v27  ;;  %v2856_v33 = vmov 12   ;;  %v2857_v34 = vmov 14   ;;  %v6574_v35 = vmov 15   ;;  %s2861_s14 = smov 17   ;;  %s2862_s15 = smov 15  }
   0xb   :  { %355 = vperm.xlu1 %2646, %v2934_v24   ;;  %2612 = vmatmul.mubr.msk.bf16.vlgmr.msra.gmra.mrb[0].mxu0 %vm38_vm2, %v31_v22  ;;  %v6575_v36 = vmov 16   ;;  %s2863_s16 = smov 1   ;;  %s2864_s17 = smov 127  }
   0xc   :  { %2615 = vmatmul.mubr.msk.bf16.vlgmr.msra.gmra.mrb[0].mxu1 %vm38_vm2, %v31_v22  ;;  %106 = vmatprep.mubr.bf16.mxu0 %v2851_v13  ;;  %s2866_s18 = smov 113   ;;  %s2867_s19 = smov 112  }
   0xd   :  { %169 = vmatprep.mubr.bf16.mxu1 %v2851_v13  ;;  %s2869_s30 = smov 111   ;;  %s2870_s10 = smov 126  }
   0xe   :  { %350 = vperm.xlu0 %2645, %v2927_v18   ;;  %s2874_s23 = smov [#allocation2]  }
   0xf   :  { %360 = vperm.xlu1 %2646, %v2943_v25   ;;  %s2604_s24 = sshll.u32 %s2874_s23, 4  ;;  %s2605_s24 = int_to_ptr.vmem [resolvable:$true] %s2604_s24 }
  0x10   :  { %s2826_s5 = scalar_lea.vmem %s2605_s24, 512  ;;  %p2831_p1 = scmp.lt.s32.totalorder %s2605_s24, %s2605_s24 }
  0x11   :  { %p2827_p0 = scmp.ne.s32.totalorder %s2605_s24, %s2826_s5  ;;  %p2832_p2 = scmp.lt.s32.totalorder %s2826_s5, %s2826_s5 }
  0x12   :  { %365 = vperm.xlu0 %2645, %v2952_v27  }
  0x13   :  { %370 = vperm.xlu1 %2646, %v2957_v28   ;;  %2613 = vmatmul.mubr.msk.bf16.gmra.mrb[4].mxu0 %vm38_vm2, %v32_v26  ;;  %p2833_p3 = por %p2832_p2, %p2831_p1 }
  0x14   :  { %2616 = vmatmul.mubr.msk.bf16.gmra.mrb[4].mxu1 %vm38_vm2, %v32_v26  ;;  %116 = vmatprep.mubr.bf16.mxu0 %v2851_v13 }
  0x15   :  { %179 = vmatprep.mubr.bf16.mxu1 %v2851_v13  ;;  %p2834_p4 = pnand %p2833_p3, %p2827_p0 }
  0x16   :  { %2647 = vset.pattern.permute.xlu0 %v2853_v29 }
  0x17   :  { %2648 = vset.pattern.permute.xlu1 %v2853_v29  ;;  %475 = vperm.xlu0 %2647, %v2922_v17  }
  0x18   :  { %479 = vperm.xlu1 %2648, %v2927_v18  }
  0x1b   :  { %487 = vperm.xlu0 %2647, %v2943_v25   ;;  %2614 = vmatmul.mubr.msk.bf16.gmra.mrb[8].mxu0 %vm38_vm2, %v33_v30 }
  0x1c   :  { %2617 = vmatmul.mubr.msk.bf16.gmra.mrb[8].mxu1 %vm38_vm2, %v33_v30  ;;  %483 = vperm.xlu1 %2648, %v2934_v24  }
  0x1d   :  { %2540 = vmatprep.mubr.bf16.mxu0 %v2851_v13  ;;  %2581 = vmatprep.mubr.bf16.mxu1 %v2851_v13 }
  0x1f   :  { %2649 = vset.pattern.permute.xlu0 %v2854_v31 }
  0x20   :  { %652 = vperm.xlu0 %2649, %v2922_v17   ;;  %491 = vperm.xlu1 %2648, %v2952_v27  }
  0x24   :  { %2651 = vset.pattern.permute.xlu0 %v2855_v32  ;;  %2650 = vset.pattern.permute.xlu1 %v2854_v31 }
  0x25   :  { %833 = vperm.xlu0 %2651, %v2922_v17   ;;  %656 = vperm.xlu1 %2650, %v2927_v18  }
  0x29   :  { %841 = vperm.xlu0 %2651, %v2934_v24   ;;  %660 = vperm.xlu1 %2650, %v2934_v24  }
  0x2d   :  { %845 = vperm.xlu0 %2651, %v2943_v25   ;;  %2652 = vset.pattern.permute.xlu1 %v2855_v32 }
  0x2e   :  { %837 = vperm.xlu1 %2652, %v2927_v18  }
  0x31   :  { %849 = vperm.xlu0 %2651, %v2952_v27  }
  0x32   :  { %2653 = vset.pattern.permute.xlu1 %v2854_v31 }
  0x33   :  { %664 = vperm.xlu1 %2653, %v2943_v25  }
  0x35   :  { %853 = vperm.xlu0 %2651, %v2957_v28  }
  0x37   :  { %2654 = vset.pattern.permute.xlu1 %v2856_v33 }
  0x38   :  { %1010 = vperm.xlu1 %2654, %v2922_v17  }
  0x39   :  { %2663 = vset.pattern.permute.xlu0 %v2856_v33 }
  0x3a   :  { %1014 = vperm.xlu0 %2663, %v2927_v18  }
  0x3c   :  { %2655 = vset.pattern.permute.xlu1 %v2853_v29 }
  0x3d   :  { %495 = vperm.xlu1 %2655, %v2957_v28  }
  0x3e   :  { %1026 = vperm.xlu0 %2663, %v2952_v27  }
  0x41   :  { %2656 = vset.pattern.permute.xlu1 %v2854_v31 }
  0x42   :  { %1030 = vperm.xlu0 %2663, %v2957_v28   ;;  %668 = vperm.xlu1 %2656, %v2952_v27  }
  0x46   :  { %2667 = vset.pattern.permute.xlu0 %v2857_v34  ;;  %2657 = vset.pattern.permute.xlu1 %v2856_v33 }
  0x47   :  { %1191 = vperm.xlu0 %2667, %v2927_v18   ;;  %1018 = vperm.xlu1 %2657, %v2934_v24  }
  0x4b   :  { %1203 = vperm.xlu0 %2667, %v2952_v27   ;;  %2658 = vset.pattern.permute.xlu1 %v2857_v34 }
  0x4c   :  { %1187 = vperm.xlu1 %2658, %v2922_v17  }
  0x50   :  { %2659 = vset.pattern.permute.xlu1 %v2854_v31 }
  0x51   :  { %672 = vperm.xlu1 %2659, %v2957_v28  }
  0x55   :  { %2660 = vset.pattern.permute.xlu1 %v2856_v33 }
  0x56   :  { %1022 = vperm.xlu1 %2660, %v2943_v25  }
  0x5a   :  { %2661 = vset.pattern.permute.xlu1 %v2857_v34 }
  0x5b   :  { %1195 = vperm.xlu1 %2661, %v2934_v24  }
  0x5f   :  { %2662 = vset.pattern.permute.xlu1 %v6574_v35 }
  0x60   :  { %1372 = vperm.xlu1 %2662, %v2927_v18  }
  0x64   :  { %2664 = vset.pattern.permute.xlu1 %v2857_v34 }
  0x65   :  { %1199 = vperm.xlu1 %2664, %v2943_v25  }
  0x69   :  { %2665 = vset.pattern.permute.xlu1 %v6574_v35 }
  0x6a   :  { %1376 = vperm.xlu1 %2665, %v2934_v24  }
  0x6e   :  { %2666 = vset.pattern.permute.xlu1 %v6575_v36 }
  0x6f   :  { %1549 = vperm.xlu1 %2666, %v2927_v18  }
  0x73   :  { %2668 = vset.pattern.permute.xlu1 %v6574_v35 }
  0x74   :  { %1380 = vperm.xlu1 %2668, %v2943_v25  }
  0x78   :  { %2669 = vset.pattern.permute.xlu1 %v6575_v36 }
  0x79   :  { %1553 = vperm.xlu1 %2669, %v2934_v24  }
  0x8a   :  { %v3006_v37 = vpop.permute.xlu1 %355 }
  0x8e   :  { %v3008_v38 = vpop.permute.xlu1 %360 }
  0x92   :  { %v3010_v39 = vpop.permute.xlu1 %370 }
  0x97   :  { %v3024_v50 = vpop.permute.xlu1 %479 }
  0x98   :  { %6879 = vst [vmem:[#allocation5_spill] sm:$0xff] %v3024_v50 }
  0x9b   :  { %v3043_v0 = vpop.permute.xlu1 %483 }
  0x9c   :  { %6880 = vst [vmem:[#allocation6_spill] sm:$0xff] %v3043_v0 }
  0x9f   :  { %v3075_v15 = vpop.permute.xlu1 %491 }
  0xa0   :  { %6881 = vst [vmem:[#allocation7_spill] sm:$0xff] %v3075_v15 }
  0xa4   :  { %v3082_v20 = vpop.permute.xlu1 %656 }
  0xa5   :  { %6882 = vst [vmem:[#allocation8_spill] sm:$0xff] %v3082_v20 }
  0xa8   :  { %v3088_v29 = vpop.permute.xlu1 %660 }
  0xa9   :  { %6883 = vst [vmem:[#allocation9_spill] sm:$0xff] %v3088_v29 }
  0xad   :  { %v3097_v34 = vpop.permute.xlu1 %837 }
  0xae   :  { %6884 = vst [vmem:[#allocation10_spill] sm:$0xff] %v3097_v34 }
  0xde   :  { %v98_v40 = vpop.f32.mrb[0].mxu0 }
  0xdf   :  { %v161_v41 = vpop.f32.mrb[0].mxu1  ;;  %v190_v42 = vmul.f32 0.5, %v98_v40  ;;  %v3012_v44 = vpop.f32.mrb[1].mxu0 }
  0xe0   :  { %v192_v43 = vmul.f32 0.5, %v161_v41  ;;  %v3014_v45 = vpop.f32.mrb[1].mxu1  ;;  %v3016_v46 = vpop.f32.mrb[2].mxu0  ;;  %v191_v60 = vmul.f32 0.5, %v3012_v44 }
  0xe1   :  { %v3018_v47 = vpop.f32.mrb[2].mxu1  ;;  %2685 = vtanh.f32 %v190_v42  ;;  %v3020_v48 = vpop.f32.mrb[3].mxu0  ;;  %v193_v4 = vmul.f32 0.5, %v3014_v45  ;;  %v194_v13 = vmul.f32 0.5, %v3016_v46 }
  0xe2   :  { %v3022_v49 = vpop.f32.mrb[3].mxu1  ;;  %2687 = vtanh.f32 %v192_v43  ;;  %v196_v16 = vmul.f32 0.5, %v3018_v47 }
  0xe3   :  { %2689 = vtanh.f32 %v191_v60 }
  0xe4   :  { %2691 = vtanh.f32 %v193_v4 }
  0xe5   :  { %2693 = vtanh.f32 %v194_v13  ;;  %v6572_v13 = vmov 17  }
  0xe6   :  { %v3026_v51 = vpop.f32.mrb[4].mxu0  ;;  %2695 = vtanh.f32 %v196_v16  ;;  %2670 = vset.pattern.permute.xlu1 %v6572_v13 }
  0xe7   :  { %v3028_v52 = vpop.f32.mrb[4].mxu1  ;;  %v3030_v53 = vpop.f32.mrb[5].mxu0  ;;  %v198_v16 = vmul.f32 0.5, %v3026_v51 }
  0xe8   :  { %v3032_v54 = vpop.f32.mrb[5].mxu1  ;;  %v3034_v55 = vpop.f32.mrb[6].mxu0 }
  0xe9   :  { %v3036_v56 = vpop.f32.mrb[6].mxu1  ;;  %v3038_v57 = vpop.f32.mrb[7].mxu0 }
  0xea   :  { %v3040_v58 = vpop.f32.mrb[7].mxu1 }
  0xeb   :  { %v2686_v59 = vpop.eup %2685 }
  0xec   :  { %v2688_v61 = vpop.eup %2687  ;;  %v238_v62 = vmul.f32 0.5, %v2686_v59 }
  0xed   :  { %v240_v63 = vmul.f32 0.5, %v2688_v61  ;;  %v2690_v19 = vpop.eup %2689 }
  0xee   :  { %v262_v1 = vadd.f32 0.5, %v238_v62  ;;  %v3045_v2 = vpop.f32.mrb[8].mxu0  ;;  %v239_v21 = vmul.f32 0.5, %v2690_v19  ;;  %v2692_v22 = vpop.eup %2691 }
  0xef   :  { %v3047_v3 = vpop.f32.mrb[8].mxu1  ;;  %v3050_v5 = vpop.f32.mrb[9].mxu0  ;;  %v264_v8 = vadd.f32 0.5, %v240_v63  ;;  %v241_v26 = vmul.f32 0.5, %v2692_v22 }
  0xf0   :  { %v3052_v6 = vpop.f32.mrb[9].mxu1  ;;  %v3054_v7 = vmul.f32 %v262_v1, %v98_v40  ;;  %v3056_v9 = vpop.f32.mrb[10].mxu0  ;;  %v263_v23 = vadd.f32 0.5, %v239_v21 }
  0xf1   :  { %v3058_v10 = vpop.f32.mrb[10].mxu1  ;;  %v3060_v11 = vpop.f32.mrb[11].mxu0  ;;  %v3069_v14 = vmul.f32 %v264_v8, %v161_v41  ;;  %v265_v32 = vadd.f32 0.5, %v241_v26  ;;  %v200_v26 = vmul.f32 0.5, %v3028_v52 }
  0xf2   :  { %v3062_v12 = vpop.f32.mrb[11].mxu1  ;;  %578 = vrot.lane.b32.xlu1 %v3054_v7, %s2860_s13  ;;  %397 = vrot.lane.b32.xlu0 %v3054_v7, %s2861_s14  ;;  %v2694_v30 = vpop.eup %2693  ;;  %v3095_v31 = vmul.f32 %v263_v23, %v3012_v44 }
  0xf3   :  { %v242_v33 = vmul.f32 0.5, %v2694_v30  ;;  %v2696_v40 = vpop.eup %2695  ;;  %v3099_v41 = vpop.permute.xlu0 %345  ;;  %v3106_v42 = vmul.f32 %v265_v32, %v3014_v45  ;;  %v195_v45 = vmul.f32 0.5, %v3020_v48 }
  0xf4   :  { %v244_v59 = vmul.f32 0.5, %v2696_v40  ;;  %v3110_v44 = vpop.permute.xlu1 %664 }
  0xf5   :  { %6885 = vst [vmem:[#allocation11_spill] sm:$0xff] %v3106_v42  ;;  %v266_v43 = vadd.f32 0.5, %v242_v33  ;;  %6886 = vst [vmem:[#allocation12_spill] sm:$0xff] %v3110_v44  ;;  %2697 = vtanh.f32 %v195_v45 }
  0xf6   :  { %779 = vrot.lane.b32.xlu1 %v3069_v14, %s2862_s15  ;;  %421 = vrot.lane.b32.xlu0 %v3069_v14, %s2861_s14  ;;  %v268_v61 = vadd.f32 0.5, %v244_v59  ;;  %v199_v59 = vmul.f32 0.5, %v3030_v53 }
  0xf7   :  { %v3115_v60 = vmul.f32 %v266_v43, %v3016_v46  ;;  %v3117_v62 = vpop.permute.xlu0 %350  ;;  %v197_v46 = vmul.f32 0.5, %v3022_v49 }
  0xf8   :  { %v3125_v63 = vmul.f32 %v268_v61, %v3018_v47  ;;  %v3127_v1 = vpop.permute.xlu1 %1010 }
  0xf9   :  { %2699 = vtanh.f32 %v197_v46  ;;  %v201_v46 = vmul.f32 0.5, %v3032_v54 }
  0xfa   :  { %936 = vrot.lane.b32.xlu1 %v3054_v7, %s2863_s16  ;;  %602 = vrot.lane.b32.xlu0 %v3069_v14, %s2860_s13  ;;  %2701 = vtanh.f32 %v198_v16 }
  0xfb   :  { %v3129_v4 = vpop.permute.xlu0 %365  ;;  %2703 = vtanh.f32 %v200_v26 }
  0xfc   :  { %v3138_v8 = vpop.permute.xlu1 %495  ;;  %2705 = vtanh.f32 %v199_v59 }
  0xfd   :  { %6887 = vst [vmem:[#allocation13_spill] sm:$0xff] %v3138_v8  ;;  %2707 = vtanh.f32 %v201_v46 }
  0xfe   :  { %960 = vrot.lane.b32.xlu1 %v3069_v14, %s2863_s16  ;;  %755 = vrot.lane.b32.xlu0 %v3054_v7, %s2862_s15 }
  0xff   :  { %v3140_v47 = vpop.permute.xlu0 %475  ;;  %v2698_v22 = vpop.eup %2697 }
 0x100   :  { %v3150_v19 = vpop.permute.xlu1 %668  ;;  %v243_v23 = vmul.f32 0.5, %v2698_v22 }
 0x101   :  { %6888 = vst [vmem:[#allocation14_spill] sm:$0xff] %v3150_v19 }
 0x102   :  { %1113 = vrot.lane.b32.xlu1 %v3054_v7, %s2864_s17  ;;  %1137 = vrot.lane.b32.xlu0 %v3069_v14, %s2864_s17  ;;  %v267_v40 = vadd.f32 0.5, %v243_v23 }
 0x103   :  { %v3152_v21 = vpop.permute.xlu0 %487  ;;  %v2700_v30 = vpop.eup %2699 }
 0x104   :  { %6889 = vst [vmem:[#allocation15_spill] sm:$0xff] %v3152_v21  ;;  %v3161_v32 = vpop.permute.xlu1 %1018  ;;  %v245_v43 = vmul.f32 0.5, %v2700_v30  ;;  %v3173_v61 = vmul.f32 %v267_v40, %v3020_v48  ;;  %v2702_v23 = vpop.eup %2701 }
 0x105   :  { %6890 = vst [vmem:[#allocation16_spill] sm:$0xff] %v3161_v32  ;;  %v246_v48 = vmul.f32 0.5, %v2702_v23  ;;  %v2704_v30 = vpop.eup %2703 }
 0x106   :  { %590 = vrot.lane.b32.xlu1 %v3095_v31, %s2860_s13  ;;  %409 = vrot.lane.b32.xlu0 %v3095_v31, %s2861_s14  ;;  %v269_v45 = vadd.f32 0.5, %v245_v43  ;;  %v248_v13 = vmul.f32 0.5, %v2704_v30  ;;  %v2706_v35 = vpop.eup %2705 }
 0x107   :  { %v3163_v33 = vpop.permute.xlu0 %652  ;;  %v270_v59 = vadd.f32 0.5, %v246_v48  ;;  %v247_v36 = vmul.f32 0.5, %v2706_v35  ;;  %v203_v48 = vmul.f32 0.5, %v3038_v57 }
 0x108   :  { %v3176_v16 = vpop.permute.xlu1 %1187  ;;  %v3185_v26 = vmul.f32 %v269_v45, %v3022_v49  ;;  %v272_v23 = vadd.f32 0.5, %v248_v13  ;;  %v205_v13 = vmul.f32 0.5, %v3040_v58 }
 0x109   :  { %6891 = vst [vmem:[#allocation17_spill] sm:$0xff] %v3176_v16  ;;  %v3204_v46 = vmul.f32 %v270_v59, %v3026_v51  ;;  %2709 = vtanh.f32 %v203_v48 }
 0x10a   :  { %614 = vrot.lane.b32.xlu1 %v3106_v42, %s2860_s13  ;;  %433 = vrot.lane.b32.xlu0 %v3106_v42, %s2861_s14  ;;  %v3212_v30 = vmul.f32 %v272_v23, %v3028_v52  ;;  %2711 = vtanh.f32 %v205_v13 }
 0x10b   :  { %v3178_v22 = vpop.permute.xlu0 %833 }
 0x10c   :  { %v3189_v40 = vpop.permute.xlu1 %672 }
 0x10d   :  { %6892 = vst [vmem:[#allocation18_spill] sm:$0xff] %v3189_v40  ;;  %v2708_v40 = vpop.eup %2707 }
 0x10e   :  { %399 = vrot.lane.b32.xlu1 %v3115_v60, %s2861_s14  ;;  %767 = vrot.lane.b32.xlu0 %v3095_v31, %s2862_s15  ;;  %v249_v8 = vmul.f32 0.5, %v2708_v40 }
 0x10f   :  { %v3191_v43 = vpop.permute.xlu0 %841 }
 0x110   :  { %6893 = vst [vmem:[#allocation19_spill] sm:$0xff] %v3191_v43  ;;  %v3199_v49 = vpop.permute.xlu1 %1022  ;;  %v273_v52 = vadd.f32 0.5, %v249_v8 }
 0x111   :  { %6894 = vst [vmem:[#allocation20_spill] sm:$0xff] %v3199_v49  ;;  %v271_v49 = vadd.f32 0.5, %v247_v36 }
 0x112   :  { %423 = vrot.lane.b32.xlu1 %v3125_v63, %s2861_s14  ;;  %791 = vrot.lane.b32.xlu0 %v3106_v42, %s2862_s15  ;;  %v3235_v23 = vmul.f32 %v273_v52, %v3032_v54  ;;  %v206_v54 = vmul.f32 0.5, %v3045_v2  ;;  %v202_v52 = vmul.f32 0.5, %v3034_v55 }
 0x113   :  { %v3201_v45 = vpop.permute.xlu0 %845  ;;  %v3224_v59 = vmul.f32 %v271_v49, %v3030_v53  ;;  %v2710_v53 = vpop.eup %2709 }
 0x114   :  { %6895 = vst [vmem:[#allocation21_spill] sm:$0xff] %v3201_v45  ;;  %v3216_v51 = vpop.permute.xlu1 %1195  ;;  %v251_v48 = vmul.f32 0.5, %v2710_v53  ;;  %v2712_v13 = vpop.eup %2711  ;;  %2713 = vtanh.f32 %v206_v54  ;;  %v204_v53 = vmul.f32 0.5, %v3036_v56  ;;  %v207_v54 = vmul.f32 0.5, %v3050_v5 }
 0x115   :  { %6896 = vst [vmem:[#allocation22_spill] sm:$0xff] %v3216_v51  ;;  %6898 = vst [vmem:[#allocation24_spill] sm:$0xff] %v3224_v59  ;;  %2715 = vtanh.f32 %v202_v52 }
 0x116   :  { %604 = vrot.lane.b32.xlu1 %v3125_v63, %s2860_s13  ;;  %948 = vrot.lane.b32.xlu0 %v3095_v31, %s2863_s16  ;;  %v275_v51 = vadd.f32 0.5, %v251_v48 }
 0x117   :  { %v3218_v35 = vpop.permute.xlu0 %849 }
 0x118   :  { %6897 = vst [vmem:[#allocation23_spill] sm:$0xff] %v3218_v35  ;;  %v3230_v36 = vpop.permute.xlu1 %1372  ;;  %v253_v35 = vmul.f32 0.5, %v2712_v13  ;;  %v3267_v19 = vmul.f32 %v275_v51, %v3038_v57 }
 0x119   :  { %6899 = vst [vmem:[#allocation25_spill] sm:$0xff] %v3230_v36 }
 0x11a   :  { %757 = vrot.lane.b32.xlu1 %v3115_v60, %s2862_s15  ;;  %972 = vrot.lane.b32.xlu0 %v3106_v42, %s2863_s16 }
 0x11b   :  { %v3232_v40 = vpop.permute.xlu0 %853 }
 0x11c   :  { %6900 = vst [vmem:[#allocation26_spill] sm:$0xff] %v3232_v40  ;;  %v3243_v8 = vpop.permute.xlu1 %1199 }
 0x11d   :  { %6901 = vst [vmem:[#allocation27_spill] sm:$0xff] %v3243_v8  ;;  %v208_v8 = vmul.f32 0.5, %v3047_v3 }
 0x11e   :  { %938 = vrot.lane.b32.xlu1 %v3115_v60, %s2863_s16  ;;  %1125 = vrot.lane.b32.xlu0 %v3095_v31, %s2864_s17  ;;  %v2714_v57 = vpop.eup %2713 }
 0x11f   :  { %v3245_v49 = vpop.permute.xlu0 %1014  ;;  %2717 = vtanh.f32 %v208_v8  ;;  %v209_v8 = vmul.f32 0.5, %v3052_v6 }
 0x120   :  { %6902 = vst [vmem:[#allocation28_spill] sm:$0xff] %v3245_v49  ;;  %v3256_v40 = vpop.permute.xlu1 %1376  ;;  %2719 = vtanh.f32 %v204_v53  ;;  %v2716_v53 = vpop.eup %2715 }
 0x121   :  { %6903 = vst [vmem:[#allocation29_spill] sm:$0xff] %v3256_v40  ;;  %v277_v40 = vadd.f32 0.5, %v253_v35  ;;  %2721 = vtanh.f32 %v207_v54 }
 0x122   :  { %1115 = vrot.lane.b32.xlu1 %v3115_v60, %s2864_s17  ;;  %580 = vrot.lane.b32.xlu0 %v3115_v60, %s2860_s13  ;;  %2723 = vtanh.f32 %v209_v8 }
 0x123   :  { %v3258_v36 = vpop.permute.xlu0 %1026  ;;  %v3279_v52 = vmul.f32 %v277_v40, %v3040_v58  ;;  %v250_v58 = vmul.f32 0.5, %v2716_v53 }
 0x124   :  { %6904 = vst [vmem:[#allocation30_spill] sm:$0xff] %v3258_v36  ;;  %v3271_v48 = vpop.permute.xlu1 %1549 }
 0x125   :  { %6905 = vst [vmem:[#allocation31_spill] sm:$0xff] %v3271_v48 }
 0x126   :  { %1139 = vrot.lane.b32.xlu1 %v3125_v63, %s2864_s17  ;;  %781 = vrot.lane.b32.xlu0 %v3125_v63, %s2862_s15 }
 0x127   :  { %v3273_v13 = vpop.permute.xlu0 %1030 }
 0x128   :  { %6906 = vst [vmem:[#allocation32_spill] sm:$0xff] %v3273_v13  ;;  %v3285_v51 = vpop.permute.xlu1 %1380  ;;  %v254_v13 = vmul.f32 0.5, %v2714_v57  ;;  %v274_v57 = vadd.f32 0.5, %v250_v58 }
 0x129   :  { %6907 = vst [vmem:[#allocation33_spill] sm:$0xff] %v3285_v51  ;;  %v2718_v54 = vpop.eup %2717 }
 0x12a   :  { %411 = vrot.lane.b32.xlu1 %v3173_v61, %s2861_s14  ;;  %962 = vrot.lane.b32.xlu0 %v3125_v63, %s2863_s16  ;;  %v2720_v40 = vpop.eup %2719  ;;  %v278_v48 = vadd.f32 0.5, %v254_v13  ;;  %v256_v36 = vmul.f32 0.5, %v2718_v54  ;;  %v3309_v54 = vmul.f32 %v274_v57, %v3034_v55  ;;  %v211_v55 = vmul.f32 0.5, %v3060_v11 }
 0x12b   :  { %v3287_v35 = vpop.permute.xlu0 %1191  ;;  %v2722_v45 = vpop.eup %2721  ;;  %v252_v44 = vmul.f32 0.5, %v2720_v40  ;;  %v210_v57 = vmul.f32 0.5, %v3056_v9 }
 0x12c   :  { %6908 = vst [vmem:[#allocation34_spill] sm:$0xff] %v3287_v35  ;;  %v3295_v8 = vpop.permute.xlu1 %1553  ;;  %v3302_v21 = vmul.f32 %v278_v48, %v3045_v2  ;;  %v280_v53 = vadd.f32 0.5, %v256_v36  ;;  %v255_v15 = vmul.f32 0.5, %v2722_v45  ;;  %v2724_v13 = vpop.eup %2723  ;;  %6912 = vst [vmem:[#allocation38_spill] sm:$0xff] %v3309_v54  ;;  %2725 = vtanh.f32 %v211_v55 }
 0x12d   :  { %6909 = vst [vmem:[#allocation35_spill] sm:$0xff] %v3295_v8  ;;  %v276_v8 = vadd.f32 0.5, %v252_v44  ;;  %v257_v45 = vmul.f32 0.5, %v2724_v13  ;;  %2727 = vtanh.f32 %v210_v57 }
 0x12e   :  { %435 = vrot.lane.b32.xlu1 %v3185_v26, %s2861_s14  ;;  %592 = vrot.lane.b32.xlu0 %v3173_v61, %s2860_s13  ;;  %6911 = vst [vmem:[#allocation37_spill] sm:$0xff] %v3302_v21  ;;  %v3316_v2 = vmul.f32 %v280_v53, %v3047_v3  ;;  %v279_v36 = vadd.f32 0.5, %v255_v15 }
 0x12f   :  { %v3297_v51 = vpop.permute.xlu0 %1203  ;;  %v3323_v48 = vmul.f32 %v276_v8, %v3036_v56  ;;  %v281_v15 = vadd.f32 0.5, %v257_v45  ;;  %v213_v56 = vmul.f32 0.5, %v3062_v12 }
 0x130   :  { %6910 = vst [vmem:[#allocation36_spill] sm:$0xff] %v3297_v51  ;;  %6913 = vst [vmem:[#allocation39_spill] sm:$0xff] %v3316_v2  ;;  %v3331_v3 = vmul.f32 %v279_v36, %v3050_v5  ;;  %v212_v5 = vmul.f32 0.5, %v3058_v10 }
 0x131   :  { %6914 = vst [vmem:[#allocation40_spill] sm:$0xff] %v3323_v48  ;;  %v3344_v13 = vmul.f32 %v281_v15, %v3052_v6  ;;  %2729 = vtanh.f32 %v213_v56 }
 0x132   :  { %769 = vrot.lane.b32.xlu1 %v3173_v61, %s2862_s15  ;;  %616 = vrot.lane.b32.xlu0 %v3185_v26, %s2860_s13  ;;  %2731 = vtanh.f32 %v212_v5 }
 0x136   :  { %793 = vrot.lane.b32.xlu1 %v3185_v26, %s2862_s15  ;;  %401 = vrot.lane.b32.xlu0 %v3204_v46, %s2861_s14  ;;  %v2726_v15 = vpop.eup %2725 }
 0x137   :  { %v2728_v56 = vpop.eup %2727  ;;  %v259_v32 = vmul.f32 0.5, %v2726_v15 }
 0x138   :  { %v258_v29 = vmul.f32 0.5, %v2728_v56 }
 0x139   :  { %v283_v49 = vadd.f32 0.5, %v259_v32 }
 0x13a   :  { %950 = vrot.lane.b32.xlu1 %v3173_v61, %s2863_s16  ;;  %425 = vrot.lane.b32.xlu0 %v3212_v30, %s2861_s14  ;;  %v282_v15 = vadd.f32 0.5, %v258_v29 }
 0x13b   :  { %v2730_v5 = vpop.eup %2729 }
 0x13c   :  { %v2732_v0 = vpop.eup %2731  ;;  %v261_v34 = vmul.f32 0.5, %v2730_v5  ;;  %v3395_v32 = vmul.f32 %v282_v15, %v3056_v9 }
 0x13d   :  { %v260_v50 = vmul.f32 0.5, %v2732_v0 }
 0x13e   :  { %974 = vrot.lane.b32.xlu1 %v3185_v26, %s2863_s16  ;;  %413 = vrot.lane.b32.xlu0 %v3224_v59, %s2861_s14  ;;  %v285_v56 = vadd.f32 0.5, %v261_v34 }
 0x13f   :  { %v284_v5 = vadd.f32 0.5, %v260_v50 }
 0x140   :  { %v3400_v0 = vmul.f32 %v285_v56, %v3062_v12 }
 0x141   :  { %v3409_v34 = vmul.f32 %v284_v5, %v3058_v10 }
 0x142   :  { %1127 = vrot.lane.b32.xlu1 %v3173_v61, %s2864_s17  ;;  %437 = vrot.lane.b32.xlu0 %v3235_v23, %s2861_s14  ;;  %6919 = vst [vmem:[#allocation45_spill] sm:$0xff] %v3400_v0 }
 0x146   :  { %582 = vrot.lane.b32.xlu1 %v3204_v46, %s2860_s13  ;;  %618 = vrot.lane.b32.xlu0 %v3235_v23, %s2860_s13 }
 0x14a   :  { %606 = vrot.lane.b32.xlu1 %v3212_v30, %s2860_s13  ;;  %771 = vrot.lane.b32.xlu0 %v3224_v59, %s2862_s15 }
 0x14e   :  { %759 = vrot.lane.b32.xlu1 %v3204_v46, %s2862_s15  ;;  %952 = vrot.lane.b32.xlu0 %v3224_v59, %s2863_s16 }
 0x152   :  { %783 = vrot.lane.b32.xlu1 %v3212_v30, %s2862_s15  ;;  %596 = vrot.lane.b32.xlu0 %v3267_v19, %s2860_s13 }
 0x156   :  { %940 = vrot.lane.b32.xlu1 %v3204_v46, %s2863_s16  ;;  %620 = vrot.lane.b32.xlu0 %v3279_v52, %s2860_s13 }
 0x15a   :  { %594 = vrot.lane.b32.xlu1 %v3224_v59, %s2860_s13  ;;  %773 = vrot.lane.b32.xlu0 %v3267_v19, %s2862_s15 }
 0x15e   :  { %795 = vrot.lane.b32.xlu1 %v3235_v23, %s2862_s15  ;;  %797 = vrot.lane.b32.xlu0 %v3279_v52, %s2862_s15 }
 0x162   :  { %976 = vrot.lane.b32.xlu1 %v3235_v23, %s2863_s16  ;;  %405 = vrot.lane.b32.xlu0 %v3302_v21, %s2861_s14 }
 0x164   :  { %v3311_v51 = vpop.permute.xlu1 %578  ;;  %v3313_v58 = vpop.permute.xlu0 %397 }
 0x166   :  { %403 = vrot.lane.b32.xlu1 %v3309_v54, %s2861_s14  ;;  %429 = vrot.lane.b32.xlu0 %v3316_v2, %s2861_s14 }
 0x168   :  { %v3326_v44 = vpop.permute.xlu1 %779  ;;  %v3328_v40 = vpop.permute.xlu0 %421 }
 0x16a   :  { %427 = vrot.lane.b32.xlu1 %v3323_v48, %s2861_s14  ;;  %417 = vrot.lane.b32.xlu0 %v3331_v3, %s2861_s14 }
 0x16c   :  { %v3339_v8 = vpop.permute.xlu1 %936  ;;  %v3341_v53 = vpop.permute.xlu0 %602 }
 0x16e   :  { %584 = vrot.lane.b32.xlu1 %v3309_v54, %s2860_s13  ;;  %441 = vrot.lane.b32.xlu0 %v3344_v13, %s2861_s14 }
 0x170   :  { %v3351_v36 = vpop.permute.xlu1 %960  ;;  %v3353_v45 = vpop.permute.xlu0 %755 }
 0x172   :  { %608 = vrot.lane.b32.xlu1 %v3323_v48, %s2860_s13  ;;  %598 = vrot.lane.b32.xlu0 %v3331_v3, %s2860_s13 }
 0x174   :  { %v3359_v6 = vpop.permute.xlu1 %1113  ;;  %v3361_v55 = vpop.permute.xlu0 %1137 }
 0x175   :  { %6915 = vst [vmem:[#allocation41_spill] sm:$0xff] %v3359_v6  ;;  %6916 = vst [vmem:[#allocation42_spill] sm:$0xff] %v3361_v55  ;;  %v3386_v55 = vmul.f32 %v283_v49, %v3060_v11 }
 0x176   :  { %761 = vrot.lane.b32.xlu1 %v3309_v54, %s2862_s15  ;;  %622 = vrot.lane.b32.xlu0 %v3344_v13, %s2860_s13 }
 0x178   :  { %v3367_v57 = vpop.permute.xlu1 %590  ;;  %v3369_v43 = vpop.permute.xlu0 %409 }
 0x17a   :  { %415 = vrot.lane.b32.xlu1 %v3267_v19, %s2861_s14  ;;  %775 = vrot.lane.b32.xlu0 %v3331_v3, %s2862_s15 }
 0x17c   :  { %v3375_v35 = vpop.permute.xlu1 %614  ;;  %v3377_v20 = vpop.permute.xlu0 %433 }
 0x17e   :  { %439 = vrot.lane.b32.xlu1 %v3279_v52, %s2861_s14  ;;  %799 = vrot.lane.b32.xlu0 %v3344_v13, %s2862_s15 }
 0x180   :  { %v3383_v16 = vpop.permute.xlu1 %399  ;;  %v3388_v6 = vpop.permute.xlu0 %767 }
 0x181   :  { %6917 = vst [vmem:[#allocation43_spill] sm:$0xff] %v3383_v16  ;;  %v3793_v16 = vmul.f32 %v3099_v41, %v3106_v42 }
 0x182   :  { %586 = vrot.lane.b32.xlu1 %v3302_v21, %s2860_s13  ;;  %600 = vrot.lane.b32.xlu0 %v3386_v55, %s2860_s13 }
 0x184   :  { %v3397_v29 = vpop.permute.xlu1 %423  ;;  %v3402_v11 = vpop.permute.xlu0 %791 }
 0x185   :  { %6918 = vst [vmem:[#allocation44_spill] sm:$0xff] %v3397_v29 }
 0x186   :  { %407 = vrot.lane.b32.xlu1 %v3395_v32, %s2861_s14  ;;  %624 = vrot.lane.b32.xlu0 %v3400_v0, %s2860_s13 }
 0x188   :  { %v3411_v49 = vpop.permute.xlu1 %604  ;;  %v3413_v9 = vpop.permute.xlu0 %948 }
 0x189   :  { %6920 = vst [vmem:[#allocation46_spill] sm:$0xff] %v3411_v49  ;;  %v6927_v49 = vmov 16  }
 0x18a   :  { %431 = vrot.lane.b32.xlu1 %v3409_v34, %s2861_s14  ;;  %954 = vrot.lane.b32.xlu0 %v3267_v19, %s2863_s16 }
 0x18c   :  { %v3419_v50 = vpop.permute.xlu1 %757  ;;  %v3421_v12 = vpop.permute.xlu0 %972 }
 0x18d   :  { %6921 = vst [vmem:[#allocation47_spill] sm:$0xff] %v3419_v50 }
 0x18e   :  { %419 = vrot.lane.b32.xlu1 %v3386_v55, %s2861_s14  ;;  %978 = vrot.lane.b32.xlu0 %v3279_v52, %s2863_s16 }
 0x190   :  { %v3427_v10 = vpop.permute.xlu1 %938  ;;  %v3429_v15 = vpop.permute.xlu0 %1125 }
 0x191   :  { %6922 = vst [vmem:[#allocation48_spill] sm:$0xff] %v3427_v10 }
 0x192   :  { %443 = vrot.lane.b32.xlu1 %v3400_v0, %s2861_s14  ;;  %1129 = vrot.lane.b32.xlu0 %v3224_v59, %s2864_s17 }
 0x194   :  { %v3435_v56 = vpop.permute.xlu1 %1115  ;;  %v3437_v5 = vpop.permute.xlu0 %580 }
 0x195   :  { %6923 = vst [vmem:[#allocation49_spill] sm:$0xff] %v3435_v56  ;;  %6924 = vst [vmem:[#allocation50_spill] sm:$0xff] %v3437_v5 }
 0x196   :  { %1730 = vperm.xlu1 %2670, %v2927_v18   ;;  %1149 = vrot.lane.b32.xlu0 %v3106_v42, %s2864_s17  ;;  %v6929_v18 = vmov 15  }
 0x198   :  { %v3442_v50 = vpop.permute.xlu1 %1139  ;;  %v3444_v10 = vpop.permute.xlu0 %781 }
 0x199   :  { %6925 = vst [vmem:[#allocation51_spill] sm:$0xff] %v3442_v50  ;;  %6926 = vst [vmem:[#allocation52_spill] sm:$0xff] %v3444_v10 }
 0x19a   :  { %588 = vrot.lane.b32.xlu1 %v3395_v32, %s2860_s13  ;;  %1207 = vperm.xlu0 %2667, %v2957_v28  }
 0x19b   :  { %2672 = vset.pattern.permute.xlu1 %v6927_v49 }
 0x19c   :  { %v3450_v29 = vpop.permute.xlu1 %411  ;;  %v3452_v56 = vpop.permute.xlu0 %962 }
 0x19d   :  { %6928 = vst [vmem:[#allocation53_spill] sm:$0xff] %v3452_v56 }
 0x19e   :  { %610 = vrot.lane.b32.xlu1 %v3316_v2, %s2860_s13  ;;  %2671 = vset.pattern.permute.xlu0 %v6929_v18 }
 0x19f   :  { %1368 = vperm.xlu0 %2671, %v2922_v17  }
 0x1a0   :  { %v3458_v50 = vpop.permute.xlu1 %435  ;;  %v3460_v10 = vpop.permute.xlu0 %592 }
 0x1a1   :  { %6930 = vst [vmem:[#allocation54_spill] sm:$0xff] %v3458_v50  ;;  %6931 = vst [vmem:[#allocation55_spill] sm:$0xff] %v3460_v10 }
 0x1a2   :  { %763 = vrot.lane.b32.xlu1 %v3302_v21, %s2862_s15 }
 0x1a3   :  { %1302 = vrot.lane.b32.xlu0 %v3095_v31, %s2866_s18 }
 0x1a4   :  { %v3466_v5 = vpop.permute.xlu1 %769  ;;  %v3468_v56 = vpop.permute.xlu0 %616 }
 0x1a5   :  { %6932 = vst [vmem:[#allocation56_spill] sm:$0xff] %v3466_v5  ;;  %6933 = vst [vmem:[#allocation57_spill] sm:$0xff] %v3468_v56 }
 0x1a6   :  { %785 = vrot.lane.b32.xlu1 %v3323_v48, %s2862_s15 }
 0x1a7   :  { %1314 = vrot.lane.b32.xlu0 %v3069_v14, %s2866_s18 }
 0x1a8   :  { %v3474_v18 = vpop.permute.xlu1 %793  ;;  %v3476_v10 = vpop.permute.xlu0 %401 }
 0x1a9   :  { %6934 = vst [vmem:[#allocation58_spill] sm:$0xff] %v3474_v18  ;;  %6935 = vst [vmem:[#allocation59_spill] sm:$0xff] %v3476_v10 }
 0x1aa   :  { %942 = vrot.lane.b32.xlu1 %v3309_v54, %s2863_s16 }
 0x1ab   :  { %1384 = vperm.xlu0 %2671, %v2952_v27  }
 0x1ac   :  { %v3481_v50 = vpop.permute.xlu1 %950  ;;  %v3483_v5 = vpop.permute.xlu0 %425 }
 0x1ad   :  { %6936 = vst [vmem:[#allocation60_spill] sm:$0xff] %v3481_v50  ;;  %6937 = vst [vmem:[#allocation61_spill] sm:$0xff] %v3483_v5 }
 0x1ae   :  { %964 = vrot.lane.b32.xlu1 %v3212_v30, %s2863_s16 }
 0x1af   :  { %612 = vrot.lane.b32.xlu0 %v3409_v34, %s2860_s13 }
 0x1b0   :  { %v3489_v56 = vpop.permute.xlu1 %974  ;;  %v3491_v18 = vpop.permute.xlu0 %413 }
 0x1b1   :  { %6938 = vst [vmem:[#allocation62_spill] sm:$0xff] %v3489_v56  ;;  %6939 = vst [vmem:[#allocation63_spill] sm:$0xff] %v3491_v18 }
 0x1b2   :  { %1117 = vrot.lane.b32.xlu1 %v3204_v46, %s2864_s17 }
 0x1b3   :  { %777 = vrot.lane.b32.xlu0 %v3386_v55, %s2862_s15 }
 0x1b4   :  { %v3497_v27 = vpop.permute.xlu1 %1127  ;;  %v3499_v10 = vpop.permute.xlu0 %437 }
 0x1b5   :  { %6940 = vst [vmem:[#allocation64_spill] sm:$0xff] %v3497_v27  ;;  %6941 = vst [vmem:[#allocation65_spill] sm:$0xff] %v3499_v10 }
 0x1b6   :  { %1141 = vrot.lane.b32.xlu1 %v3212_v30, %s2864_s17 }
 0x1b7   :  { %801 = vrot.lane.b32.xlu0 %v3400_v0, %s2862_s15 }
 0x1b8   :  { %v3505_v5 = vpop.permute.xlu1 %582  ;;  %v3507_v56 = vpop.permute.xlu0 %618 }
 0x1b9   :  { %6942 = vst [vmem:[#allocation66_spill] sm:$0xff] %v3505_v5  ;;  %6943 = vst [vmem:[#allocation67_spill] sm:$0xff] %v3507_v56 }
 0x1ba   :  { %1151 = vrot.lane.b32.xlu1 %v3185_v26, %s2864_s17 }
 0x1bb   :  { %956 = vrot.lane.b32.xlu0 %v3331_v3, %s2863_s16 }
 0x1bc   :  { %v3513_v18 = vpop.permute.xlu1 %606  ;;  %v3515_v27 = vpop.permute.xlu0 %771 }
 0x1bd   :  { %6944 = vst [vmem:[#allocation68_spill] sm:$0xff] %v3513_v18  ;;  %6945 = vst [vmem:[#allocation69_spill] sm:$0xff] %v3515_v27 }
 0x1be   :  { %1290 = vrot.lane.b32.xlu1 %v3054_v7, %s2866_s18 }
 0x1bf   :  { %980 = vrot.lane.b32.xlu0 %v3344_v13, %s2863_s16 }
 0x1c0   :  { %v3521_v10 = vpop.permute.xlu1 %759  ;;  %v3523_v5 = vpop.permute.xlu0 %952 }
 0x1c1   :  { %6946 = vst [vmem:[#allocation70_spill] sm:$0xff] %v3521_v10  ;;  %6947 = vst [vmem:[#allocation71_spill] sm:$0xff] %v3523_v5 }
 0x1c2   :  { %1292 = vrot.lane.b32.xlu1 %v3115_v60, %s2866_s18 }
 0x1c3   :  { %1131 = vrot.lane.b32.xlu0 %v3267_v19, %s2864_s17 }
 0x1c4   :  { %v3529_v56 = vpop.permute.xlu1 %783  ;;  %v3531_v18 = vpop.permute.xlu0 %596 }
 0x1c5   :  { %6948 = vst [vmem:[#allocation72_spill] sm:$0xff] %v3529_v56  ;;  %6949 = vst [vmem:[#allocation73_spill] sm:$0xff] %v3531_v18 }
 0x1c6   :  { %1304 = vrot.lane.b32.xlu1 %v3173_v61, %s2866_s18 }
 0x1c7   :  { %1153 = vrot.lane.b32.xlu0 %v3235_v23, %s2864_s17 }
 0x1c8   :  { %v3537_v27 = vpop.permute.xlu1 %940  ;;  %v3539_v10 = vpop.permute.xlu0 %620 }
 0x1c9   :  { %6950 = vst [vmem:[#allocation74_spill] sm:$0xff] %v3537_v27  ;;  %6951 = vst [vmem:[#allocation75_spill] sm:$0xff] %v3539_v10  ;;  %v6956_v10 = vmov 17  }
 0x1ca   :  { %1316 = vrot.lane.b32.xlu1 %v3125_v63, %s2866_s18 }
 0x1cb   :  { %1306 = vrot.lane.b32.xlu0 %v3224_v59, %s2866_s18 }
 0x1cc   :  { %v3545_v5 = vpop.permute.xlu1 %594  ;;  %v3547_v56 = vpop.permute.xlu0 %773 }
 0x1cd   :  { %6952 = vst [vmem:[#allocation76_spill] sm:$0xff] %v3545_v5  ;;  %6953 = vst [vmem:[#allocation77_spill] sm:$0xff] %v3547_v56 }
 0x1ce   :  { %1557 = vperm.xlu1 %2672, %v2943_v25  }
 0x1cf   :  { %1326 = vrot.lane.b32.xlu0 %v3106_v42, %s2866_s18 }
 0x1d0   :  { %v3552_v18 = vpop.permute.xlu1 %795  ;;  %v3554_v27 = vpop.permute.xlu0 %797 }
 0x1d1   :  { %6954 = vst [vmem:[#allocation78_spill] sm:$0xff] %v3552_v18  ;;  %6955 = vst [vmem:[#allocation79_spill] sm:$0xff] %v3554_v27 }
 0x1d2   :  { %2673 = vset.pattern.permute.xlu1 %v6956_v10 }
 0x1d3   :  { %1734 = vperm.xlu1 %2673, %v2934_v24   ;;  %1388 = vperm.xlu0 %2671, %v2957_v28  }
 0x1d4   :  { %v3559_v50 = vpop.permute.xlu1 %976  ;;  %v3561_v5 = vpop.permute.xlu0 %405 }
 0x1d5   :  { %6957 = vst [vmem:[#allocation80_spill] sm:$0xff] %v3559_v50  ;;  %6958 = vst [vmem:[#allocation81_spill] sm:$0xff] %v3561_v5 }
 0x1d7   :  { %765 = vrot.lane.b32.xlu1 %v3395_v32, %s2862_s15  ;;  %2674 = vset.pattern.permute.xlu0 %v6927_v49 }
 0x1d8   :  { %v3566_v25 = vpop.permute.xlu1 %403  ;;  %2675 = vset.pattern.permute.xlu1 %v6927_v49  ;;  %v3569_v56 = vpop.permute.xlu0 %429  ;;  %1545 = vperm.xlu0 %2674, %v2922_v17  }
 0x1d9   :  { %6959 = vst [vmem:[#allocation82_spill] sm:$0xff] %v3566_v25  ;;  %6960 = vst [vmem:[#allocation83_spill] sm:$0xff] %v3569_v56  ;;  %v3671_v56 = vld [vmem:[%s6569_s1 + $0x28] sm:$0xff] }
 0x1da   :  { %6982 = vst [vmem:[#allocation105_spill] sm:$0xff] %v3671_v56 }
 0x1db   :  { %787 = vrot.lane.b32.xlu1 %v3316_v2, %s2862_s15 }
 0x1dc   :  { %v3574_v24 = vpop.permute.xlu1 %427  ;;  %v3576_v28 = vpop.permute.xlu0 %417  ;;  %1473 = vrot.lane.b32.xlu0 %v3115_v60, %s2867_s19 }
 0x1dd   :  { %6961 = vst [vmem:[#allocation84_spill] sm:$0xff] %v3574_v24  ;;  %6962 = vst [vmem:[#allocation85_spill] sm:$0xff] %v3576_v28 }
 0x1df   :  { %944 = vrot.lane.b32.xlu1 %v3302_v21, %s2863_s16 }
 0x1e0   :  { %v3582_v27 = vpop.permute.xlu1 %584  ;;  %v3584_v49 = vpop.permute.xlu0 %441  ;;  %1485 = vrot.lane.b32.xlu0 %v3173_v61, %s2867_s19 }
 0x1e1   :  { %6963 = vst [vmem:[#allocation86_spill] sm:$0xff] %v3582_v27  ;;  %6964 = vst [vmem:[#allocation87_spill] sm:$0xff] %v3584_v49 }
 0x1e3   :  { %966 = vrot.lane.b32.xlu1 %v3323_v48, %s2863_s16 }
 0x1e4   :  { %v3590_v17 = vpop.permute.xlu1 %608  ;;  %v3592_v24 = vpop.permute.xlu0 %598  ;;  %1497 = vrot.lane.b32.xlu0 %v3125_v63, %s2867_s19 }
 0x1e5   :  { %6965 = vst [vmem:[#allocation88_spill] sm:$0xff] %v3590_v17  ;;  %6966 = vst [vmem:[#allocation89_spill] sm:$0xff] %v3592_v24 }
 0x1e7   :  { %1119 = vrot.lane.b32.xlu1 %v3309_v54, %s2864_s17 }
 0x1e8   :  { %v3598_v25 = vpop.permute.xlu1 %761  ;;  %v3600_v27 = vpop.permute.xlu0 %622  ;;  %789 = vrot.lane.b32.xlu0 %v3409_v34, %s2862_s15 }
 0x1e9   :  { %6967 = vst [vmem:[#allocation90_spill] sm:$0xff] %v3598_v25  ;;  %6968 = vst [vmem:[#allocation91_spill] sm:$0xff] %v3600_v27 }
 0x1eb   :  { %1143 = vrot.lane.b32.xlu1 %v3323_v48, %s2864_s17 }
 0x1ec   :  { %v3606_v49 = vpop.permute.xlu1 %415  ;;  %v3608_v17 = vpop.permute.xlu0 %775  ;;  %958 = vrot.lane.b32.xlu0 %v3386_v55, %s2863_s16 }
 0x1ed   :  { %6969 = vst [vmem:[#allocation92_spill] sm:$0xff] %v3606_v49  ;;  %6970 = vst [vmem:[#allocation93_spill] sm:$0xff] %v3608_v17 }
 0x1ef   :  { %1294 = vrot.lane.b32.xlu1 %v3204_v46, %s2866_s18 }
 0x1f0   :  { %982 = vrot.lane.b32.xlu0 %v3400_v0, %s2863_s16  ;;  %v3616_v27 = vpop.permute.xlu0 %799  ;;  %v3618_v24 = vpop.permute.xlu1 %439 }
 0x1f1   :  { %6971 = vst [vmem:[#allocation94_spill] sm:$0xff] %v3616_v27  ;;  %6972 = vst [vmem:[#allocation95_spill] sm:$0xff] %v3618_v24 }
 0x1f3   :  { %1318 = vrot.lane.b32.xlu1 %v3212_v30, %s2866_s18 }
 0x1f4   :  { %1133 = vrot.lane.b32.xlu0 %v3331_v3, %s2864_s17  ;;  %v3626_v17 = vpop.permute.xlu0 %600  ;;  %v3628_v25 = vpop.permute.xlu1 %586 }
 0x1f5   :  { %6973 = vst [vmem:[#allocation96_spill] sm:$0xff] %v3626_v17  ;;  %6974 = vst [vmem:[#allocation97_spill] sm:$0xff] %v3628_v25 }
 0x1f7   :  { %1328 = vrot.lane.b32.xlu1 %v3185_v26, %s2866_s18 }
 0x1f8   :  { %1155 = vrot.lane.b32.xlu0 %v3279_v52, %s2864_s17  ;;  %v3636_v27 = vpop.permute.xlu0 %624  ;;  %v3638_v24 = vpop.permute.xlu1 %407 }
 0x1f9   :  { %6975 = vst [vmem:[#allocation98_spill] sm:$0xff] %v3636_v27  ;;  %6976 = vst [vmem:[#allocation99_spill] sm:$0xff] %v3638_v24  ;;  %v3655_v27 = vld [vmem:[%s6569_s1 + $0x20] sm:$0xff] }
 0x1fa   :  { %6979 = vst [vmem:[#allocation102_spill] sm:$0xff] %v3655_v27 }
 0x1fb   :  { %1471 = vrot.lane.b32.xlu1 %v3054_v7, %s2867_s19 }
 0x1fc   :  { %1308 = vrot.lane.b32.xlu0 %v3267_v19, %s2866_s18  ;;  %v3646_v17 = vpop.permute.xlu0 %954  ;;  %v3648_v25 = vpop.permute.xlu1 %431 }
 0x1fd   :  { %6977 = vst [vmem:[#allocation100_spill] sm:$0xff] %v3646_v17  ;;  %6978 = vst [vmem:[#allocation101_spill] sm:$0xff] %v3648_v25  ;;  %v6664_v17 = vmov 24   ;;  %v2810_v25 = vld [vmem:[%s6569_s1] sm:$0xff] }
 0x1ff   :  { %1483 = vrot.lane.b32.xlu1 %v3095_v31, %s2867_s19 }
 0x200   :  { %1330 = vrot.lane.b32.xlu0 %v3235_v23, %s2866_s18  ;;  %v3660_v24 = vpop.permute.xlu0 %978  ;;  %v3662_v49 = vpop.permute.xlu1 %419 }
 0x201   :  { %6980 = vst [vmem:[#allocation103_spill] sm:$0xff] %v3660_v24  ;;  %6981 = vst [vmem:[#allocation104_spill] sm:$0xff] %v3662_v49  ;;  %v2812_v24 = vld [vmem:[%s6569_s1 + $0x8] sm:$0xff] }
 0x203   :  { %1495 = vrot.lane.b32.xlu1 %v3069_v14, %s2867_s19 }
 0x204   :  { %1487 = vrot.lane.b32.xlu0 %v3224_v59, %s2867_s19  ;;  %v3674_v5 = vpop.permute.xlu0 %1129 }
 0x205   :  { %6983 = vst [vmem:[#allocation106_spill] sm:$0xff] %v3674_v5  ;;  %v3691_v5 = vld [vmem:[%s6569_s1 + $0x18] sm:$0xff] }
 0x207   :  { %1561 = vperm.xlu1 %2675, %v3655_v27  }
 0x208   :  { %1507 = vrot.lane.b32.xlu0 %v3106_v42, %s2867_s19  ;;  %v3686_v28 = vpop.permute.xlu0 %1149  ;;  %v3816_v42 = vmul.f32 %v3006_v37, %v3204_v46 }
 0x209   :  { %6986 = vst [vmem:[#allocation109_spill] sm:$0xff] %v3686_v28 }
 0x20a   :  { %7012 = vst [vmem:[#allocation134_spill] sm:$0xff] %v3816_v42 }
 0x20b   :  { %2676 = vset.pattern.permute.xlu1 %v6664_v17  ;;  %v3679_v17 = vpop.permute.xlu1 %443 }
 0x20c   :  { %1830 = vperm.xlu1 %2676, %v2810_v25   ;;  %1565 = vperm.xlu0 %2674, %v3671_v56   ;;  %6984 = vst [vmem:[#allocation107_spill] sm:$0xff] %v3679_v17 }
 0x210   :  { %1834 = vperm.xlu1 %2676, %v2812_v24   ;;  %2677 = vset.pattern.permute.xlu0 %v6956_v10 }
 0x211   :  { %1726 = vperm.xlu0 %2677, %v2810_v25  }
 0x214   :  { %946 = vrot.lane.b32.xlu1 %v3395_v32, %s2863_s16 }
 0x215   :  { %v3684_v49 = vpop.permute.xlu1 %1730  ;;  %1738 = vperm.xlu0 %2677, %v3691_v5  }
 0x216   :  { %6985 = vst [vmem:[#allocation108_spill] sm:$0xff] %v3684_v49 }
 0x218   :  { %968 = vrot.lane.b32.xlu1 %v3316_v2, %s2863_s16 }
 0x219   :  { %v3696_v24 = vpop.permute.xlu1 %588  ;;  %1660 = vrot.lane.b32.xlu0 %v3095_v31, %s2869_s30  ;;  %v3700_v25 = vpop.permute.xlu0 %1207 }
 0x21a   :  { %6987 = vst [vmem:[#allocation110_spill] sm:$0xff] %v3696_v24  ;;  %6988 = vst [vmem:[#allocation111_spill] sm:$0xff] %v3700_v25 }
 0x21c   :  { %1121 = vrot.lane.b32.xlu1 %v3302_v21, %s2864_s17 }
 0x21d   :  { %v3704_v49 = vpop.permute.xlu1 %610  ;;  %1672 = vrot.lane.b32.xlu0 %v3069_v14, %s2869_s30 }
 0x21e   :  { %6989 = vst [vmem:[#allocation112_spill] sm:$0xff] %v3704_v49  ;;  %v3708_v28 = vpop.permute.xlu0 %1368 }
 0x21f   :  { %6990 = vst [vmem:[#allocation113_spill] sm:$0xff] %v3708_v28  ;;  %v6995_v28 = vmov 24  }
 0x220   :  { %1145 = vrot.lane.b32.xlu1 %v3316_v2, %s2864_s17 }
 0x221   :  { %v3712_v24 = vpop.permute.xlu1 %763  ;;  %1742 = vperm.xlu0 %2677, %v3655_v27  }
 0x222   :  { %6991 = vst [vmem:[#allocation114_spill] sm:$0xff] %v3712_v24  ;;  %v3715_v17 = vpop.permute.xlu0 %1302 }
 0x223   :  { %6992 = vst [vmem:[#allocation115_spill] sm:$0xff] %v3715_v17 }
 0x224   :  { %1296 = vrot.lane.b32.xlu1 %v3309_v54, %s2866_s18 }
 0x225   :  { %v3719_v25 = vpop.permute.xlu1 %785  ;;  %1123 = vrot.lane.b32.xlu0 %v3395_v32, %s2864_s17 }
 0x226   :  { %6993 = vst [vmem:[#allocation116_spill] sm:$0xff] %v3719_v25  ;;  %v3723_v49 = vpop.permute.xlu0 %1314  ;;  %2679 = vset.pattern.permute.xlu0 %v6995_v28 }
 0x227   :  { %6994 = vst [vmem:[#allocation117_spill] sm:$0xff] %v3723_v49  ;;  %v6687_v49 = vlaneseq }
 0x228   :  { %1320 = vrot.lane.b32.xlu1 %v3323_v48, %s2866_s18 }
 0x229   :  { %v3728_v24 = vpop.permute.xlu1 %942  ;;  %1147 = vrot.lane.b32.xlu0 %v3409_v34, %s2864_s17 }
 0x22a   :  { %6996 = vst [vmem:[#allocation118_spill] sm:$0xff] %v3728_v24  ;;  %v3732_v17 = vpop.permute.xlu0 %1384 }
 0x22b   :  { %6997 = vst [vmem:[#allocation119_spill] sm:$0xff] %v3732_v17  ;;  %v3749_v17 = vand.u32 127, %v6687_v49 }
 0x22c   :  { %1475 = vrot.lane.b32.xlu1 %v3204_v46, %s2867_s19 }
 0x22d   :  { %v3736_v25 = vpop.permute.xlu1 %964  ;;  %1298 = vrot.lane.b32.xlu0 %v3302_v21, %s2866_s18  ;;  %v3765_v50 = vadd.s32 256, %v3749_v17  ;;  %v3783_v18 = vadd.s32 384, %v3749_v17  ;;  %vm6716_vm3 = vcmp.lt.s32.totalorder %v3749_v17, 17  ;;  %vm6717_vm4 = vcmp.lt.s32.totalorder %v3749_v17, 16 }
 0x22e   :  { %6998 = vst [vmem:[#allocation120_spill] sm:$0xff] %v3736_v25  ;;  %v3740_v27 = vpop.permute.xlu0 %612  ;;  %vm6722_vm14 = vcmp.lt.s32.totalorder %v3749_v17, 15 }
 0x22f   :  { %6999 = vst [vmem:[#allocation121_spill] sm:$0xff] %v3740_v27  ;;  %v3760_v27 = vadd.s32 128, %v3749_v17  ;;  %7005 = vst [vmem:[#allocation127_spill] sm:$0xff] %v3765_v50 }
 0x230   :  { %1499 = vrot.lane.b32.xlu1 %v3212_v30, %s2867_s19  ;;  %7007 = vst [vmem:[#allocation129_spill] sm:$0xff] %v3783_v18 }
 0x231   :  { %v3744_v24 = vpop.permute.xlu1 %1117  ;;  %1322 = vrot.lane.b32.xlu0 %v3316_v2, %s2866_s18  ;;  %7003 = vst [vmem:[#allocation125_spill] sm:$0xff] %v3760_v27 }
 0x232   :  { %7000 = vst [vmem:[#allocation122_spill] sm:$0xff] %v3744_v24  ;;  %v3751_v28 = vpop.permute.xlu0 %777 }
 0x233   :  { %7001 = vst [vmem:[#allocation123_spill] sm:$0xff] %v3751_v28  ;;  %v3775_v28 = vmul.f32 %v3099_v41, %v3054_v7 }
 0x234   :  { %1509 = vrot.lane.b32.xlu1 %v3185_v26, %s2867_s19 }
 0x235   :  { %v3755_v25 = vpop.permute.xlu1 %1141  ;;  %1477 = vrot.lane.b32.xlu0 %v3309_v54, %s2867_s19 }
 0x236   :  { %7002 = vst [vmem:[#allocation124_spill] sm:$0xff] %v3755_v25  ;;  %v3762_v24 = vpop.permute.xlu0 %801  ;;  %v3779_v25 = vmul.f32 %v3099_v41, %v3095_v31  ;;  %v317_v31 = vshra.s32 %v3765_v50, 4 }
 0x237   :  { %7004 = vst [vmem:[#allocation126_spill] sm:$0xff] %v3762_v24  ;;  %v316_v24 = vshra.s32 %v3760_v27, 4 }
 0x238   :  { %1648 = vrot.lane.b32.xlu1 %v3054_v7, %s2869_s30  ;;  %v3797_v7 = vmul.f32 %v3117_v62, %v3115_v60 }
 0x239   :  { %v3769_v49 = vpop.permute.xlu1 %1151  ;;  %1501 = vrot.lane.b32.xlu0 %v3323_v48, %s2867_s19  ;;  %v3835_v42 = vand.u32 15, %v316_v24  ;;  %v3854_v24 = vand.u32 15, %v317_v31  ;;  %v323_v31 = vand.u32 15, %v3749_v17 }
 0x23a   :  { %7006 = vst [vmem:[#allocation128_spill] sm:$0xff] %v3769_v49  ;;  %v3785_v56 = vpop.permute.xlu0 %956  ;;  %v3789_v49 = vmul.f32 %v3099_v41, %v3069_v14  ;;  %7009 = vst [vmem:[#allocation131_spill] sm:$0xff] %v3797_v7  ;;  %v3808_v14 = vmul.f32 %v3117_v62, %v3125_v63  ;;  %v3812_v41 = vmul.f32 %v3117_v62, %v3185_v26 }
 0x23b   :  { %7008 = vst [vmem:[#allocation130_spill] sm:$0xff] %v3785_v56  ;;  %v3804_v56 = vmul.f32 %v3117_v62, %v3173_v61  ;;  %v315_v62 = vshra.s32 %v3749_v17, 4  ;;  %7016 = vst [vmem:[#allocation138_spill] sm:$0xff] %v3835_v42  ;;  %vm6725_vm5 = vcmp.ge.s32.totalorder %v3835_v42, 1  ;;  %vm6726_vm7 = vcmp.ge.s32.totalorder %v3854_v24, 1 }
 0x23c   :  { %1650 = vrot.lane.b32.xlu1 %v3115_v60, %s2869_s30  ;;  %7011 = vst [vmem:[#allocation133_spill] sm:$0xff] %v3808_v14  ;;  %v3822_v60 = vmul.f32 %v3006_v37, %v3224_v59  ;;  %v3830_v14 = vmul.f32 %v3006_v37, %v3235_v23  ;;  %7021 = vst [vmem:[#allocation143_spill] sm:$0xff] %v3854_v24  ;;  %vm3936_vm11 = vcmp.ge.s32.totalorder %v323_v31, 1 }
 0x23d   :  { %7010 = vst [vmem:[#allocation132_spill] sm:$0xff] %v3804_v56  ;;  %v3818_v7 = vpop.permute.xlu1 %1290  ;;  %v3826_v56 = vmul.f32 %v3006_v37, %v3212_v30  ;;  %1652 = vrot.lane.b32.xlu0 %v3204_v46, %s2869_s30  ;;  %v3848_v37 = vmul.f32 %v3008_v38, %v3267_v19  ;;  %v3852_v46 = vmul.f32 %v3008_v38, %v3323_v48  ;;  %v325_v48 = vand.u32 15, %v3765_v50 }
 0x23e   :  { %7013 = vst [vmem:[#allocation135_spill] sm:$0xff] %v3818_v7  ;;  %7014 = vst [vmem:[#allocation136_spill] sm:$0xff] %v3822_v60  ;;  %v324_v7 = vand.u32 15, %v3760_v27  ;;  %v318_v60 = vshra.s32 %v3783_v18, 4  ;;  %v3840_v59 = vpop.permute.xlu0 %980  ;;  %v3864_v27 = vmul.f32 %v3129_v4, %v3302_v21  ;;  %v7026_v50 = vmov 0 }
 0x23f   :  { %7015 = vst [vmem:[#allocation137_spill] sm:$0xff] %v3826_v56  ;;  %7017 = vst [vmem:[#allocation139_spill] sm:$0xff] %v3840_v59  ;;  %v3844_v56 = vmul.f32 %v3008_v38, %v3309_v54  ;;  %v3860_v59 = vmul.f32 %v3008_v38, %v3279_v52  ;;  %v3868_v54 = vmul.f32 %v3129_v4, %v3316_v2  ;;  %vm3908_vm8 = vcmp.ge.s32.totalorder %v325_v48, 1 }
 0x240   :  { %7019 = vst [vmem:[#allocation141_spill] sm:$0xff] %v3848_v37  ;;  %7020 = vst [vmem:[#allocation142_spill] sm:$0xff] %v3852_v46  ;;  %1662 = vrot.lane.b32.xlu1 %v3173_v61, %s2869_s30  ;;  %v458_v38 = vsel %vm6716_vm3, %v3313_v58, %v3369_v43  ;;  %v3878_v61 = vand.u32 15, %v315_v62  ;;  %vm3884_vm6 = vcmp.ge.s32.totalorder %v324_v7, 1  ;;  %v3895_v62 = vmul.f32 %v3010_v39, %v3395_v32 }
 0x241   :  { %7018 = vst [vmem:[#allocation140_spill] sm:$0xff] %v3844_v56  ;;  %7022 = vst [vmem:[#allocation144_spill] sm:$0xff] %v3860_v59  ;;  %v3871_v56 = vpop.permute.xlu1 %1292  ;;  %1676 = vrot.lane.b32.xlu0 %v3212_v30, %s2869_s30  ;;  %v7027_v50 = vsel %vm3884_vm6, 4294967295, %v7026_v50  ;;  %v326_v59 = vand.u32 15, %v3783_v18  ;;  %v3903_v30 = vmul.f32 %v3129_v4, %v3344_v13  ;;  %v452_v18 = vsel %vm6716_vm3, %v3369_v43, %v3328_v40 }
 0x242   :  { %7023 = vst [vmem:[#allocation145_spill] sm:$0xff] %v3864_v27  ;;  %7024 = vst [vmem:[#allocation146_spill] sm:$0xff] %v3868_v54  ;;  %v3891_v46 = vpop.permute.xlu0 %1131  ;;  %v3899_v27 = vmul.f32 %v3129_v4, %v3331_v3  ;;  %v464_v4 = vsel %vm6716_vm3, %v3377_v20, %v3313_v58  ;;  %vm6720_vm10 = vcmp.ge.s32.totalorder %v3878_v61, 1  ;;  %v446_v58 = vsel %vm6716_vm3, %v3328_v40, %v3377_v20 }
 0x243   :  { %7025 = vst [vmem:[#allocation147_spill] sm:$0xff] %v3871_v56  ;;  %7028 = vst [vmem:[#allocation148_spill] sm:$0xff] %v7027_v50  ;;  %v3888_v56 = vand.u32 15, %v318_v60  ;;  %v7032_v60 = vmov 0  ;;  %vm3951_vm13 = vcmp.ge.s32.totalorder %v326_v59, 1  ;;  %v3960_v20 = vmul.f32 %v3010_v39, %v3386_v55 }
 0x244   :  { %7029 = vst [vmem:[#allocation149_spill] sm:$0xff] %v3891_v46  ;;  %7030 = vst [vmem:[#allocation150_spill] sm:$0xff] %v3895_v62  ;;  %1674 = vrot.lane.b32.xlu1 %v3125_v63, %s2869_s30  ;;  %v7033_v60 = vsel %vm3908_vm8, 4294967295, %v7032_v60  ;;  %v499_v46 = vmul.f32 %v3140_v47, %v458_v38  ;;  %v639_v63 = vsel %vm6717_vm4, %v3311_v51, %v3367_v57  ;;  %v7038_v38 = vmov 0 }
 0x245   :  { %7031 = vst [vmem:[#allocation151_spill] sm:$0xff] %v3903_v30  ;;  %7034 = vst [vmem:[#allocation152_spill] sm:$0xff] %v7033_v60  ;;  %v3921_v62 = vpop.permute.xlu1 %1304  ;;  %v7039_v38 = vsel %vm3936_vm11, 4294967295, %v7038_v38  ;;  %1686 = vrot.lane.b32.xlu0 %v3185_v26, %s2869_s30  ;;  %vm6718_vm12 = vcmp.ge.s32.totalorder %v3888_v56, 1  ;;  %v7041_v30 = vmov 0  ;;  %v3964_v26 = vmul.f32 %v3010_v39, %v3409_v34  ;;  %v7282_v60 = vld [vmem:[#allocation14_spill] sm:$0xff] }
 0x246   :  { %7035 = vst [vmem:[#allocation153_spill] sm:$0xff] %v3921_v62  ;;  %vm3931_vm9 = vmand %vm6725_vm5, %vm3884_vm6  ;;  %v633_v62 = vsel %vm6717_vm4, %v3367_v57, %v3341_v53  ;;  %v7042_v30 = vsel %vm3951_vm13, 4294967295, %v7041_v30  ;;  %v3956_v2 = vpop.permute.xlu0 %1153  ;;  %v500_v57 = vmul.f32 %v3140_v47, %v452_v18  ;;  %v676_v37 = vmul.f32 %v3163_v33, %v639_v63 }
 0x247   :  { %7040 = vst [vmem:[#allocation154_spill] sm:$0xff] %v7039_v38  ;;  %7043 = vst [vmem:[#allocation155_spill] sm:$0xff] %v7042_v30  ;;  %v7049_v54 = vmov 0  ;;  %v501_v18 = vmul.f32 %v3140_v47, %v446_v58  ;;  %vm3991_vm1 = vcmp.lt.s32.totalorder %v324_v7, 15  ;;  %v677_v63 = vmul.f32 %v3163_v33, %v633_v62 }
 0x248   :  { %7044 = vst [vmem:[#allocation156_spill] sm:$0xff] %v3956_v2  ;;  %7045 = vst [vmem:[#allocation157_spill] sm:$0xff] %v3960_v20  ;;  %v498_v2 = vmul.f32 %v3140_v47, %v464_v4  ;;  %v2814_v20 = vld [vmem:[%s6569_s1 + $0x10] sm:$0xff]  ;;  %v7051_v4 = vmov 0  ;;  %v645_v21 = vsel %vm6717_vm4, %v3375_v35, %v3311_v51  ;;  %v7055_v47 = vmov 0 }
 0x249   :  { %7046 = vst [vmem:[#allocation158_spill] sm:$0xff] %v3964_v26  ;;  %vm3970_vm15 = vmand %vm6726_vm7, %vm3908_vm8  ;;  %1838 = vperm.xlu1 %2676, %v2814_v20   ;;  %v531_v26 = vsel %vm3931_vm9, %v499_v46, 0.0  ;;  %v7052_v4 = vsel %vm3991_vm1, 4294967295, %v7051_v4  ;;  %v3995_v20 = vpop.permute.xlu1 %1316  ;;  %v627_v46 = vsel %vm6717_vm4, %v3341_v53, %v3375_v35  ;;  %v816_v7 = vsel %vm6722_vm14, %v3353_v45, %v3388_v6  ;;  %1842 = vperm.xlu0 %2679, %v3691_v5  }
 0x24a   :  { %vm3986_vm0 = vmand %vm6720_vm10, %vm3936_vm11  ;;  %7053 = vst [vmem:[#allocation159_spill] sm:$0xff] %v7052_v4  ;;  %vm4019_vm3 = vcmp.lt.s32.totalorder %v325_v48, 15  ;;  %v7057_v53 = vmov 0  ;;  %v810_v51 = vsel %vm6722_vm14, %v3388_v6, %v3326_v44  ;;  %vm4027_vm4 = vcmp.lt.s32.totalorder %v323_v31, 15  ;;  %v4035_v58 = vpop.permute.xlu0 %1306 }
 0x24b   :  { %v7050_v54 = vsel %vm3986_vm0, 4294967295, %v7049_v54  ;;  %7054 = vst [vmem:[#allocation160_spill] sm:$0xff] %v3995_v20  ;;  %vm4010_vm2 = vmand %vm6718_vm12, %vm3951_vm13  ;;  %v7058_v53 = vsel %vm4019_vm3, 4294967295, %v7057_v53  ;;  %v7060_v35 = vmov 0  ;;  %vm4031_vm12 = vcmp.lt.s32.totalorder %v326_v59, 15 }
 0x24c   :  { %v7056_v47 = vsel %vm4010_vm2, 4294967295, %v7055_v47  ;;  %7059 = vst [vmem:[#allocation161_spill] sm:$0xff] %v7058_v53  ;;  %v7061_v35 = vsel %vm4027_vm4, 4294967295, %v7060_v35  ;;  %v7063_v62 = vmov 0  ;;  %7066 = vst [vmem:[#allocation164_spill] sm:$0xff] %v4035_v58  ;;  %v532_v48 = vsel %vm3970_vm15, %v500_v57, 0.0 }
 0x24d   :  { %7062 = vst [vmem:[#allocation162_spill] sm:$0xff] %v7061_v35  ;;  %v7064_v62 = vsel %vm4031_vm12, 4294967295, %v7063_v62  ;;  %v555_v5 = vadd.f32 %v531_v26, %v3779_v25  ;;  %v530_v20 = vsel %vm3986_vm0, %v498_v2, 0.0  ;;  %970 = vrot.lane.b32.xlu1 %v3409_v34, %s2863_s16  ;;  %v675_v59 = vmul.f32 %v3163_v33, %v645_v21  ;;  %v4050_v57 = vpop.permute.xlu1 %1557  ;;  %vm4061_vm10 = vmand %vm6725_vm5, %vm3991_vm1  ;;  %1312 = vrot.lane.b32.xlu0 %v3386_v55, %s2866_s18  ;;  %v7157_v53 = vld [vmem:[#allocation24_spill] sm:$0xff] }
 0x24e   :  { %7065 = vst [vmem:[#allocation163_spill] sm:$0xff] %v7064_v62  ;;  %v678_v6 = vmul.f32 %v3163_v33, %v627_v46  ;;  %v533_v31 = vsel %vm4010_vm2, %v501_v18, 0.0  ;;  %v857_v58 = vmul.f32 %v3178_v22, %v816_v7  ;;  %7067 = vst [vmem:[#allocation165_spill] sm:$0xff] %v4050_v57  ;;  %2678 = vset.pattern.permute.xlu1 %v6956_v10  ;;  %v708_v2 = vsel %vm6725_vm5, %v676_v37, 0.0 }
 0x24f   :  { %v709_v25 = vsel %vm6726_vm7, %v677_v63, 0.0  ;;  %v858_v33 = vmul.f32 %v3178_v22, %v810_v51  ;;  %v556_v10 = vadd.f32 %v532_v48, %v3789_v49  ;;  %v554_v37 = vadd.f32 %v530_v20, %v3775_v28  ;;  %vm4075_vm2 = vmand %vm6726_vm7, %vm4019_vm3  ;;  %v4087_v63 = vpop.permute.xlu0 %1326  ;;  %v7303_v40 = vld [vmem:[#allocation157_spill] sm:$0xff] }
 0x250   :  { %vm7072_vm5 = vcmp.lt.s32.totalorder %v3749_v17, 15  ;;  %7074 = vst [vmem:[#allocation166_spill] sm:$0xff] %v4087_v63  ;;  %v557_v28 = vadd.f32 %v533_v31, %v3793_v16  ;;  %vm7075_vm7 = vcmp.lt.s32.totalorder %v3749_v17, 1  ;;  %vm7079_vm0 = vcmp.ge.s32.totalorder %v3888_v56, 1 }
 0x251   :  { %v804_v18 = vsel %vm7072_vm5, %v3326_v44, %v3402_v11  ;;  %vm7073_vm14 = vmmov %vm7072_vm5  ;;  %v991_v20 = vsel %vm7075_vm7, %v3413_v9, %v3351_v36  ;;  %1135 = vrot.lane.b32.xlu1 %v3386_v55, %s2864_s17  ;;  %v889_v7 = vsel %vm4061_vm10, %v857_v58, 0.0  ;;  %1334 = vrot.lane.b32.xlu0 %v3344_v13, %s2866_s18 }
 0x252   :  { %v822_v49 = vsel %vm7073_vm14, %v3402_v11, %v3353_v45  ;;  %vm7076_vm3 = vmmov %vm7075_vm7  ;;  %vm7078_vm14 = vcmp.ge.s32.totalorder %v3878_v61, 1  ;;  %v710_v45 = vsel %vm7079_vm0, %v678_v6, 0.0  ;;  %v732_v11 = vadd.f32 %v708_v2, %v555_v5  ;;  %v4128_v5 = vpop.permute.xlu1 %1734 }
 0x253   :  { %v997_v46 = vsel %vm7076_vm3, %v3339_v8, %v3413_v9  ;;  %vm7077_vm5 = vmmov %vm7076_vm3  ;;  %v707_v16 = vsel %vm7078_vm14, %v675_v59, 0.0  ;;  %v890_v9 = vsel %vm4075_vm2, %v858_v33, 0.0  ;;  %v856_v51 = vmul.f32 %v3178_v22, %v822_v49  ;;  %7084 = vst [vmem:[#allocation167_spill] sm:$0xff] %v4128_v5  ;;  %v4145_v2 = vpop.permute.xlu0 %1388 }
 0x254   :  { %v1003_v44 = vsel %vm7077_vm5, %v3421_v12, %v3339_v8  ;;  %vm7080_vm3 = vmmov %vm7078_vm14  ;;  %v859_v48 = vmul.f32 %v3178_v22, %v804_v18  ;;  %v1034_v22 = vmul.f32 %v3127_v1, %v997_v46  ;;  %v1035_v6 = vmul.f32 %v3127_v1, %v991_v20 }
 0x255   :  { %vm4116_vm7 = vmand %vm7080_vm3, %vm4027_vm4  ;;  %v1033_v31 = vmul.f32 %v3127_v1, %v1003_v44  ;;  %vm7089_vm3 = vcmp.lt.s32.totalorder %v3749_v17, 127  ;;  %v4149_v33 = vmul.f32 %v3010_v39, %v3400_v0  ;;  %v733_v18 = vadd.f32 %v709_v25, %v556_v10  ;;  %1157 = vrot.lane.b32.xlu1 %v3344_v13, %s2864_s17  ;;  %v7092_v44 = vld [vmem:[#allocation42_spill] sm:$0xff]  ;;  %1491 = vrot.lane.b32.xlu0 %v3331_v3, %s2867_s19 }
 0x256   :  { %vm7083_vm0 = vmmov %vm7077_vm5  ;;  %vm7085_vm5 = vcmp.ge.s32.totalorder %v3888_v56, 1  ;;  %v731_v49 = vadd.f32 %v707_v16, %v554_v37  ;;  %v734_v57 = vadd.f32 %v710_v45, %v557_v28  ;;  %v913_v20 = vadd.f32 %v889_v7, %v732_v11  ;;  %v7096_v37 = vld [vmem:[#allocation17_spill] sm:$0xff]  ;;  %v7098_v11 = vld [vmem:[#allocation44_spill] sm:$0xff] }
 0x257   :  { %v985_v58 = vsel %vm7083_vm0, %v3351_v36, %v3421_v12  ;;  %vm4134_vm14 = vmand %vm7085_vm5, %vm4031_vm12  ;;  %v7088_v36 = vld [vmem:[#allocation41_spill] sm:$0xff]  ;;  %7091 = vst [vmem:[#allocation168_spill] sm:$0xff] %v4149_v33  ;;  %vm7095_vm5 = vcmp.lt.s32.totalorder %v3749_v17, 17  ;;  %v914_v63 = vadd.f32 %v890_v9, %v733_v18  ;;  %v888_v25 = vsel %vm4116_vm7, %v856_v51, 0.0  ;;  %v7105_v18 = vld [vmem:[#allocation55_spill] sm:$0xff] }
 0x258   :  { %v1174_v12 = vsel %vm7089_vm3, %v7088_v36, %v3429_v15  ;;  %7090 = vst [vmem:[#allocation41_spill] sm:$0xff] %v4145_v2  ;;  %v1036_v46 = vmul.f32 %v3127_v1, %v985_v58  ;;  %vm7093_vm0 = vmmov %vm7089_vm3  ;;  %v7094_v2 = vld [vmem:[#allocation43_spill] sm:$0xff]  ;;  %v891_v10 = vsel %vm4134_vm14, %v859_v48, 0.0  ;;  %v4169_v1 = vpop.permute.xlu1 %765  ;;  %v1067_v16 = vsel %vm3908_vm8, %v1035_v6, 0.0  ;;  %v7100_v51 = vld [vmem:[#allocation5_spill] sm:$0xff] }
 0x259   :  { %v1168_v5 = vsel %vm7093_vm0, %v3429_v15, %v7092_v44  ;;  %v459_v39 = vsel %vm7095_vm5, %v7094_v2, %v3450_v29  ;;  %v1210_v28 = vmul.f32 %v7096_v37, %v1174_v12  ;;  %7097 = vst [vmem:[#allocation42_spill] sm:$0xff] %v4169_v1  ;;  %v1066_v15 = vsel %vm3884_vm6, %v1034_v22, 0.0  ;;  %vm7099_vm3 = vmmov %vm7095_vm5  ;;  %v7101_v58 = vld [vmem:[#allocation54_spill] sm:$0xff]  ;;  %1310 = vrot.lane.b32.xlu1 %v3331_v3, %s2866_s18 }
 0x25a   :  { %v1065_v45 = vsel %vm3936_vm11, %v1033_v31, 0.0  ;;  %v453_v7 = vsel %vm7099_vm3, %v3450_v29, %v7098_v11  ;;  %v4182_v9 = vmul.f32 %v7096_v37, %v1168_v5  ;;  %v503_v48 = vmul.f32 %v7100_v51, %v459_v39  ;;  %vm7102_vm0 = vmmov %vm7099_vm3  ;;  %v4193_v31 = vpop.permute.xlu0 %1545  ;;  %v7106_v39 = vld [vmem:[#allocation50_spill] sm:$0xff]  ;;  %1513 = vrot.lane.b32.xlu0 %v3279_v52, %s2867_s19 }
 0x25b   :  { %v447_v22 = vsel %vm7102_vm0, %v7098_v11, %v7101_v58  ;;  %vm7103_vm5 = vmmov %vm7102_vm0  ;;  %7104 = vst [vmem:[#allocation43_spill] sm:$0xff] %v4193_v31  ;;  %v912_v29 = vadd.f32 %v888_v25, %v731_v49  ;;  %v915_v5 = vadd.f32 %v891_v10, %v734_v57  ;;  %v1068_v12 = vsel %vm3951_vm13, %v1036_v46, 0.0  ;;  %v7108_v31 = vld [vmem:[#allocation46_spill] sm:$0xff] }
 0x25c   :  { %v465_v6 = vsel %vm7103_vm5, %v7101_v58, %v7094_v2  ;;  %vm7107_vm3 = vcmp.lt.s32.totalorder %v3749_v17, 16  ;;  %v4203_v1 = vadd.f32 %v1066_v15, %v913_v20  ;;  %v1242_v2 = vsel %vm4027_vm4, %v1210_v28, 0.0  ;;  %v4214_v49 = vpop.permute.xlu1 %787 }
 0x25d   :  { %v640_v11 = vsel %vm7107_vm3, %v7106_v39, %v7105_v18  ;;  %v504_v58 = vmul.f32 %v7100_v51, %v453_v7  ;;  %vm7109_vm0 = vmmov %vm7107_vm3  ;;  %7110 = vst [vmem:[#allocation17_spill] sm:$0xff] %v4214_v49  ;;  %v4216_v46 = vadd.f32 %v1067_v16, %v914_v63  ;;  %v1089_v25 = vadd.f32 %v1065_v45, %v912_v29  ;;  %v7116_v45 = vld [vmem:[#allocation57_spill] sm:$0xff]  ;;  %v7139_v49 = vld [vmem:[#allocation131_spill] sm:$0xff] }
 0x25e   :  { %v634_v57 = vsel %vm7109_vm0, %v7105_v18, %v7108_v31  ;;  %v502_v20 = vmul.f32 %v7100_v51, %v465_v6  ;;  %v505_v10 = vmul.f32 %v7100_v51, %v447_v22  ;;  %v4220_v28 = vadd.f32 %v1068_v12, %v915_v5  ;;  %v7113_v18 = vld [vmem:[#allocation8_spill] sm:$0xff]  ;;  %v4228_v62 = vpop.permute.xlu0 %1473  ;;  %1332 = vrot.lane.b32.xlu1 %v3279_v52, %s2866_s18  ;;  %vm7117_vm5 = vmmov %vm7109_vm0  ;;  %v7122_v5 = vld [vmem:[#allocation47_spill] sm:$0xff] }
 0x25f   :  { %7111 = vst [vmem:[#allocation44_spill] sm:$0xff] %v4216_v46  ;;  %v1243_v15 = vsel %vm3991_vm1, %v4182_v9, 0.0  ;;  %v535_v7 = vsel %vm3931_vm9, %v503_v48, 0.0  ;;  %v680_v33 = vmul.f32 %v7113_v18, %v640_v11  ;;  %7114 = vst [vmem:[#allocation54_spill] sm:$0xff] %v4228_v62  ;;  %v4232_v63 = vadd.f32 %v1242_v2, %v1089_v25  ;;  %v7119_v22 = vld [vmem:[#allocation52_spill] sm:$0xff]  ;;  %1666 = vrot.lane.b32.xlu0 %v3267_v19, %s2869_s30  ;;  %v7141_v46 = vld [vmem:[#allocation53_spill] sm:$0xff] }
 0x260   :  { %7112 = vst [vmem:[#allocation5_spill] sm:$0xff] %v4220_v28  ;;  %v681_v16 = vmul.f32 %v7113_v18, %v634_v57  ;;  %v628_v51 = vsel %vm7117_vm5, %v7108_v31, %v7116_v45  ;;  %vm7118_vm3 = vmmov %vm7109_vm0  ;;  %v536_v48 = vsel %vm3970_vm15, %v504_v58, 0.0  ;;  %v7120_v6 = vld [vmem:[#allocation56_spill] sm:$0xff]  ;;  %vm7121_vm0 = vcmp.lt.s32.totalorder %v3749_v17, 15  ;;  %v7124_v31 = vld [vmem:[#allocation58_spill] sm:$0xff] }
 0x261   :  { %7115 = vst [vmem:[#allocation55_spill] sm:$0xff] %v4232_v63  ;;  %v646_v9 = vsel %vm7118_vm3, %v7116_v45, %v7106_v39  ;;  %v811_v29 = vsel %vm7121_vm0, %v7120_v6, %v7119_v22  ;;  %vm7123_vm12 = vmmov %vm7121_vm0  ;;  %v4259_v39 = vpop.permute.xlu1 %944  ;;  %v7127_v2 = vld [vmem:[#allocation132_spill] sm:$0xff]  ;;  %vm7128_vm3 = vnez %v7050_v54  ;;  %v682_v62 = vmul.f32 %v7113_v18, %v628_v51 }
 0x262   :  { %v817_v12 = vsel %vm7123_vm12, %v7122_v5, %v7120_v6  ;;  %vm7125_vm5 = vmmov %vm7121_vm0  ;;  %7126 = vst [vmem:[#allocation50_spill] sm:$0xff] %v4259_v39  ;;  %v559_v58 = vadd.f32 %v535_v7, %v7127_v2  ;;  %v534_v57 = vsel %vm7128_vm3, %v502_v20, 0.0  ;;  %vm7129_vm0 = vnez %v7056_v47  ;;  %v7132_v39 = vld [vmem:[#allocation60_spill] sm:$0xff]  ;;  %v4278_v2 = vpop.permute.xlu0 %1485  ;;  %1489 = vrot.lane.b32.xlu1 %v3267_v19, %s2867_s19 }
 0x263   :  { %v823_v11 = vsel %vm7125_vm5, %v7124_v31, %v7122_v5  ;;  %v537_v25 = vsel %vm7129_vm0, %v505_v10, 0.0  ;;  %vm7130_vm12 = vmmov %vm7125_vm5  ;;  %vm7131_vm5 = vcmp.ge.s32.totalorder %v3835_v42, 1  ;;  %v679_v5 = vmul.f32 %v7113_v18, %v646_v9  ;;  %v7133_v7 = vld [vmem:[#allocation48_spill] sm:$0xff]  ;;  %7135 = vst [vmem:[#allocation46_spill] sm:$0xff] %v4278_v2  ;;  %v7138_v18 = vld [vmem:[#allocation133_spill] sm:$0xff]  ;;  %1688 = vrot.lane.b32.xlu0 %v3235_v23, %s2869_s30 }
 0x264   :  { %v805_v45 = vsel %vm7130_vm12, %v7119_v22, %v7124_v31  ;;  %v712_v6 = vsel %vm7131_vm5, %v680_v33, 0.0  ;;  %vm7134_vm1 = vcmp.lt.s32.totalorder %v3749_v17, 1  ;;  %vm7136_vm0 = vcmp.ge.s32.totalorder %v3854_v24, 1  ;;  %v7137_v22 = vld [vmem:[#allocation10_spill] sm:$0xff] }
 0x265   :  { %v998_v20 = vsel %vm7134_vm1, %v7133_v7, %v7132_v39  ;;  %v713_v10 = vsel %vm7136_vm0, %v681_v16, 0.0  ;;  %v861_v31 = vmul.f32 %v7137_v22, %v817_v12  ;;  %v862_v33 = vmul.f32 %v7137_v22, %v811_v29  ;;  %v4293_v19 = vpop.permute.xlu1 %966  ;;  %v7142_v12 = vld [vmem:[#allocation28_spill] sm:$0xff]  ;;  %vm7144_vm0 = vmmov %vm7134_vm1 }
 0x266   :  { %v860_v9 = vmul.f32 %v7137_v22, %v823_v11  ;;  %v560_v51 = vadd.f32 %v536_v48, %v7138_v18  ;;  %v558_v63 = vadd.f32 %v534_v57, %v7139_v49  ;;  %v561_v28 = vadd.f32 %v537_v25, %v3812_v41  ;;  %7140 = vst [vmem:[#allocation8_spill] sm:$0xff] %v4293_v19  ;;  %v7143_v48 = vld [vmem:[#allocation62_spill] sm:$0xff]  ;;  %vm7147_vm4 = vmmov %vm7144_vm0 }
 0x267   :  { %v863_v2 = vmul.f32 %v7137_v22, %v805_v45  ;;  %v736_v16 = vadd.f32 %v712_v6, %v559_v58  ;;  %v992_v29 = vsel %vm7134_vm1, %v7132_v39, %v7141_v46  ;;  %v1038_v11 = vmul.f32 %v7142_v12, %v998_v20  ;;  %v4312_v39 = vpop.permute.xlu0 %1497  ;;  %1511 = vrot.lane.b32.xlu1 %v3235_v23, %s2867_s19  ;;  %v7152_v22 = vld [vmem:[#allocation61_spill] sm:$0xff] }
 0x268   :  { %v1004_v41 = vsel %vm7144_vm0, %v7143_v48, %v7133_v7  ;;  %v737_v49 = vadd.f32 %v713_v10, %v560_v51  ;;  %vm7145_vm12 = vcmp.ge.s32.totalorder %v3878_v61, 1  ;;  %vm7146_vm5 = vcmp.ge.s32.totalorder %v3888_v56, 1  ;;  %7148 = vst [vmem:[#allocation57_spill] sm:$0xff] %v4312_v39  ;;  %v7150_v7 = vld [vmem:[#allocation59_spill] sm:$0xff]  ;;  %1336 = vrot.lane.b32.xlu0 %v3400_v0, %s2866_s18  ;;  %v7155_v39 = vld [vmem:[#allocation6_spill] sm:$0xff] }
 0x269   :  { %v711_v57 = vsel %vm7145_vm12, %v679_v5, 0.0  ;;  %v714_v25 = vsel %vm7146_vm5, %v682_v62, 0.0  ;;  %v986_v58 = vsel %vm7147_vm4, %v7141_v46, %v7143_v48  ;;  %v893_v45 = vsel %vm4061_vm10, %v861_v31, 0.0  ;;  %v7149_v62 = vld [vmem:[#allocation63_spill] sm:$0xff] }
 0x26a   :  { %v894_v6 = vsel %vm4075_vm2, %v862_v33, 0.0  ;;  %v892_v5 = vsel %vm4116_vm7, %v860_v9, 0.0  ;;  %vm7151_vm1 = vcmp.lt.s32.totalorder %v3749_v17, 17  ;;  %v895_v46 = vsel %vm4134_vm14, %v863_v2, 0.0  ;;  %v4336_v33 = vpop.permute.xlu1 %1119 }
 0x26b   :  { %v460_v20 = vsel %vm7151_vm1, %v7150_v7, %v7149_v62  ;;  %v1039_v10 = vmul.f32 %v7142_v12, %v992_v29  ;;  %v1037_v23 = vmul.f32 %v7142_v12, %v1004_v41  ;;  %vm7153_vm4 = vmmov %vm7151_vm1  ;;  %7154 = vst [vmem:[#allocation52_spill] sm:$0xff] %v4336_v33  ;;  %v735_v9 = vadd.f32 %v711_v57, %v558_v63  ;;  %v7161_v57 = vld [vmem:[#allocation49_spill] sm:$0xff] }
 0x26c   :  { %v454_v31 = vsel %vm7153_vm4, %v7149_v62, %v7152_v22  ;;  %v738_v18 = vadd.f32 %v714_v25, %v561_v28  ;;  %v1070_v51 = vsel %vm3884_vm6, %v1038_v11, 0.0  ;;  %v1040_v2 = vmul.f32 %v7142_v12, %v986_v58  ;;  %v4345_v62 = vpop.permute.xlu0 %789  ;;  %1664 = vrot.lane.b32.xlu1 %v7157_v53, %s2869_s30  ;;  %v7158_v11 = vld [vmem:[#allocation65_spill] sm:$0xff]  ;;  %vm7159_vm0 = vmmov %vm7151_vm1  ;;  %1493 = vrot.lane.b32.xlu0 %v3386_v55, %s2867_s19 }
 0x26d   :  { %v4342_v29 = vadd.f32 %v1243_v15, %v4203_v1  ;;  %v917_v48 = vadd.f32 %v893_v45, %v736_v16  ;;  %v918_v41 = vadd.f32 %v894_v6, %v737_v49  ;;  %v507_v19 = vmul.f32 %v7155_v39, %v460_v20  ;;  %7156 = vst [vmem:[#allocation56_spill] sm:$0xff] %v4345_v62  ;;  %v7160_v49 = vld [vmem:[#allocation64_spill] sm:$0xff]  ;;  %v7164_v45 = vld [vmem:[#allocation51_spill] sm:$0xff]  ;;  %vm7166_vm1 = vmmov %vm7159_vm0 }
 0x26e   :  { %v916_v33 = vadd.f32 %v892_v5, %v735_v9  ;;  %v919_v63 = vadd.f32 %v895_v46, %v738_v18  ;;  %v508_v28 = vmul.f32 %v7155_v39, %v454_v31  ;;  %v466_v12 = vsel %vm7159_vm0, %v7158_v11, %v7150_v7  ;;  %v4364_v25 = vpop.permute.xlu1 %1143  ;;  %v7167_v7 = vld [vmem:[#allocation76_spill] sm:$0xff]  ;;  %v7168_v20 = vld [vmem:[#allocation66_spill] sm:$0xff]  ;;  %v7170_v31 = vld [vmem:[#allocation67_spill] sm:$0xff] }
 0x26f   :  { %v1071_v1 = vsel %vm3908_vm8, %v1039_v10, 0.0  ;;  %v1094_v15 = vadd.f32 %v1070_v51, %v917_v48  ;;  %v1069_v16 = vsel %vm3936_vm11, %v1037_v23, 0.0  ;;  %vm7162_vm12 = vcmp.lt.s32.totalorder %v3749_v17, 127  ;;  %7163 = vst [vmem:[#allocation47_spill] sm:$0xff] %v4364_v25  ;;  %v7172_v18 = vld [vmem:[#allocation68_spill] sm:$0xff]  ;;  %v7179_v25 = vld [vmem:[#allocation9_spill] sm:$0xff] }
 0x270   :  { %v1175_v53 = vsel %vm7162_vm12, %v7161_v57, %v7160_v49  ;;  %v1072_v58 = vsel %vm3951_vm13, %v1040_v2, 0.0  ;;  %vm7165_vm5 = vmmov %vm7162_vm12  ;;  %v448_v5 = vsel %vm7166_vm1, %v7152_v22, %v7158_v11  ;;  %vm7169_vm4 = vcmp.lt.s32.totalorder %v3749_v17, 16  ;;  %v4391_v51 = vpop.permute.xlu0 %958  ;;  %v7175_v2 = vld [vmem:[#allocation11_spill] sm:$0xff]  ;;  %v7177_v11 = vld [vmem:[#allocation34_spill] sm:$0xff]  ;;  %1515 = vrot.lane.b32.xlu0 %v3344_v13, %s2867_s19 }
 0x271   :  { %v1169_v6 = vsel %vm7165_vm5, %v7160_v49, %v7164_v45  ;;  %v641_v46 = vsel %vm7169_vm4, %v7168_v20, %v7167_v7  ;;  %v539_v10 = vsel %vm3931_vm9, %v507_v19, 0.0  ;;  %v506_v23 = vmul.f32 %v7155_v39, %v466_v12  ;;  %vm7171_vm0 = vmmov %vm7169_vm4  ;;  %7174 = vst [vmem:[#allocation58_spill] sm:$0xff] %v4391_v51  ;;  %1684 = vrot.lane.b32.xlu1 %v7175_v2, %s2869_s30 }
 0x272   :  { %v647_v9 = vsel %vm7171_vm0, %v7170_v31, %v7168_v20  ;;  %vm7173_vm12 = vmmov %vm7171_vm0  ;;  %v4395_v48 = vadd.f32 %v1071_v1, %v918_v41  ;;  %v540_v19 = vsel %vm3970_vm15, %v508_v28, 0.0  ;;  %v1214_v12 = vmul.f32 %v7177_v11, %v1175_v53  ;;  %v4409_v41 = vpop.permute.xlu1 %1294  ;;  %v7182_v1 = vld [vmem:[#allocation136_spill] sm:$0xff] }
 0x273   :  { %v635_v22 = vsel %vm7173_vm12, %v7167_v7, %v7172_v18  ;;  %vm7178_vm5 = vmmov %vm7171_vm0  ;;  %v1093_v20 = vadd.f32 %v1069_v16, %v916_v33  ;;  %v1215_v7 = vmul.f32 %v7177_v11, %v1169_v6  ;;  %v509_v51 = vmul.f32 %v7155_v39, %v448_v5  ;;  %7180 = vst [vmem:[#allocation60_spill] sm:$0xff] %v4409_v41  ;;  %v7183_v33 = vld [vmem:[#allocation137_spill] sm:$0xff] }
 0x274   :  { %7176 = vst [vmem:[#allocation132_spill] sm:$0xff] %v4395_v48  ;;  %v629_v49 = vsel %vm7178_vm5, %v7172_v18, %v7170_v31  ;;  %v684_v62 = vmul.f32 %v7179_v25, %v641_v46  ;;  %v4411_v28 = vadd.f32 %v1072_v58, %v919_v63  ;;  %v563_v53 = vadd.f32 %v539_v10, %v7182_v1  ;;  %v7184_v5 = vld [vmem:[#allocation69_spill] sm:$0xff]  ;;  %v7185_v46 = vld [vmem:[#allocation70_spill] sm:$0xff]  ;;  %v4424_v63 = vpop.permute.xlu0 %982  ;;  %v7197_v1 = vld [vmem:[#allocation71_spill] sm:$0xff] }
 0x275   :  { %v683_v2 = vmul.f32 %v7179_v25, %v647_v9  ;;  %v685_v31 = vmul.f32 %v7179_v25, %v635_v22  ;;  %v564_v16 = vadd.f32 %v540_v19, %v7183_v33  ;;  %v538_v39 = vsel %vm7128_vm3, %v506_v23, 0.0  ;;  %7187 = vst [vmem:[#allocation10_spill] sm:$0xff] %v4424_v63  ;;  %v7188_v58 = vld [vmem:[#allocation105_spill] sm:$0xff]  ;;  %v7190_v9 = vld [vmem:[#allocation72_spill] sm:$0xff]  ;;  %v7192_v23 = vld [vmem:[#allocation78_spill] sm:$0xff]  ;;  %1668 = vrot.lane.b32.xlu0 %v3331_v3, %s2869_s30 }
 0x276   :  { %7181 = vst [vmem:[#allocation48_spill] sm:$0xff] %v4411_v28  ;;  %v686_v6 = vmul.f32 %v7179_v25, %v629_v49  ;;  %vm7186_vm1 = vcmp.lt.s32.totalorder %v3749_v17, 15  ;;  %1746 = vperm.xlu1 %2678, %v7188_v58   ;;  %vm7189_vm4 = vnez %v7061_v35  ;;  %v7198_v33 = vld [vmem:[#allocation74_spill] sm:$0xff]  ;;  %vm7200_vm13 = vcmp.ge.s32.totalorder %v3835_v42, 1  ;;  %v7204_v63 = vld [vmem:[#allocation19_spill] sm:$0xff] }
 0x277   :  { %v818_v18 = vsel %vm7186_vm1, %v7185_v46, %v7184_v5  ;;  %v1246_v10 = vsel %vm7189_vm4, %v1214_v12, 0.0  ;;  %vm7191_vm0 = vmmov %vm7186_vm1  ;;  %vm7195_vm1 = vnez %v7052_v4  ;;  %vm7196_vm4 = vnez %v7056_v47  ;;  %v7215_v4 = vld [vmem:[#allocation81_spill] sm:$0xff] }
 0x278   :  { %v812_v22 = vsel %vm7191_vm0, %v7184_v5, %v7190_v9  ;;  %vm7193_vm12 = vmmov %vm7191_vm0  ;;  %v1247_v49 = vsel %vm7195_vm1, %v1215_v7, 0.0  ;;  %v541_v12 = vsel %vm7196_vm4, %v509_v51, 0.0  ;;  %v716_v58 = vsel %vm7200_vm13, %v684_v62, 0.0 }
 0x279   :  { %v806_v25 = vsel %vm7193_vm12, %v7190_v9, %v7192_v23  ;;  %vm7194_vm5 = vmmov %vm7191_vm0  ;;  %vm7199_vm0 = vcmp.lt.s32.totalorder %v3749_v17, 1  ;;  %v4453_v9 = vpop.permute.xlu1 %1318  ;;  %vm7203_vm12 = vcmp.ge.s32.totalorder %v3878_v61, 1  ;;  %v865_v51 = vmul.f32 %v7204_v63, %v818_v18  ;;  %1690 = vrot.lane.b32.xlu0 %v3279_v52, %s2869_s30 }
 0x27a   :  { %v824_v19 = vsel %vm7194_vm5, %v7192_v23, %v7185_v46  ;;  %v999_v5 = vsel %vm7199_vm0, %v7198_v33, %v7197_v1  ;;  %7201 = vst [vmem:[#allocation133_spill] sm:$0xff] %v4453_v9  ;;  %v7202_v46 = vld [vmem:[#allocation134_spill] sm:$0xff]  ;;  %v715_v7 = vsel %vm7203_vm12, %v683_v2, 0.0  ;;  %vm7205_vm5 = vcmp.ge.s32.totalorder %v3854_v24, 1  ;;  %v4466_v9 = vpop.permute.xlu0 %1133  ;;  %1159 = vrot.lane.b32.xlu1 %v3400_v0, %s2864_s17 }
 0x27b   :  { %v562_v23 = vadd.f32 %v538_v39, %v7202_v46  ;;  %v717_v41 = vsel %vm7205_vm5, %v685_v31, 0.0  ;;  %vm7206_vm0 = vcmp.ge.s32.totalorder %v3888_v56, 1  ;;  %v866_v62 = vmul.f32 %v7204_v63, %v812_v22  ;;  %7207 = vst [vmem:[#allocation131_spill] sm:$0xff] %v4466_v9  ;;  %v7208_v39 = vld [vmem:[#allocation16_spill] sm:$0xff]  ;;  %v7214_v9 = vld [vmem:[#allocation85_spill] sm:$0xff] }
 0x27c   :  { %v718_v28 = vsel %vm7206_vm0, %v686_v6, 0.0  ;;  %v864_v48 = vmul.f32 %v7204_v63, %v824_v19  ;;  %v867_v3 = vmul.f32 %v7204_v63, %v806_v25  ;;  %v565_v2 = vadd.f32 %v541_v12, %v3830_v14  ;;  %v7209_v31 = vld [vmem:[#allocation80_spill] sm:$0xff] }
 0x27d   :  { %v1042_v18 = vmul.f32 %v7208_v39, %v999_v5  ;;  %v740_v46 = vadd.f32 %v716_v58, %v563_v53  ;;  %vm7210_vm13 = vcmp.lt.s32.totalorder %v3749_v17, 1  ;;  %v7211_v22 = vmov 24   ;;  %v4487_v53 = vpop.permute.xlu1 %1328  ;;  %1517 = vrot.lane.b32.xlu0 %v3400_v0, %s2867_s19 }
 0x27e   :  { %v1005_v6 = vsel %vm7210_vm13, %v7209_v31, %v7198_v33  ;;  %2680 = vset.pattern.permute.xlu1 %v7211_v22  ;;  %v4477_v19 = vadd.f32 %v1246_v10, %v1093_v20  ;;  %v4479_v63 = vadd.f32 %v1247_v49, %v1094_v15  ;;  %v741_v25 = vadd.f32 %v717_v41, %v564_v16  ;;  %v7218_v20 = vld [vmem:[#allocation83_spill] sm:$0xff] }
 0x27f   :  { %vm7216_vm12 = vcmp.lt.s32.totalorder %v3749_v17, 17  ;;  %7217 = vst [vmem:[#allocation62_spill] sm:$0xff] %v4487_v53  ;;  %v739_v12 = vadd.f32 %v715_v7, %v562_v23  ;;  %v742_v5 = vadd.f32 %v718_v28, %v565_v2  ;;  %v897_v33 = vsel %vm4061_vm10, %v865_v51, 0.0  ;;  %v4502_v28 = vpop.permute.xlu0 %1155  ;;  %1300 = vrot.lane.b32.xlu1 %v3395_v32, %s2866_s18  ;;  %v7222_v7 = vld [vmem:[#allocation92_spill] sm:$0xff]  ;;  %v7223_v51 = vld [vmem:[#allocation82_spill] sm:$0xff]  ;;  %v7228_v22 = vld [vmem:[#allocation75_spill] sm:$0xff] }
 0x280   :  { %7212 = vst [vmem:[#allocation53_spill] sm:$0xff] %v4477_v19  ;;  %7213 = vst [vmem:[#allocation28_spill] sm:$0xff] %v4479_v63  ;;  %v462_v14 = vsel %vm7216_vm12, %v7215_v4, %v7214_v9  ;;  %v898_v41 = vsel %vm4075_vm2, %v866_v62, 0.0  ;;  %v896_v16 = vsel %vm4116_vm7, %v864_v48, 0.0  ;;  %v899_v52 = vsel %vm4134_vm14, %v867_v3, 0.0  ;;  %v7225_v3 = vld [vmem:[#allocation73_spill] sm:$0xff] }
 0x281   :  { %vm7219_vm5 = vmmov %vm7216_vm12  ;;  %v1041_v10 = vmul.f32 %v7208_v39, %v1005_v6  ;;  %7220 = vst [vmem:[#allocation63_spill] sm:$0xff] %v4502_v28  ;;  %v1074_v49 = vsel %vm3884_vm6, %v1042_v18, 0.0  ;;  %v921_v58 = vadd.f32 %v897_v33, %v740_v46  ;;  %v7226_v2 = vld [vmem:[#allocation86_spill] sm:$0xff]  ;;  %vm7227_vm13 = vcmp.lt.s32.totalorder %v3749_v17, 16  ;;  %1670 = vrot.lane.b32.xlu0 %v3386_v55, %s2869_s30  ;;  %v7263_v19 = vld [vmem:[#allocation97_spill] sm:$0xff] }
 0x282   :  { %v456_v15 = vsel %vm7219_vm5, %v7214_v9, %v7218_v20  ;;  %v7221_v9 = vld [vmem:[#allocation7_spill] sm:$0xff]  ;;  %vm7224_vm0 = vmmov %vm7219_vm5  ;;  %v642_v6 = vsel %vm7227_vm13, %v7226_v2, %v7225_v3  ;;  %v4522_v46 = vadd.f32 %v898_v41, %v741_v25  ;;  %v920_v33 = vadd.f32 %v896_v16, %v739_v12  ;;  %v7235_v41 = vld [vmem:[#allocation84_spill] sm:$0xff] }
 0x283   :  { %v515_v23 = vmul.f32 %v7221_v9, %v462_v14  ;;  %v461_v48 = vsel %vm7224_vm0, %v7223_v51, %v7222_v7  ;;  %v516_v62 = vmul.f32 %v7221_v9, %v456_v15  ;;  %vm7229_vm12 = vmmov %vm7227_vm13  ;;  %v4526_v14 = vpop.permute.xlu1 %1471  ;;  %v4528_v28 = vadd.f32 %v899_v52, %v742_v5  ;;  %v7233_v15 = vld [vmem:[#allocation87_spill] sm:$0xff]  ;;  %1324 = vrot.lane.b32.xlu1 %v3409_v34, %s2866_s18 }
 0x284   :  { %v648_v18 = vsel %vm7229_vm12, %v7228_v22, %v7226_v2  ;;  %7230 = vst [vmem:[#allocation59_spill] sm:$0xff] %v4522_v46  ;;  %7231 = vst [vmem:[#allocation61_spill] sm:$0xff] %v4526_v14  ;;  %v468_v2 = vsel %vm7224_vm0, %v7233_v15, %v7215_v4  ;;  %v1073_v25 = vsel %vm3936_vm11, %v1041_v10, 0.0  ;;  %v7237_v5 = vld [vmem:[#allocation15_spill] sm:$0xff]  ;;  %v4549_v14 = vpop.permute.xlu0 %1308  ;;  %v7241_v10 = vld [vmem:[#allocation12_spill] sm:$0xff]  ;;  %v4565_v63 = vadd.f32 %v1074_v49, %v921_v58 }
 0x285   :  { %7232 = vst [vmem:[#allocation6_spill] sm:$0xff] %v4528_v28  ;;  %vm7234_vm5 = vmmov %vm7224_vm0  ;;  %v511_v16 = vmul.f32 %v7237_v5, %v461_v48  ;;  %v7238_v52 = vld [vmem:[#allocation95_spill] sm:$0xff]  ;;  %v547_v4 = vsel %vm3931_vm9, %v515_v23, 0.0  ;;  %v688_v0 = vmul.f32 %v7241_v10, %v642_v6  ;;  %v514_v48 = vmul.f32 %v7221_v9, %v468_v2  ;;  %1692 = vrot.lane.b32.xlu0 %v3344_v13, %s2869_s30  ;;  %v7274_v28 = vld [vmem:[#allocation142_spill] sm:$0xff] }
 0x286   :  { %v450_v53 = vsel %vm7234_vm5, %v7218_v20, %v7233_v15  ;;  %vm7236_vm13 = vmmov %vm7224_vm0  ;;  %7240 = vst [vmem:[#allocation24_spill] sm:$0xff] %v4549_v14  ;;  %v687_v15 = vmul.f32 %v7241_v10, %v648_v18  ;;  %v4571_v6 = vadd.f32 %v1073_v25, %v920_v33  ;;  %v7246_v18 = vld [vmem:[#allocation88_spill] sm:$0xff]  ;;  %v7251_v33 = vld [vmem:[#allocation146_spill] sm:$0xff]  ;;  %vm6792_vm1 = vcmp.lt.s32.totalorder %v3835_v42, 15 }
 0x287   :  { %v455_v12 = vsel %vm7236_vm13, %v7222_v7, %v7235_v41  ;;  %vm7239_vm12 = vmmov %vm7224_vm0  ;;  %v517_v14 = vmul.f32 %v7221_v9, %v450_v53  ;;  %7243 = vst [vmem:[#allocation65_spill] sm:$0xff] %v4565_v63  ;;  %v4569_v23 = vpop.permute.xlu1 %1483  ;;  %v4580_v53 = vadd.f32 %v547_v4, %v3899_v27  ;;  %v543_v49 = vsel %vm3931_vm9, %v511_v16, 0.0  ;;  %v7271_v63 = vld [vmem:[#allocation104_spill] sm:$0xff] }
 0x288   :  { %v467_v20 = vsel %vm7239_vm12, %v7238_v52, %v7223_v51  ;;  %vm7242_vm5 = vmmov %vm7224_vm0  ;;  %v548_v51 = vsel %vm3970_vm15, %v516_v62, 0.0  ;;  %7244 = vst [vmem:[#allocation64_spill] sm:$0xff] %v4569_v23  ;;  %vm7247_vm0 = vcmp.lt.s32.totalorder %v3749_v17, 16  ;;  %v512_v62 = vmul.f32 %v7237_v5, %v455_v12  ;;  %v4589_v9 = vpop.permute.xlu0 %1330  ;;  %v7262_v23 = vld [vmem:[#allocation89_spill] sm:$0xff] }
 0x289   :  { %v449_v7 = vsel %vm7242_vm5, %v7235_v41, %v7238_v52  ;;  %7245 = vst [vmem:[#allocation51_spill] sm:$0xff] %v4571_v6  ;;  %v636_v41 = vsel %vm7247_vm0, %v7225_v3, %v7246_v18  ;;  %v510_v2 = vmul.f32 %v7237_v5, %v467_v20  ;;  %vm7248_vm13 = vmmov %vm7247_vm0  ;;  %v7250_v3 = vld [vmem:[#allocation37_spill] sm:$0xff]  ;;  %v4594_v25 = vadd.f32 %v548_v51, %v7251_v33  ;;  %v7255_v52 = vld [vmem:[#allocation79_spill] sm:$0xff] }
 0x28a   :  { %v630_v55 = vsel %vm7248_vm13, %v7246_v18, %v7228_v22  ;;  %v513_v58 = vmul.f32 %v7237_v5, %v449_v7  ;;  %7249 = vst [vmem:[#allocation76_spill] sm:$0xff] %v4589_v9  ;;  %1479 = vrot.lane.b32.xlu1 %v7250_v3, %s2867_s19  ;;  %vm7252_vm12 = vcmp.ge.s32.totalorder %v3878_v61, 1  ;;  %vm7253_vm5 = vcmp.ge.s32.totalorder %v3835_v42, 1  ;;  %v7254_v22 = vld [vmem:[#allocation90_spill] sm:$0xff]  ;;  %v7257_v7 = vld [vmem:[#allocation77_spill] sm:$0xff]  ;;  %v7272_v6 = vld [vmem:[#allocation99_spill] sm:$0xff] }
 0x28b   :  { %v719_v27 = vsel %vm7252_vm12, %v687_v15, 0.0  ;;  %v720_v12 = vsel %vm7253_vm5, %v688_v0, 0.0  ;;  %vm7256_vm0 = vcmp.lt.s32.totalorder %v3749_v17, 15  ;;  %v546_v5 = vsel %vm7128_vm3, %v514_v48, 0.0  ;;  %v4615_v0 = vpop.permute.xlu1 %1495  ;;  %v7260_v18 = vld [vmem:[#allocation141_spill] sm:$0xff] }
 0x28c   :  { %v825_v16 = vsel %vm7256_vm0, %v7255_v52, %v7254_v22  ;;  %v549_v20 = vsel %vm7196_vm4, %v517_v14, 0.0  ;;  %v689_v4 = vmul.f32 %v7241_v10, %v636_v41  ;;  %vm7258_vm13 = vmmov %vm7256_vm0  ;;  %7259 = vst [vmem:[#allocation66_spill] sm:$0xff] %v4615_v0  ;;  %v690_v51 = vmul.f32 %v7241_v10, %v630_v55  ;;  %v7261_v41 = vld [vmem:[#allocation21_spill] sm:$0xff]  ;;  %v7265_v10 = vld [vmem:[#allocation91_spill] sm:$0xff]  ;;  %v4634_v55 = vpop.permute.xlu0 %1487 }
 0x28d   :  { %v819_v15 = vsel %vm7258_vm13, %v7254_v22, %v7257_v7  ;;  %v544_v48 = vsel %vm3970_vm15, %v512_v62, 0.0  ;;  %v567_v33 = vadd.f32 %v543_v49, %v7260_v18  ;;  %v542_v14 = vsel %vm7128_vm3, %v510_v2, 0.0  ;;  %7267 = vst [vmem:[#allocation67_spill] sm:$0xff] %v4634_v55  ;;  %v7268_v49 = vld [vmem:[#allocation39_spill] sm:$0xff]  ;;  %v7269_v2 = vld [vmem:[#allocation145_spill] sm:$0xff] }
 0x28e   :  { %v868_v9 = vmul.f32 %v7261_v41, %v825_v16  ;;  %v545_v22 = vsel %vm7196_vm4, %v513_v58, 0.0  ;;  %vm7264_vm12 = vcmp.lt.s32.totalorder %v3749_v17, 16  ;;  %1503 = vrot.lane.b32.xlu1 %v7268_v49, %s2867_s19  ;;  %v570_v16 = vadd.f32 %v546_v5, %v7269_v2  ;;  %v7270_v18 = vld [vmem:[#allocation151_spill] sm:$0xff]  ;;  %v7276_v55 = vld [vmem:[#allocation101_spill] sm:$0xff] }
 0x28f   :  { %v643_v13 = vsel %vm7264_vm12, %v7263_v19, %v7262_v23  ;;  %vm7266_vm5 = vmmov %vm7264_vm12  ;;  %v4640_v0 = vadd.f32 %v549_v20, %v7270_v18  ;;  %v869_v58 = vmul.f32 %v7261_v41, %v819_v15  ;;  %vm7273_vm0 = vcmp.lt.s32.totalorder %v3749_v17, 17  ;;  %v7278_v5 = vld [vmem:[#allocation107_spill] sm:$0xff]  ;;  %v4657_v15 = vpop.permute.xlu1 %1561  ;;  %v7281_v18 = vld [vmem:[#allocation144_spill] sm:$0xff] }
 0x290   :  { %v649_v62 = vsel %vm7266_vm5, %v7265_v10, %v7263_v19  ;;  %v463_v35 = vsel %vm7273_vm0, %v7272_v6, %v7271_v63  ;;  %v568_v46 = vadd.f32 %v544_v48, %v7274_v28  ;;  %v7275_v19 = vld [vmem:[#allocation140_spill] sm:$0xff]  ;;  %vm7277_vm13 = vmmov %vm7273_vm0  ;;  %7280 = vst [vmem:[#allocation68_spill] sm:$0xff] %v4657_v15  ;;  %v744_v2 = vadd.f32 %v720_v12, %v567_v33  ;;  %v4670_v12 = vpop.permute.xlu0 %1507  ;;  %v7287_v33 = vld [vmem:[#allocation38_spill] sm:$0xff] }
 0x291   :  { %v566_v11 = vadd.f32 %v542_v14, %v7275_v19  ;;  %v457_v49 = vsel %vm7277_vm13, %v7271_v63, %v7276_v55  ;;  %vm7279_vm12 = vmmov %vm7273_vm0  ;;  %v569_v30 = vadd.f32 %v545_v22, %v7281_v18  ;;  %v691_v57 = vmul.f32 %v7282_v60, %v649_v62  ;;  %v7285_v14 = vld [vmem:[#allocation13_spill] sm:$0xff]  ;;  %7286 = vst [vmem:[#allocation11_spill] sm:$0xff] %v4670_v12 }
 0x292   :  { %v469_v20 = vsel %vm7279_vm12, %v7278_v5, %v7272_v6  ;;  %v692_v28 = vmul.f32 %v7282_v60, %v643_v13  ;;  %vm7283_vm0 = vcmp.ge.s32.totalorder %v3854_v24, 1  ;;  %vm7284_vm13 = vcmp.ge.s32.totalorder %v3888_v56, 1  ;;  %1654 = vrot.lane.b32.xlu1 %v7287_v33, %s2869_s30  ;;  %v7288_v62 = vld [vmem:[#allocation109_spill] sm:$0xff] }
 0x293   :  { %v721_v48 = vsel %vm7283_vm0, %v689_v4, 0.0  ;;  %v722_v63 = vsel %vm7284_vm13, %v690_v51, 0.0  ;;  %v900_v6 = vsel %vm4116_vm7, %v868_v9, 0.0  ;;  %v519_v19 = vmul.f32 %v7285_v14, %v463_v35 }
 0x294   :  { %v901_v22 = vsel %vm4061_vm10, %v869_v58, 0.0  ;;  %v520_v13 = vmul.f32 %v7285_v14, %v457_v49  ;;  %v451_v4 = vsel %vm7279_vm12, %v7276_v55, %v7278_v5  ;;  %v518_v51 = vmul.f32 %v7285_v14, %v469_v20  ;;  %v7295_v20 = vld [vmem:[#allocation110_spill] sm:$0xff] }
 0x295   :  { %v743_v9 = vadd.f32 %v719_v27, %v566_v11  ;;  %vm7289_vm0 = vcmp.lt.s32.totalorder %v3749_v17, 127  ;;  %v4690_v18 = vadd.f32 %v721_v48, %v568_v46  ;;  %vm7291_vm5 = vcmp.ge.s32.totalorder %v3878_v61, 1  ;;  %v7294_v46 = vld [vmem:[#allocation96_spill] sm:$0xff]  ;;  %v4714_v48 = vpop.permute.xlu0 %1565 }
 0x296   :  { %v1162_v35 = vsel %vm7289_vm0, %v7092_v44, %v7288_v62  ;;  %vm7290_vm13 = vmmov %vm7289_vm0  ;;  %v723_v49 = vsel %vm7291_vm5, %v691_v57, 0.0  ;;  %vm7292_vm12 = vcmp.ge.s32.totalorder %v3835_v42, 1  ;;  %v4696_v5 = vadd.f32 %v722_v63, %v569_v30  ;;  %v4701_v44 = vpop.permute.xlu1 %1830  ;;  %7299 = vst [vmem:[#allocation136_spill] sm:$0xff] %v4714_v48 }
 0x297   :  { %v1180_v58 = vsel %vm7290_vm13, %v7288_v62, %v7088_v36  ;;  %v724_v55 = vsel %vm7292_vm12, %v692_v28, 0.0  ;;  %v4699_v11 = vadd.f32 %v901_v22, %v744_v2  ;;  %7293 = vst [vmem:[#allocation9_spill] sm:$0xff] %v4701_v44  ;;  %v551_v27 = vsel %vm3931_vm9, %v519_v19, 0.0  ;;  %v7297_v28 = vld [vmem:[#allocation98_spill] sm:$0xff]  ;;  %v7300_v2 = vld [vmem:[#allocation40_spill] sm:$0xff] }
 0x298   :  { %v521_v36 = vmul.f32 %v7285_v14, %v451_v4  ;;  %vm7296_vm5 = vcmp.lt.s32.totalorder %v3749_v17, 16  ;;  %1678 = vrot.lane.b32.xlu1 %v7300_v2, %s2869_s30  ;;  %v552_v43 = vsel %vm3970_vm15, %v520_v13, 0.0  ;;  %v550_v63 = vsel %vm7128_vm3, %v518_v51, 0.0  ;;  %v7301_v4 = vld [vmem:[#allocation112_spill] sm:$0xff]  ;;  %v7304_v2 = vld [vmem:[#allocation18_spill] sm:$0xff] }
 0x299   :  { %v644_v57 = vsel %vm7296_vm5, %v7295_v20, %v7294_v46  ;;  %vm7298_vm0 = vmmov %vm7296_vm5  ;;  %v1212_v14 = vmul.f32 %v7096_v37, %v1162_v35  ;;  %v1213_v19 = vmul.f32 %v7096_v37, %v1180_v58  ;;  %v747_v33 = vadd.f32 %v723_v49, %v570_v16  ;;  %v7307_v16 = vld [vmem:[#allocation158_spill] sm:$0xff] }
 0x29a   :  { %v650_v30 = vsel %vm7298_vm0, %v7297_v28, %v7295_v20  ;;  %v4725_v22 = vadd.f32 %v724_v55, %v4580_v53  ;;  %vm7302_vm9 = vmmov %vm7298_vm0  ;;  %v4731_v20 = vadd.f32 %v900_v6, %v743_v9  ;;  %v575_v13 = vadd.f32 %v551_v27, %v7303_v40  ;;  %v4740_v53 = vpop.permute.xlu1 %1834  ;;  %v7308_v6 = vld [vmem:[#allocation150_spill] sm:$0xff]  ;;  %v7317_v40 = vld [vmem:[#allocation93_spill] sm:$0xff] }
 0x29b   :  { %v637_v62 = vsel %vm7302_vm9, %v7262_v23, %v7301_v4  ;;  %v695_v54 = vmul.f32 %v7304_v2, %v650_v30  ;;  %v696_v51 = vmul.f32 %v7304_v2, %v644_v57  ;;  %vm7305_vm15 = vmmov %vm7298_vm0  ;;  %7306 = vst [vmem:[#allocation137_spill] sm:$0xff] %v4740_v53  ;;  %v4743_v35 = vadd.f32 %v552_v43, %v7307_v16  ;;  %v7309_v58 = vld [vmem:[#allocation114_spill] sm:$0xff]  ;;  %v7313_v57 = vld [vmem:[#allocation161_spill] sm:$0xff] }
 0x29c   :  { %v631_v37 = vsel %vm7305_vm15, %v7301_v4, %v7265_v10  ;;  %v553_v23 = vsel %vm7196_vm4, %v521_v36, 0.0  ;;  %v574_v9 = vadd.f32 %v550_v63, %v7308_v6  ;;  %v7310_v49 = vld [vmem:[#allocation94_spill] sm:$0xff]  ;;  %vm7311_vm3 = vcmp.lt.s32.totalorder %v3749_v17, 15  ;;  %v7315_v30 = vld [vmem:[#allocation163_spill] sm:$0xff]  ;;  %v4762_v36 = vpop.permute.xlu0 %1726  ;;  %v7320_v16 = vld [vmem:[#allocation116_spill] sm:$0xff] }
 0x29d   :  { %v826_v55 = vsel %vm7311_vm3, %v7310_v49, %v7309_v58  ;;  %v7312_v27 = vld [vmem:[#allocation102_spill] sm:$0xff]  ;;  %vm7314_vm13 = vnez %v7313_v57  ;;  %vm7316_vm12 = vnez %v7315_v30  ;;  %v693_v43 = vmul.f32 %v7282_v60, %v637_v62  ;;  %vm7318_vm4 = vmmov %vm7311_vm3  ;;  %7319 = vst [vmem:[#allocation69_spill] sm:$0xff] %v4762_v36  ;;  %v7324_v62 = vld [vmem:[#allocation115_spill] sm:$0xff] }
 0x29e   :  { %1846 = vperm.xlu1 %2680, %v7312_v27   ;;  %v1244_v10 = vsel %vm7314_vm13, %v1212_v14, 0.0  ;;  %v1245_v4 = vsel %vm7316_vm12, %v1213_v19, 0.0  ;;  %v820_v47 = vsel %vm7318_vm4, %v7309_v58, %v7317_v40  ;;  %v694_v63 = vmul.f32 %v7282_v60, %v631_v37  ;;  %vm7321_vm5 = vmmov %vm7311_vm3  ;;  %v7323_v19 = vld [vmem:[#allocation117_spill] sm:$0xff]  ;;  %v7326_v58 = vld [vmem:[#allocation168_spill] sm:$0xff]  ;;  %v4785_v12 = vpop.permute.xlu1 %946 }
 0x29f   :  { %v807_v6 = vsel %vm7321_vm5, %v7320_v16, %v7255_v52  ;;  %vm7322_vm0 = vmmov %vm7311_vm3  ;;  %vm7325_vm9 = vcmp.lt.s32.totalorder %v3749_v17, 113  ;;  %v4778_v48 = vadd.f32 %v553_v23, %v7326_v58  ;;  %vm7327_vm15 = vcmp.ge.s32.totalorder %v3878_v61, 1  ;;  %v7329_v52 = vld [vmem:[#allocation23_spill] sm:$0xff]  ;;  %7330 = vst [vmem:[#allocation70_spill] sm:$0xff] %v4785_v12  ;;  %v7331_v53 = vld [vmem:[#allocation44_spill] sm:$0xff] }
 0x2a0   :  { %v813_v14 = vsel %vm7322_vm0, %v7257_v7, %v7320_v16  ;;  %v1345_v27 = vsel %vm7325_vm9, %v7324_v62, %v7323_v19  ;;  %v727_v60 = vsel %vm7327_vm15, %v695_v54, 0.0  ;;  %vm7328_vm3 = vcmp.ge.s32.totalorder %v3835_v42, 1  ;;  %v7332_v16 = vld [vmem:[#allocation5_spill] sm:$0xff]  ;;  %v7333_v23 = vld [vmem:[#allocation118_spill] sm:$0xff]  ;;  %v7334_v58 = vld [vmem:[#allocation103_spill] sm:$0xff] }
 0x2a1   :  { %v728_v37 = vsel %vm7328_vm3, %v696_v51, 0.0  ;;  %v872_v15 = vmul.f32 %v7329_v52, %v826_v55  ;;  %v4788_v7 = vadd.f32 %v1244_v10, %v7331_v53  ;;  %v4791_v44 = vadd.f32 %v1245_v4, %v7332_v16  ;;  %v7337_v10 = vld [vmem:[#allocation113_spill] sm:$0xff]  ;;  %v4805_v16 = vpop.permute.xlu0 %1738  ;;  %vm4817_vm9 = vmand %vm6792_vm1, %vm3884_vm6  ;;  %v7354_v42 = vld [vmem:[#allocation106_spill] sm:$0xff] }
 0x2a2   :  { %v873_v36 = vmul.f32 %v7329_v52, %v820_v47  ;;  %vm7335_vm4 = vcmp.lt.s32.totalorder %v3749_v17, 1  ;;  %1481 = vrot.lane.b32.xlu1 %v3395_v32, %s2867_s19  ;;  %vm7336_vm5 = vcmp.ge.s32.totalorder %v3854_v24, 1  ;;  %v870_v55 = vmul.f32 %v7261_v41, %v813_v14  ;;  %7338 = vst [vmem:[#allocation105_spill] sm:$0xff] %v4805_v16 }
 0x2a3   :  { %v1006_v54 = vsel %vm7335_vm4, %v7334_v58, %v7333_v23  ;;  %v725_v51 = vsel %vm7336_vm5, %v693_v43, 0.0  ;;  %v871_v53 = vmul.f32 %v7261_v41, %v807_v6  ;;  %v1392_v4 = vmul.f32 %v7337_v10, %v1345_v27  ;;  %v7343_v41 = vld [vmem:[#allocation100_spill] sm:$0xff]  ;;  %vm7344_vm15 = vmmov %vm7335_vm4 }
 0x2a4   :  { %v4807_v47 = vadd.f32 %v727_v60, %v574_v9  ;;  %v4809_v12 = vadd.f32 %v728_v37, %v575_v13  ;;  %vm7339_vm0 = vcmp.ge.s32.totalorder %v3888_v56, 1  ;;  %v7340_v43 = vmov 0  ;;  %v7345_v9 = vld [vmem:[#allocation20_spill] sm:$0xff]  ;;  %vm7347_vm3 = vmmov %vm7335_vm4  ;;  %v4836_v37 = vpop.permute.xlu1 %968 }
 0x2a5   :  { %v726_v58 = vsel %vm7339_vm0, %v694_v63, 0.0  ;;  %v7341_v43 = vsel %vm4817_vm9, 4294967295, %v7340_v43  ;;  %v1000_v6 = vsel %vm7344_vm15, %v7333_v23, %v7343_v41  ;;  %v904_v13 = vsel %vm4116_vm7, %v872_v15, 0.0  ;;  %v7346_v63 = vld [vmem:[#allocation120_spill] sm:$0xff]  ;;  %vm7348_vm4 = vmmov %vm7347_vm3  ;;  %7349 = vst [vmem:[#allocation78_spill] sm:$0xff] %v4836_v37  ;;  %v7351_v23 = vld [vmem:[#allocation121_spill] sm:$0xff] }
 0x2a6   :  { %7342 = vst [vmem:[#allocation72_spill] sm:$0xff] %v7341_v43  ;;  %v1045_v14 = vmul.f32 %v7345_v9, %v1006_v54  ;;  %v987_v27 = vsel %vm7347_vm3, %v7346_v63, %v7209_v31  ;;  %v993_v60 = vsel %vm7348_vm4, %v7197_v1, %v7346_v63  ;;  %v4839_v16 = vadd.f32 %v725_v51, %v4594_v25  ;;  %v4861_v51 = vpop.permute.xlu0 %1660 }
 0x2a7   :  { %v905_v15 = vsel %vm4061_vm10, %v873_v36, 0.0  ;;  %vm7352_vm5 = vcmp.lt.s32.totalorder %v3749_v17, 16  ;;  %1505 = vrot.lane.b32.xlu1 %v3409_v34, %s2867_s19  ;;  %v902_v1 = vsel %vm4075_vm2, %v870_v55, 0.0  ;;  %v903_v25 = vsel %vm4134_vm14, %v871_v53, 0.0 }
 0x2a8   :  { %7350 = vst [vmem:[#allocation71_spill] sm:$0xff] %v4839_v16  ;;  %v632_v54 = vsel %vm7352_vm5, %v7351_v23, %v7297_v28  ;;  %vm7353_vm0 = vmmov %vm7352_vm5  ;;  %v1424_v36 = vsel %vm4817_vm9, %v1392_v4, 0.0  ;;  %v1046_v28 = vmul.f32 %v7345_v9, %v1000_v6  ;;  %v4866_v63 = vadd.f32 %v904_v13, %v747_v33  ;;  %v7355_v6 = vld [vmem:[#allocation122_spill] sm:$0xff] }
 0x2a9   :  { %v638_v31 = vsel %vm7353_vm0, %v7294_v46, %v7351_v23  ;;  %v4864_v46 = vadd.f32 %v726_v58, %v4640_v0  ;;  %v1043_v23 = vmul.f32 %v7208_v39, %v993_v60  ;;  %v1044_v37 = vmul.f32 %v7208_v39, %v987_v27  ;;  %v4878_v0 = vpop.permute.xlu1 %1121 }
 0x2aa   :  { %v1077_v55 = vsel %vm3936_vm11, %v1045_v14, 0.0  ;;  %v697_v53 = vmul.f32 %v7304_v2, %v638_v31  ;;  %v698_v4 = vmul.f32 %v7304_v2, %v632_v54  ;;  %vm7356_vm3 = vcmp.lt.s32.totalorder %v3749_v17, 127  ;;  %7357 = vst [vmem:[#allocation74_spill] sm:$0xff] %v4878_v0  ;;  %v7360_v14 = vld [vmem:[#allocation124_spill] sm:$0xff]  ;;  %v4909_v60 = vpop.permute.xlu0 %1672  ;;  %v7369_v31 = vld [vmem:[#allocation155_spill] sm:$0xff] }
 0x2ab   :  { %v1176_v16 = vsel %vm7356_vm3, %v7355_v6, %v7354_v42  ;;  %v4881_v33 = vadd.f32 %v905_v15, %v4725_v22  ;;  %v4884_v58 = vadd.f32 %v902_v1, %v4690_v18  ;;  %v4887_v39 = vadd.f32 %v903_v25, %v4696_v5  ;;  %1656 = vrot.lane.b32.xlu1 %v7250_v3, %s2869_s30  ;;  %vm7361_vm5 = vmmov %vm7356_vm3  ;;  %v7362_v22 = vld [vmem:[#allocation128_spill] sm:$0xff]  ;;  %v7371_v1 = vld [vmem:[#allocation22_spill] sm:$0xff] }
 0x2ac   :  { %v4890_v13 = vadd.f32 %v1424_v36, %v4342_v29  ;;  %v1078_v2 = vsel %vm3884_vm6, %v1046_v28, 0.0  ;;  %v1170_v18 = vsel %vm7361_vm5, %v7354_v42, %v7360_v14  ;;  %vm7363_vm0 = vmmov %vm7356_vm3  ;;  %v7364_v29 = vld [vmem:[#allocation49_spill] sm:$0xff]  ;;  %7366 = vst [vmem:[#allocation16_spill] sm:$0xff] %v4909_v60  ;;  %v4912_v3 = vadd.f32 %v1077_v55, %v4731_v20  ;;  %v7374_v28 = vld [vmem:[#allocation135_spill] sm:$0xff] }
 0x2ad   :  { %7358 = vst [vmem:[#allocation134_spill] sm:$0xff] %v4887_v39  ;;  %v1163_v5 = vsel %vm7363_vm0, %v7164_v45, %v7362_v22  ;;  %vm7365_vm3 = vmmov %vm7363_vm0  ;;  %v1075_v54 = vsel %vm3908_vm8, %v1043_v23, 0.0  ;;  %vm7370_vm5 = vnez %v7369_v31  ;;  %v1218_v25 = vmul.f32 %v7371_v1, %v1176_v16  ;;  %v7376_v55 = vld [vmem:[#allocation153_spill] sm:$0xff]  ;;  %v7377_v23 = vld [vmem:[#allocation147_spill] sm:$0xff] }
 0x2ae   :  { %7359 = vst [vmem:[#allocation19_spill] sm:$0xff] %v4890_v13  ;;  %v1181_v27 = vsel %vm7365_vm3, %v7362_v22, %v7364_v29  ;;  %7367 = vst [vmem:[#allocation80_spill] sm:$0xff] %v4912_v3  ;;  %v1076_v42 = vsel %vm7370_vm5, %v1044_v37, 0.0  ;;  %vm7372_vm1 = vcmp.ge.s32.totalorder %v3854_v24, 1  ;;  %vm7373_vm3 = vcmp.ge.s32.totalorder %v3888_v56, 1  ;;  %v4932_v22 = vpop.permute.xlu1 %1145  ;;  %v7380_v29 = vld [vmem:[#allocation34_spill] sm:$0xff] }
 0x2af   :  { %v729_v45 = vsel %vm7372_vm1, %v697_v53, 0.0  ;;  %v730_v36 = vsel %vm7373_vm3, %v698_v4, 0.0  ;;  %vm7375_vm4 = vcmp.lt.s32.totalorder %v3749_v17, 113  ;;  %7379 = vst [vmem:[#allocation85_spill] sm:$0xff] %v4932_v22  ;;  %v1219_v16 = vmul.f32 %v7371_v1, %v1170_v18  ;;  %v7381_v3 = vld [vmem:[#allocation156_spill] sm:$0xff]  ;;  %vm7382_vm1 = vmmov %vm7363_vm0  ;;  %v7385_v22 = vld [vmem:[#allocation59_spill] sm:$0xff] }
 0x2b0   :  { %v1351_v20 = vsel %vm7375_vm4, %v7374_v28, %v7324_v62  ;;  %vm7378_vm15 = vmmov %vm7375_vm4  ;;  %v1216_v0 = vmul.f32 %v7380_v29, %v1163_v5  ;;  %v1217_v53 = vmul.f32 %v7380_v29, %v1181_v27  ;;  %v1164_v4 = vsel %vm7382_vm1, %v7360_v14, %v7381_v3  ;;  %v7383_v62 = vld [vmem:[#allocation39_spill] sm:$0xff]  ;;  %v7386_v18 = vld [vmem:[#allocation6_spill] sm:$0xff]  ;;  %v4953_v27 = vpop.permute.xlu0 %1742 }
 0x2b1   :  { %v1352_v37 = vsel %vm7378_vm15, %v7377_v23, %v7376_v55  ;;  %1680 = vrot.lane.b32.xlu1 %v7383_v62, %s2869_s30  ;;  %v4945_v39 = vadd.f32 %v1078_v2, %v4699_v11  ;;  %v1099_v23 = vadd.f32 %v1075_v54, %v7385_v22  ;;  %v1100_v13 = vadd.f32 %v1076_v42, %v7386_v18  ;;  %vm7387_vm15 = vmmov %vm7363_vm0  ;;  %v7390_v29 = vld [vmem:[#allocation162_spill] sm:$0xff]  ;;  %v7392_v2 = vld [vmem:[#allocation25_spill] sm:$0xff] }
 0x2b2   :  { %v1182_v5 = vsel %vm7387_vm15, %v7381_v3, %v7355_v6  ;;  %7388 = vst [vmem:[#allocation83_spill] sm:$0xff] %v4953_v27  ;;  %v4956_v14 = vadd.f32 %v729_v45, %v4743_v35  ;;  %vm7391_vm3 = vnez %v7390_v29  ;;  %v1391_v11 = vmul.f32 %v7337_v10, %v1351_v20  ;;  %v7398_v3 = vld [vmem:[#allocation160_spill] sm:$0xff]  ;;  %vm7400_vm0 = vmmov %vm7375_vm4  ;;  %v4982_v45 = vpop.permute.xlu1 %1296  ;;  %v7404_v18 = vld [vmem:[#allocation51_spill] sm:$0xff] }
 0x2b3   :  { %7384 = vst [vmem:[#allocation81_spill] sm:$0xff] %v4945_v39  ;;  %v1250_v62 = vsel %vm7391_vm3, %v1218_v25, 0.0  ;;  %v1395_v39 = vmul.f32 %v7392_v2, %v1352_v37  ;;  %v4963_v54 = vadd.f32 %v730_v36, %v4778_v48  ;;  %vm7394_vm1 = vcmp.lt.s32.totalorder %v3878_v61, 15  ;;  %v7399_v25 = vld [vmem:[#allocation166_spill] sm:$0xff]  ;;  %7401 = vst [vmem:[#allocation73_spill] sm:$0xff] %v4982_v45  ;;  %v7402_v36 = vld [vmem:[#allocation159_spill] sm:$0xff] }
 0x2b4   :  { %7389 = vst [vmem:[#allocation7_spill] sm:$0xff] %v4956_v14  ;;  %vm4969_vm15 = vmand %vm7394_vm1, %vm3936_vm11  ;;  %v7395_v6 = vmov 0  ;;  %v1220_v35 = vmul.f32 %v7371_v1, %v1164_v4  ;;  %v1346_v42 = vsel %vm7375_vm4, %v7376_v55, %v7398_v3  ;;  %v1339_v48 = vsel %vm7400_vm0, %v7323_v19, %v7399_v25  ;;  %v2815_v55 = vld [vmem:[%s6569_s1 + $0x28] sm:$0xff]  ;;  %v7406_v27 = vld [vmem:[#allocation123_spill] sm:$0xff] }
 0x2b5   :  { %7393 = vst [vmem:[#allocation92_spill] sm:$0xff] %v4963_v54  ;;  %v7396_v6 = vsel %vm4969_vm15, 4294967295, %v7395_v6  ;;  %vm7403_vm3 = vnez %v7402_v36  ;;  %v1248_v37 = vsel %vm7314_vm13, %v1216_v0, 0.0  ;;  %v1249_v22 = vsel %vm7316_vm12, %v1217_v53, 0.0  ;;  %1850 = vperm.xlu1 %2680, %v2815_v55   ;;  %v7407_v0 = vld [vmem:[#allocation42_spill] sm:$0xff]  ;;  %v5010_v55 = vpop.permute.xlu0 %1123  ;;  %v7412_v45 = vld [vmem:[#allocation65_spill] sm:$0xff] }
 0x2b6   :  { %7397 = vst [vmem:[#allocation82_spill] sm:$0xff] %v7396_v6  ;;  %v1251_v20 = vsel %vm7403_vm3, %v1219_v16, 0.0  ;;  %v1221_v4 = vmul.f32 %v7371_v1, %v1182_v5  ;;  %v4995_v19 = vadd.f32 %v1250_v62, %v7404_v18  ;;  %v1357_v16 = vsel %vm7400_vm0, %v7399_v25, %v7374_v28  ;;  %v7409_v1 = vld [vmem:[#allocation126_spill] sm:$0xff]  ;;  %7411 = vst [vmem:[#allocation75_spill] sm:$0xff] %v5010_v55  ;;  %v7414_v54 = vld [vmem:[#allocation132_spill] sm:$0xff] }
 0x2b7   :  { %vm7408_vm4 = vcmp.lt.s32.totalorder %v3749_v17, 15  ;;  %v1423_v62 = vsel %vm4969_vm15, %v1391_v11, 0.0  ;;  %v1427_v28 = vsel %vm4969_vm15, %v1395_v39, 0.0  ;;  %v1396_v25 = vmul.f32 %v7392_v2, %v1346_v42  ;;  %v5037_v11 = vpop.permute.xlu1 %1320  ;;  %v7476_v38 = vld [vmem:[#allocation71_spill] sm:$0xff] }
 0x2b8   :  { %7405 = vst [vmem:[#allocation86_spill] sm:$0xff] %v4995_v19  ;;  %v821_v53 = vsel %vm7408_vm4, %v7407_v0, %v7406_v27  ;;  %vm7410_vm1 = vmmov %vm7408_vm4  ;;  %v1393_v18 = vmul.f32 %v7337_v10, %v1339_v48  ;;  %v5019_v19 = vadd.f32 %v1251_v20, %v7412_v45  ;;  %v5022_v14 = vadd.f32 %v1248_v37, %v7414_v54  ;;  %v7421_v48 = vld [vmem:[#allocation26_spill] sm:$0xff] }
 0x2b9   :  { %v827_v5 = vsel %vm7410_vm1, %v7409_v1, %v7407_v0  ;;  %v7415_v0 = vld [vmem:[#allocation48_spill] sm:$0xff]  ;;  %v1252_v55 = vsel %vm7314_vm13, %v1220_v35, 0.0  ;;  %vm7416_vm0 = vcmp.lt.s32.totalorder %v3854_v24, 15  ;;  %v7417_v39 = vmov 0  ;;  %7420 = vst [vmem:[#allocation15_spill] sm:$0xff] %v5037_v11  ;;  %1658 = vrot.lane.b32.xlu1 %v3395_v32, %s2869_s30  ;;  %v7422_v35 = vld [vmem:[#allocation55_spill] sm:$0xff]  ;;  %v5064_v32 = vpop.permute.xlu0 %1147 }
 0x2ba   :  { %7413 = vst [vmem:[#allocation87_spill] sm:$0xff] %v5019_v19  ;;  %v5025_v3 = vadd.f32 %v1249_v22, %v7415_v0  ;;  %vm5033_vm4 = vmand %vm7416_vm0, %vm3908_vm8  ;;  %v1253_v54 = vsel %vm7316_vm12, %v1221_v4, 0.0  ;;  %v1394_v42 = vmul.f32 %v7337_v10, %v1357_v16  ;;  %v876_v45 = vmul.f32 %v7421_v48, %v827_v5  ;;  %v7423_v22 = vld [vmem:[#allocation53_spill] sm:$0xff]  ;;  %v7436_v19 = vld [vmem:[#allocation50_spill] sm:$0xff] }
 0x2bb   :  { %v7418_v39 = vsel %vm5033_vm4, 4294967295, %v7417_v39  ;;  %v877_v20 = vmul.f32 %v7421_v48, %v821_v53  ;;  %v5047_v37 = vadd.f32 %v1423_v62, %v7422_v35  ;;  %v5050_v0 = vadd.f32 %v1427_v28, %v7423_v22  ;;  %v7428_v10 = vld [vmem:[#allocation17_spill] sm:$0xff]  ;;  %7430 = vst [vmem:[#allocation12_spill] sm:$0xff] %v5064_v32  ;;  %v7441_v32 = vld [vmem:[#allocation54_spill] sm:$0xff]  ;;  %v5091_v53 = vpop.permute.xlu1 %1475 }
 0x2bc   :  { %7419 = vst [vmem:[#allocation84_spill] sm:$0xff] %v7418_v39  ;;  %vm7424_vm1 = vcmp.lt.s32.totalorder %v3888_v56, 15  ;;  %v7425_v4 = vmov 0  ;;  %vm7429_vm3 = vcmp.lt.s32.totalorder %v3749_v17, 15  ;;  %v5067_v62 = vadd.f32 %v1252_v55, %v1099_v23  ;;  %v7438_v23 = vld [vmem:[#allocation139_spill] sm:$0xff]  ;;  %7443 = vst [vmem:[#allocation146_spill] sm:$0xff] %v5091_v53 }
 0x2bd   :  { %vm5056_vm0 = vmand %vm7424_vm1, %vm7370_vm5  ;;  %v814_v16 = vsel %vm7429_vm3, %v7317_v40, %v7428_v10  ;;  %v1428_v28 = vsel %vm4817_vm9, %v1396_v25, 0.0  ;;  %v1425_v35 = vsel %vm5033_vm4, %v1393_v18, 0.0  ;;  %v5077_v11 = vadd.f32 %v1253_v54, %v1100_v13  ;;  %v7435_v40 = vld [vmem:[#allocation130_spill] sm:$0xff]  ;;  %1682 = vrot.lane.b32.xlu1 %v3409_v34, %s2869_s30  ;;  %v5113_v21 = vpop.permute.xlu0 %1298  ;;  %v7450_v34 = vld [vmem:[#allocation31_spill] sm:$0xff] }
 0x2be   :  { %v7426_v4 = vsel %vm5056_vm0, 4294967295, %v7425_v4  ;;  %7432 = vst [vmem:[#allocation88_spill] sm:$0xff] %v5067_v62  ;;  %vm7433_vm1 = vmmov %vm7429_vm3  ;;  %vm7437_vm3 = vcmp.lt.s32.totalorder %v3749_v17, 1  ;;  %v7440_v25 = vld [vmem:[#allocation46_spill] sm:$0xff]  ;;  %vm7442_vm9 = vcmp.lt.s32.totalorder %v3749_v17, 112  ;;  %v908_v13 = vsel %vm4116_vm7, %v876_v45, 0.0 }
 0x2bf   :  { %7427 = vst [vmem:[#allocation95_spill] sm:$0xff] %v7426_v4  ;;  %v808_v22 = vsel %vm7433_vm1, %v7428_v10, %v7310_v49  ;;  %7434 = vst [vmem:[#allocation37_spill] sm:$0xff] %v5077_v11  ;;  %v1001_v5 = vsel %vm7437_vm3, %v7436_v19, %v7435_v40  ;;  %v1533_v18 = vsel %vm7442_vm9, %v7441_v32, %v7440_v25  ;;  %v1426_v49 = vsel %vm5056_vm0, %v1394_v42, 0.0  ;;  %v7446_v42 = vld [vmem:[#allocation8_spill] sm:$0xff]  ;;  %v7449_v45 = vld [vmem:[#allocation30_spill] sm:$0xff] }
 0x2c0   :  { %vm7439_vm12 = vmmov %vm7437_vm3  ;;  %v909_v54 = vsel %vm4061_vm10, %v877_v20, 0.0  ;;  %v874_v10 = vmul.f32 %v7329_v52, %v814_v16  ;;  %v5106_v11 = vadd.f32 %v1425_v35, %v4788_v7  ;;  %v875_v53 = vmul.f32 %v7329_v52, %v808_v22  ;;  %7448 = vst [vmem:[#allocation79_spill] sm:$0xff] %v5113_v21  ;;  %v5131_v22 = vpop.permute.xlu1 %1499  ;;  %v7647_v15 = vld [vmem:[#allocation75_spill] sm:$0xff] }
 0x2c1   :  { %v1007_v55 = vsel %vm7439_vm12, %v7438_v23, %v7436_v19  ;;  %v7444_v19 = vld [vmem:[#allocation28_spill] sm:$0xff]  ;;  %vm7447_vm7 = vmmov %vm7437_vm3  ;;  %v1050_v16 = vmul.f32 %v7449_v45, %v1001_v5  ;;  %v1572_v62 = vmul.f32 %v7450_v34, %v1533_v18  ;;  %v5123_v52 = vadd.f32 %v1426_v49, %v4791_v44  ;;  %7457 = vst [vmem:[#allocation89_spill] sm:$0xff] %v5131_v22  ;;  %v7458_v18 = vld [vmem:[#allocation103_spill] sm:$0xff] }
 0x2c2   :  { %v5103_v23 = vadd.f32 %v1428_v28, %v7444_v19  ;;  %7445 = vst [vmem:[#allocation90_spill] sm:$0xff] %v5106_v11  ;;  %v994_v8 = vsel %vm7447_vm7, %v7343_v41, %v7446_v42  ;;  %v1049_v20 = vmul.f32 %v7449_v45, %v1007_v55  ;;  %v7451_v28 = vld [vmem:[#allocation66_spill] sm:$0xff]  ;;  %v7452_v19 = vld [vmem:[#allocation64_spill] sm:$0xff]  ;;  %vm7453_vm10 = vmmov %vm7442_vm9  ;;  %v5126_v35 = vadd.f32 %v908_v13, %v4807_v47 }
 0x2c3   :  { %v1526_v7 = vsel %vm7453_vm10, %v7452_v19, %v7451_v28  ;;  %7454 = vst [vmem:[#allocation77_spill] sm:$0xff] %v5123_v52  ;;  %v5129_v41 = vadd.f32 %v909_v54, %v4809_v12  ;;  %v906_v55 = vsel %vm4075_vm2, %v874_v10, 0.0  ;;  %vm7459_vm12 = vmmov %vm7437_vm3  ;;  %v1047_v44 = vmul.f32 %v7345_v9, %v994_v8  ;;  %v7461_v47 = vld [vmem:[#allocation45_spill] sm:$0xff]  ;;  %v7473_v22 = vld [vmem:[#allocation47_spill] sm:$0xff] }
 0x2c4   :  { %7455 = vst [vmem:[#allocation141_spill] sm:$0xff] %v5126_v35  ;;  %v988_v11 = vsel %vm7459_vm12, %v7446_v42, %v7458_v18  ;;  %vm7460_vm9 = vcmp.lt.s32.totalorder %v3749_v17, 111  ;;  %1694 = vrot.lane.b32.xlu1 %v7461_v47, %s2869_s30  ;;  %v907_v49 = vsel %vm4134_vm14, %v875_v53, 0.0  ;;  %v7462_v13 = vld [vmem:[#allocation57_spill] sm:$0xff]  ;;  %vm7463_vm1 = vmmov %vm7453_vm10  ;;  %v7465_v42 = vld [vmem:[#allocation52_spill] sm:$0xff]  ;;  %vm7466_vm3 = vcmp.lt.s32.totalorder %v3749_v17, 127 }
 0x2c5   :  { %7456 = vst [vmem:[#allocation21_spill] sm:$0xff] %v5129_v41  ;;  %v1703_v12 = vsel %vm7460_vm9, %v4861_v51, %v4909_v60  ;;  %v1527_v54 = vsel %vm7463_vm1, %v7440_v25, %v7462_v13  ;;  %v7464_v10 = vld [vmem:[#allocation149_spill] sm:$0xff]  ;;  %v7467_v18 = vld [vmem:[#allocation43_spill] sm:$0xff]  ;;  %v5158_v41 = vpop.permute.xlu0 %1322  ;;  %v1081_v47 = vsel %vm3936_vm11, %v1049_v20, 0.0  ;;  %v1082_v53 = vsel %vm3884_vm6, %v1050_v16, 0.0  ;;  %v7470_v35 = vld [vmem:[#allocation56_spill] sm:$0xff] }
 0x2c6   :  { %v1177_v8 = vsel %vm7466_vm3, %v7465_v42, %v7464_v10  ;;  %v1569_v5 = vmul.f32 %v7467_v18, %v1526_v7  ;;  %7468 = vst [vmem:[#allocation97_spill] sm:$0xff] %v5158_v41  ;;  %vm7469_vm7 = vcmp.lt.s32.totalorder %v3878_v61, 15  ;;  %vm7471_vm10 = vcmp.lt.s32.totalorder %v3749_v17, 15  ;;  %vm7474_vm9 = vmmov %vm7466_vm3  ;;  %v7475_v16 = vld [vmem:[#allocation69_spill] sm:$0xff] }
 0x2c7   :  { %v1604_v60 = vsel %vm7469_vm7, %v1572_v62, 0.0  ;;  %v815_v25 = vsel %vm7471_vm10, %v7406_v27, %v7470_v35  ;;  %v1048_v52 = vmul.f32 %v7345_v9, %v988_v11  ;;  %vm7472_vm12 = vmmov %vm7471_vm10  ;;  %v1171_v20 = vsel %vm7474_vm9, %v7464_v10, %v7473_v22  ;;  %v1510_v62 = vpop.permute.xlu1 %1509  ;;  %v7478_v11 = vld [vmem:[#allocation27_spill] sm:$0xff] }
 0x2c8   :  { %v809_v7 = vsel %vm7472_vm12, %v7470_v35, %v7409_v1  ;;  %v1750_v50 = vmul.f32 %v7475_v16, %v1703_v12  ;;  %v5181_v45 = vadd.f32 %v906_v55, %v7476_v38  ;;  %v1079_v27 = vsel %vm3908_vm8, %v1047_v44, 0.0  ;;  %v7480_v1 = vld [vmem:[#allocation138_spill] sm:$0xff] }
 0x2c9   :  { %v1573_v9 = vmul.f32 %v7450_v34, %v1527_v54  ;;  %v1222_v21 = vmul.f32 %v7478_v11, %v1177_v8  ;;  %vm7479_vm1 = vnez %v7402_v36  ;;  %vm7481_vm3 = vcmp.lt.s32.totalorder %v7480_v1, 15  ;;  %v5204_v54 = vpop.permute.xlu0 %1477  ;;  %v7509_v1 = vld [vmem:[#allocation80_spill] sm:$0xff] }
 0x2ca   :  { %7477 = vst [vmem:[#allocation91_spill] sm:$0xff] %v5181_v45  ;;  %vm5191_vm7 = vmand %vm7481_vm3, %vm7479_vm1  ;;  %v7482_v35 = vmov 0  ;;  %v5196_v12 = vadd.f32 %v907_v49, %v4864_v46  ;;  %v5199_v38 = vadd.f32 %v1081_v47, %v4866_v63  ;;  %v878_v55 = vmul.f32 %v7421_v48, %v815_v25  ;;  %v7498_v25 = vld [vmem:[#allocation19_spill] sm:$0xff] }
 0x2cb   :  { %v7483_v35 = vsel %vm5191_vm7, 4294967295, %v7482_v35  ;;  %vm7487_vm10 = vmmov %vm7481_vm3  ;;  %7488 = vst [vmem:[#allocation99_spill] sm:$0xff] %v5204_v54  ;;  %v5207_v10 = vadd.f32 %v1082_v53, %v4881_v33  ;;  %v5210_v8 = vadd.f32 %v1604_v60, %v5050_v0  ;;  %v879_v45 = vmul.f32 %v7421_v48, %v809_v7  ;;  %v5225_v60 = vpop.permute.xlu1 %1648  ;;  %v7496_v53 = vld [vmem:[#allocation60_spill] sm:$0xff]  ;;  %v7502_v54 = vld [vmem:[#allocation147_spill] sm:$0xff] }
 0x2cc   :  { %7484 = vst [vmem:[#allocation145_spill] sm:$0xff] %v7483_v35  ;;  %7485 = vst [vmem:[#allocation151_spill] sm:$0xff] %v5196_v12  ;;  %v1601_v44 = vsel %vm7487_vm10, %v1569_v5, 0.0  ;;  %v1223_v46 = vmul.f32 %v7478_v11, %v1171_v20  ;;  %v1080_v63 = vsel %vm7370_vm5, %v1048_v52, 0.0  ;;  %v5217_v49 = vadd.f32 %v1079_v27, %v4884_v58  ;;  %v7490_v5 = vld [vmem:[#allocation61_spill] sm:$0xff]  ;;  %v7495_v52 = vld [vmem:[#allocation164_spill] sm:$0xff] }
 0x2cd   :  { %7486 = vst [vmem:[#allocation104_spill] sm:$0xff] %v5199_v38  ;;  %7489 = vst [vmem:[#allocation142_spill] sm:$0xff] %v5207_v10  ;;  %vm7491_vm12 = vcmp.lt.s32.totalorder %v3749_v17, 112  ;;  %v1782_v33 = vsel %vm5191_vm7, %v1750_v50, 0.0  ;;  %vm7497_vm10 = vcmp.lt.s32.totalorder %v3749_v17, 113  ;;  %v1625_v7 = vadd.f32 %v1601_v44, %v7498_v25  ;;  %v7499_v20 = vld [vmem:[#allocation62_spill] sm:$0xff]  ;;  %v5250_v10 = vpop.permute.xlu0 %1501 }
 0x2ce   :  { %v1532_v47 = vsel %vm7491_vm12, %v7490_v5, %v7452_v19  ;;  %7492 = vst [vmem:[#allocation140_spill] sm:$0xff] %v5225_v60  ;;  %vm7493_vm9 = vmmov %vm7481_vm3  ;;  %vm7494_vm3 = vnez %v7390_v29  ;;  %v1353_v58 = vsel %vm7497_vm10, %v7496_v53, %v7495_v52  ;;  %v910_v19 = vsel %vm4075_vm2, %v878_v55, 0.0  ;;  %v7500_v50 = vld [vmem:[#allocation160_spill] sm:$0xff] }
 0x2cf   :  { %v1605_v48 = vsel %vm7493_vm9, %v1573_v9, 0.0  ;;  %v1254_v0 = vsel %vm7494_vm3, %v1222_v21, 0.0  ;;  %vm7501_vm12 = vmmov %vm7497_vm10  ;;  %vm7504_vm5 = vcmp.lt.s32.totalorder %v3749_v17, 111  ;;  %7505 = vst [vmem:[#allocation101_spill] sm:$0xff] %v5250_v10  ;;  %v911_v26 = vsel %vm4134_vm14, %v879_v45, 0.0 }
 0x2d0   :  { %v1340_v27 = vsel %vm7501_vm12, %v7500_v50, %v7499_v20  ;;  %vm7503_vm9 = vmmov %vm7497_vm10  ;;  %v1709_v9 = vsel %vm7504_vm5, %v5225_v60, %v4861_v51  ;;  %v1255_v55 = vsel %vm7479_vm1, %v1223_v46, 0.0  ;;  %v1568_v44 = vmul.f32 %v7467_v18, %v1532_v47  ;;  %v7506_v50 = vld [vmem:[#allocation134_spill] sm:$0xff]  ;;  %v1651_v51 = vpop.permute.xlu1 %1650  ;;  %v7508_v60 = vld [vmem:[#allocation127_spill] sm:$0xff] }
 0x2d1   :  { %v1358_v21 = vsel %vm7503_vm9, %v7499_v20, %v7502_v54  ;;  %v1806_v25 = vadd.f32 %v1782_v33, %v1625_v7  ;;  %v5258_v38 = vadd.f32 %v1080_v63, %v7506_v50  ;;  %v5261_v54 = vadd.f32 %v1605_v48, %v5103_v23  ;;  %v7507_v20 = vld [vmem:[#allocation29_spill] sm:$0xff]  ;;  %v7510_v33 = vld [vmem:[#allocation7_spill] sm:$0xff]  ;;  %v7512_v7 = vld [vmem:[#allocation92_spill] sm:$0xff] }
 0x2d2   :  { %v1399_v12 = vmul.f32 %v7507_v20, %v1353_v58  ;;  %v5266_v59 = vadd.f32 %v1254_v0, %v7509_v1  ;;  %v1397_v45 = vmul.f32 %v7392_v2, %v1340_v27  ;;  %v1398_v46 = vmul.f32 %v7392_v2, %v1358_v21  ;;  %v7514_v48 = vld [vmem:[#allocation81_spill] sm:$0xff]  ;;  %v5288_v2 = vpop.permute.xlu0 %1652 }
 0x2d3   :  { %v1749_v47 = vmul.f32 %v7475_v16, %v1709_v9  ;;  %v5272_v63 = vadd.f32 %v910_v19, %v7510_v33  ;;  %v5275_v23 = vadd.f32 %v911_v26, %v7512_v7  ;;  %v5278_v58 = vadd.f32 %v1255_v55, %v7514_v48  ;;  %7519 = vst [vmem:[#allocation13_spill] sm:$0xff] %v5288_v2  ;;  %v7520_v0 = vld [vmem:[#allocation129_spill] sm:$0xff] }
 0x2d4   :  { %vm7515_vm2 = vcmp.lt.s32.totalorder %v3878_v61, 15  ;;  %v7516_v1 = vmov 0  ;;  %v7522_v21 = vld [vmem:[#allocation9_spill] sm:$0xff]  ;;  %vm7523_vm10 = vcmp.lt.s32.totalorder %v3749_v17, 112  ;;  %v1431_v50 = vsel %vm4969_vm15, %v1399_v12, 0.0  ;;  %v1663_v48 = vpop.permute.xlu1 %1662 }
 0x2d5   :  { %7511 = vst [vmem:[#allocation107_spill] sm:$0xff] %v5272_v63  ;;  %7513 = vst [vmem:[#allocation144_spill] sm:$0xff] %v5275_v23  ;;  %v5294_v9 = vadd.f32 %v7522_v21, %v1806_v25  ;;  %v1521_v26 = vsel %vm7523_vm10, %v7462_v13, %v1510_v62  ;;  %v7525_v33 = vld [vmem:[#allocation133_spill] sm:$0xff] }
 0x2d6   :  { %vm5284_vm14 = vmand %vm7515_vm2, %vm7494_vm3  ;;  %v1347_v7 = vsel %vm7503_vm9, %v7495_v52, %v7525_v33  ;;  %v1574_v27 = vmul.f32 %v7450_v34, %v1521_v26  ;;  %v5328_v16 = vpop.permute.xlu0 %1676 }
 0x2d7   :  { %v7517_v1 = vsel %vm5284_vm14, 4294967295, %v7516_v1  ;;  %vm7521_vm5 = vmmov %vm7515_vm2  ;;  %vm7527_vm2 = vcmp.lt.s32.totalorder %v3749_v17, 127  ;;  %v1781_v12 = vsel %vm5284_vm14, %v1749_v47, 0.0  ;;  %v1878_v23 = vmul.f32 0.5, %v5294_v9 }
 0x2d8   :  { %7518 = vst [vmem:[#allocation14_spill] sm:$0xff] %v7517_v1  ;;  %v1600_v19 = vsel %vm7521_vm5, %v1568_v44, 0.0  ;;  %vm7524_vm12 = vmmov %vm7523_vm10  ;;  %v7526_v44 = vld [vmem:[#allocation63_spill] sm:$0xff]  ;;  %vm7529_vm10 = vcmp.lt.s32.totalorder %v3749_v17, 111  ;;  %v1675_v26 = vpop.permute.xlu1 %1674  ;;  %v7611_v1 = vld [vmem:[#allocation21_spill] sm:$0xff] }
 0x2d9   :  { %v1539_v55 = vsel %vm7524_vm12, %v1510_v62, %v7441_v32  ;;  %v1165_v25 = vsel %vm7527_vm2, %v7473_v22, %v7526_v44  ;;  %vm7528_vm5 = vmmov %vm7527_vm2  ;;  %v1429_v32 = vsel %vm5033_vm4, %v1397_v45, 0.0  ;;  %v1430_v62 = vsel %vm5056_vm0, %v1398_v46, 0.0  ;;  %v7531_v45 = vld [vmem:[#allocation86_spill] sm:$0xff] }
 0x2da   :  { %v1183_v13 = vsel %vm7528_vm5, %v7526_v44, %v7465_v42  ;;  %v1710_v52 = vsel %vm7529_vm10, %v1651_v51, %v1663_v48  ;;  %v1624_v22 = vadd.f32 %v1600_v19, %v5047_v37  ;;  %v1575_v10 = vmul.f32 %v7450_v34, %v1539_v55  ;;  %v7530_v42 = vld [vmem:[#allocation108_spill] sm:$0xff]  ;;  %vm7533_vm12 = vmmov %vm7503_vm9 }
 0x2db   :  { %v1753_v44 = vmul.f32 %v7530_v42, %v1710_v52  ;;  %v5331_v63 = vadd.f32 %v1431_v50, %v7531_v45  ;;  %v1400_v46 = vmul.f32 %v7507_v20, %v1347_v7  ;;  %v1224_v47 = vmul.f32 %v7478_v11, %v1165_v25  ;;  %v7532_v50 = vld [vmem:[#allocation76_spill] sm:$0xff]  ;;  %vm7534_vm9 = vmmov %vm7529_vm10 }
 0x2dc   :  { %v1453_v2 = vadd.f32 %v1429_v32, %v5022_v14  ;;  %v5338_v37 = vmul.f32 %v7478_v11, %v1183_v13  ;;  %v1805_v19 = vadd.f32 %v1781_v12, %v1624_v22  ;;  %v1454_v55 = vadd.f32 %v1430_v62, %v5025_v3  ;;  %vm7535_vm2 = vmmov %vm7533_vm12 }
 0x2dd   :  { %v1785_v34 = vsel %vm5284_vm14, %v1753_v44, 0.0  ;;  %v1341_v7 = vsel %vm7533_vm12, %v7525_v33, %v7532_v50  ;;  %v1704_v14 = vsel %vm7534_vm9, %v1663_v48, %v1675_v26  ;;  %v1359_v11 = vsel %vm7535_vm2, %v7532_v50, %v7496_v53  ;;  %v1687_v33 = vpop.permute.xlu0 %1686  ;;  %v7542_v48 = vld [vmem:[#allocation137_spill] sm:$0xff]  ;;  %v5389_v44 = vpop.permute.xlu1 %1838 }
 0x2de   :  { %v1809_v25 = vadd.f32 %v1785_v34, %v5210_v8  ;;  %vm7536_vm5 = vcmp.lt.s32.totalorder %v3854_v24, 15  ;;  %vm7537_vm10 = vcmp.lt.s32.totalorder %v3888_v56, 15  ;;  %v1754_v32 = vmul.f32 %v7530_v42, %v1704_v14  ;;  %7549 = vst [vmem:[#allocation109_spill] sm:$0xff] %v5389_v44  ;;  %v7613_v44 = vld [vmem:[#allocation35_spill] sm:$0xff] }
 0x2df   :  { %v1606_v13 = vsel %vm7536_vm5, %v1574_v27, 0.0  ;;  %v1607_v3 = vsel %vm7537_vm10, %v1575_v10, 0.0  ;;  %vm7538_vm12 = vmmov %vm7536_vm5  ;;  %v7539_v8 = vmov 0  ;;  %2733 = vtanh.f32 %v1878_v23 }
 0x2e0   :  { %vm5363_vm14 = vmand %vm7538_vm12, %vm7314_vm13  ;;  %v5368_v53 = vadd.f32 %v7542_v48, %v1809_v25  ;;  %vm7543_vm9 = vnez %v7315_v30  ;;  %v5383_v12 = vadd.f32 %v7522_v21, %v1805_v19  ;;  %v1786_v23 = vsel %vm5191_vm7, %v1754_v32, 0.0  ;;  %v7552_v32 = vld [vmem:[#allocation11_spill] sm:$0xff]  ;;  %v7587_v30 = vld [vmem:[#allocation73_spill] sm:$0xff] }
 0x2e1   :  { %v7540_v8 = vsel %vm5363_vm14, 4294967295, %v7539_v8  ;;  %vm7544_vm2 = vmmov %vm7537_vm10  ;;  %vm7547_vm10 = vcmp.lt.s32.totalorder %v3749_v17, 111  ;;  %v1630_v45 = vadd.f32 %v1606_v13, %v1453_v2  ;;  %v1631_v34 = vadd.f32 %v1607_v3, %v1454_v55 }
 0x2e2   :  { %7541 = vst [vmem:[#allocation38_spill] sm:$0xff] %v7540_v8  ;;  %vm5374_vm5 = vmand %vm7544_vm2, %vm7543_vm9  ;;  %v1698_v27 = vsel %vm7547_vm10, %v1675_v26, %v1687_v33  ;;  %v1881_v50 = vmul.f32 0.5, %v5368_v53  ;;  %v1810_v26 = vadd.f32 %v1786_v23, %v5261_v54  ;;  %vm7550_vm2 = vnez %v7341_v43 }
 0x2e3   :  { %vm7548_vm12 = vmmov %vm7547_vm10  ;;  %v1755_v52 = vmul.f32 %v7530_v42, %v1698_v27  ;;  %v1401_v19 = vmul.f32 %v7507_v20, %v1341_v7  ;;  %vm7553_vm10 = vcmp.lt.s32.totalorder %v3749_v17, 112  ;;  %v1256_v7 = vsel %vm7314_vm13, %v1224_v47, 0.0 }
 0x2e4   :  { %v1716_v62 = vsel %vm7548_vm12, %v1687_v33, %v1651_v51  ;;  %v1432_v51 = vsel %vm7550_vm2, %v1400_v46, 0.0  ;;  %v1520_v2 = vsel %vm7553_vm10, %v7451_v28, %v7552_v32  ;;  %v5407_v54 = vadd.f32 %v7542_v48, %v1810_v26  ;;  %v5413_v33 = vpop.permute.xlu1 %970  ;;  %vm7554_vm12 = vmmov %vm7553_vm10 }
 0x2e5   :  { %v1756_v22 = vmul.f32 %v7530_v42, %v1716_v62  ;;  %v1787_v25 = vsel %vm5363_vm14, %v1755_v52, 0.0  ;;  %v5400_v42 = vpop.permute.xlu0 %1842  ;;  %v1402_v13 = vmul.f32 %v7507_v20, %v1359_v11  ;;  %v1877_v3 = vmul.f32 0.5, %v5383_v12  ;;  %v7555_v52 = vld [vmem:[#allocation70_spill] sm:$0xff] }
 0x2e6   :  { %7551 = vst [vmem:[#allocation96_spill] sm:$0xff] %v5400_v42  ;;  %v1811_v55 = vadd.f32 %v1787_v25, %v1630_v45  ;;  %2735 = vtanh.f32 %v1881_v50  ;;  %v1257_v27 = vsel %vm7543_vm9, %v5338_v37, 0.0  ;;  %v1882_v28 = vmul.f32 0.5, %v5407_v54  ;;  %v7556_v37 = vld [vmem:[#allocation10_spill] sm:$0xff] }
 0x2e7   :  { %v1788_v14 = vsel %vm5374_vm5, %v1756_v22, 0.0  ;;  %v1433_v20 = vsel %vm5033_vm4, %v1401_v19, 0.0  ;;  %v1538_v47 = vsel %vm7554_vm12, %v7552_v32, %v7490_v5  ;;  %v1570_v11 = vmul.f32 %v7467_v18, %v1520_v2  ;;  %v7561_v5 = vld [vmem:[#allocation87_spill] sm:$0xff] }
 0x2e8   :  { %v1812_v46 = vadd.f32 %v1788_v14, %v1631_v34  ;;  %v5420_v62 = vadd.f32 %v7542_v48, %v1811_v55  ;;  %vm7557_vm10 = vcmp.lt.s32.totalorder %v3749_v17, 1  ;;  %v7559_v34 = vld [vmem:[#allocation58_spill] sm:$0xff]  ;;  %2737 = vtanh.f32 %v1882_v28  ;;  %v5452_v32 = vpop.permute.xlu1 %1135 }
 0x2e9   :  { %v1008_v22 = vsel %vm7557_vm10, %v7556_v37, %v7555_v52  ;;  %v5436_v45 = vpop.permute.xlu0 %1312  ;;  %vm7560_vm9 = vmmov %vm7557_vm10  ;;  %v5445_v19 = vadd.f32 %v1432_v51, %v7561_v5  ;;  %v5448_v25 = vadd.f32 %v1256_v7, %v5217_v49  ;;  %v1434_v14 = vsel %vm5056_vm0, %v1402_v13, 0.0  ;;  %v2734_v2 = vpop.eup %2733  ;;  %v7566_v7 = vld [vmem:[#allocation88_spill] sm:$0xff] }
 0x2ea   :  { %v5423_v23 = vadd.f32 %v7542_v48, %v1812_v46  ;;  %7558 = vst [vmem:[#allocation110_spill] sm:$0xff] %v5436_v45  ;;  %v1002_v48 = vsel %vm7560_vm9, %v7555_v52, %v7559_v34  ;;  %v1883_v50 = vmul.f32 0.5, %v5420_v62  ;;  %2739 = vtanh.f32 %v1877_v3  ;;  %v7563_v46 = vld [vmem:[#allocation32_spill] sm:$0xff]  ;;  %v7564_v52 = vld [vmem:[#allocation78_spill] sm:$0xff] }
 0x2eb   :  { %7562 = vst [vmem:[#allocation98_spill] sm:$0xff] %v5448_v25  ;;  %v1571_v55 = vmul.f32 %v7467_v18, %v1538_v47  ;;  %v1053_v28 = vmul.f32 %v7563_v46, %v1008_v22  ;;  %v995_v51 = vsel %vm7560_vm9, %v7435_v40, %v7564_v52  ;;  %v5461_v49 = vadd.f32 %v1257_v27, %v5258_v38  ;;  %v7568_v47 = vld [vmem:[#allocation37_spill] sm:$0xff]  ;;  %v7570_v38 = vld [vmem:[#allocation79_spill] sm:$0xff]  ;;  %v7583_v25 = vld [vmem:[#allocation90_spill] sm:$0xff] }
 0x2ec   :  { %v1884_v26 = vmul.f32 0.5, %v5423_v23  ;;  %2741 = vtanh.f32 %v1883_v50  ;;  %v5464_v5 = vadd.f32 %v1433_v20, %v7566_v7  ;;  %vm7567_vm12 = vcmp.lt.s32.totalorder %v3854_v24, 15  ;;  %v7573_v20 = vld [vmem:[#allocation139_spill] sm:$0xff]  ;;  %v7577_v7 = vld [vmem:[#allocation74_spill] sm:$0xff]  ;;  %v5495_v45 = vpop.permute.xlu1 %1157 }
 0x2ed   :  { %7565 = vst [vmem:[#allocation40_spill] sm:$0xff] %v5461_v49  ;;  %v1602_v13 = vsel %vm7567_vm12, %v1570_v11, 0.0  ;;  %v1054_v3 = vmul.f32 %v7563_v46, %v1002_v48  ;;  %v1335_v18 = vpop.permute.xlu0 %1334  ;;  %v5470_v22 = vadd.f32 %v1434_v14, %v7568_v47  ;;  %vm7569_vm10 = vcmp.lt.s32.totalorder %v3749_v17, 113  ;;  %v7575_v48 = vld [vmem:[#allocation30_spill] sm:$0xff]  ;;  %v7576_v14 = vld [vmem:[#allocation131_spill] sm:$0xff]  ;;  %v7579_v47 = vld [vmem:[#allocation85_spill] sm:$0xff] }
 0x2ee   :  { %2743 = vtanh.f32 %v1884_v26  ;;  %v5475_v40 = vsel %vm7569_vm10, %v5158_v41, %v1335_v18  ;;  %vm7571_vm9 = vmmov %vm7569_vm10  ;;  %vm7574_vm12 = vcmp.lt.s32.totalorder %v3749_v17, 1  ;;  %v1051_v50 = vmul.f32 %v7575_v48, %v995_v51  ;;  %7581 = vst [vmem:[#allocation157_spill] sm:$0xff] %v5495_v45  ;;  %v7590_v41 = vld [vmem:[#allocation15_spill] sm:$0xff] }
 0x2ef   :  { %v5480_v27 = vsel %vm7571_vm9, %v1335_v18, %v7570_v38  ;;  %v989_v11 = vsel %vm7574_vm12, %v7564_v52, %v7573_v20  ;;  %vm7578_vm13 = vcmp.lt.s32.totalorder %v3749_v17, 127  ;;  %vm7582_vm9 = vcmp.lt.s32.totalorder %v3888_v56, 15  ;;  %v7586_v20 = vld [vmem:[#allocation24_spill] sm:$0xff] }
 0x2f0   :  { %7572 = vst [vmem:[#allocation112_spill] sm:$0xff] %v5480_v27  ;;  %v1178_v26 = vsel %vm7578_vm13, %v7577_v7, %v7576_v14  ;;  %vm7580_vm10 = vmmov %vm7578_vm13  ;;  %v1603_v18 = vsel %vm7582_vm9, %v1571_v55, 0.0  ;;  %v5500_v49 = vadd.f32 %v1602_v13, %v7583_v25  ;;  %v1085_v51 = vsel %vm3936_vm11, %v1053_v28, 0.0  ;;  %v2736_v4 = vpop.eup %2735  ;;  %v7592_v25 = vld [vmem:[#allocation67_spill] sm:$0xff]  ;;  %v7593_v13 = vld [vmem:[#allocation146_spill] sm:$0xff]  ;;  %v5548_v45 = vpop.permute.xlu1 %1310 }
 0x2f1   :  { %v1172_v42 = vsel %vm7580_vm10, %v7576_v14, %v7579_v47  ;;  %vm7588_vm13 = vcmp.lt.s32.totalorder %v3749_v17, 113  ;;  %v1086_v14 = vsel %vm3884_vm6, %v1054_v3, 0.0  ;;  %v1926_v38 = vmul.f32 0.5, %v2734_v2  ;;  %v5518_v52 = vpop.permute.xlu0 %1491  ;;  %v7597_v3 = vld [vmem:[#allocation89_spill] sm:$0xff] }
 0x2f2   :  { %7584 = vst [vmem:[#allocation18_spill] sm:$0xff] %v5500_v49  ;;  %v1354_v57 = vsel %vm7588_vm13, %v7587_v30, %v7586_v20  ;;  %vm7591_vm12 = vmmov %vm7588_vm13  ;;  %vm7594_vm10 = vcmp.lt.s32.totalorder %v3749_v17, 112  ;;  %v1052_v21 = vmul.f32 %v7575_v48, %v989_v11  ;;  %v7596_v30 = vld [vmem:[#allocation36_spill] sm:$0xff]  ;;  %v7599_v49 = vld [vmem:[#allocation125_spill] sm:$0xff]  ;;  %v2738_v35 = vpop.eup %2737  ;;  %vm7614_vm13 = vcmp.lt.s32.totalorder %v3749_v17, 1 }
 0x2f3   :  { %v1348_v55 = vsel %vm7591_vm12, %v7586_v20, %v7590_v41  ;;  %v1534_v28 = vsel %vm7594_vm10, %v7593_v13, %v7592_v25  ;;  %7595 = vst [vmem:[#allocation158_spill] sm:$0xff] %v5518_v52  ;;  %v1226_v7 = vmul.f32 %v7596_v30, %v1178_v26  ;;  %v1227_v39 = vmul.f32 %v7596_v30, %v1172_v42  ;;  %vm7598_vm6 = vmmov %vm7594_vm10  ;;  %v7606_v11 = vld [vmem:[#allocation77_spill] sm:$0xff] }
 0x2f4   :  { %v1528_v2 = vsel %vm7598_vm6, %v7592_v25, %v7597_v3  ;;  %v7600_v20 = vshra.s32 %v7599_v49, 8  ;;  %v5540_v48 = vadd.f32 %v1603_v18, %v7606_v11  ;;  %v7608_v42 = vld [vmem:[#allocation141_spill] sm:$0xff]  ;;  %v1083_v25 = vsel %vm3908_vm8, %v1051_v50, 0.0  ;;  %v2740_v11 = vpop.eup %2739  ;;  %vm7622_vm6 = vmmov %vm7614_vm13 }
 0x2f5   :  { %v5543_v26 = vadd.f32 %v1085_v51, %v7608_v42  ;;  %v7610_v30 = vld [vmem:[#allocation33_spill] sm:$0xff]  ;;  %v5551_v49 = vadd.f32 %v1086_v14, %v7611_v1  ;;  %v1576_v27 = vmul.f32 %v7613_v44, %v1534_v28  ;;  %v1929_v18 = vmul.f32 0.5, %v2736_v4  ;;  %v5560_v50 = vpop.permute.xlu0 %1513  ;;  %v7617_v14 = vld [vmem:[#allocation91_spill] sm:$0xff] }
 0x2f6   :  { %vm5529_vm11 = vcmp.eq.s32.totalorder %v7600_v20, 0  ;;  %v7603_v47 = vmov %v7600_v20  ;;  %7607 = vst [vmem:[#allocation150_spill] sm:$0xff] %v5540_v48  ;;  %v1403_v20 = vmul.f32 %v7610_v30, %v1354_v57  ;;  %v1950_v48 = vadd.f32 0.5, %v1926_v38  ;;  %7615 = vst [vmem:[#allocation102_spill] sm:$0xff] %v5560_v50  ;;  %v30_v52 = vld [vmem:[%s6570_s2] sm:$0xf] }
 0x2f7   :  { %vm5535_vm9 = vcmp.eq.s32.totalorder %v7603_v47, 1  ;;  %7609 = vst [vmem:[#allocation114_spill] sm:$0xff] %v5543_v26  ;;  %7612 = vst [vmem:[#allocation94_spill] sm:$0xff] %v5551_v49  ;;  %v1404_v47 = vmul.f32 %v7610_v30, %v1348_v55  ;;  %v1577_v51 = vmul.f32 %v7613_v44, %v1528_v2  ;;  %v1930_v42 = vmul.f32 0.5, %v2738_v35  ;;  %v2742_v26 = vpop.eup %2741 }
 0x2f8   :  { %v990_v57 = vsel %vm7614_vm13, %v5413_v33, %v7556_v37  ;;  %vm7616_vm12 = vnez %v7369_v31  ;;  %v5565_v55 = vadd.f32 %v1083_v25, %v7617_v14  ;;  %v1258_v4 = vsel %vm7494_vm3, %v1226_v7, 0.0  ;;  %v5583_v7 = vpop.permute.xlu1 %1332 }
 0x2f9   :  { %v1084_v1 = vsel %vm7616_vm12, %v1052_v21, 0.0  ;;  %v1259_v35 = vsel %vm7479_vm1, %v1227_v39, 0.0  ;;  %v7619_v38 = vshra.s32 %v7508_v60, 8  ;;  %v1435_v37 = vsel %vm4969_vm15, %v1403_v20, 0.0  ;;  %7623 = vst [vmem:[#allocation116_spill] sm:$0xff] %v5583_v7  ;;  %v5601_v50 = vpop.permute.xlu0 %1666  ;;  %v7631_v7 = vld [vmem:[#allocation151_spill] sm:$0xff] }
 0x2fa   :  { %7618 = vst [vmem:[#allocation93_spill] sm:$0xff] %v5565_v55  ;;  %v1954_v2 = vadd.f32 0.5, %v1930_v42  ;;  %v1931_v21 = vmul.f32 0.5, %v2742_v26  ;;  %v996_v25 = vsel %vm7622_vm6, %v7559_v34, %v5413_v33  ;;  %v7624_v39 = vshra.s32 %v3749_v17, 8  ;;  %v7629_v34 = vld [vmem:[#allocation138_spill] sm:$0xff] }
 0x2fb   :  { %vm5573_vm10 = vcmp.eq.s32.totalorder %v7619_v38, 0  ;;  %v2744_v38 = vpop.eup %2743  ;;  %v1436_v55 = vsel %vm7550_vm2, %v1404_v47, 0.0  ;;  %vm7627_vm15 = vcmp.lt.s32.totalorder %v3878_v61, 15  ;;  %v1953_v20 = vadd.f32 0.5, %v1929_v18  ;;  %v7632_v47 = vld [vmem:[#allocation104_spill] sm:$0xff] }
 0x2fc   :  { %vm5587_vm13 = vcmp.eq.s32.totalorder %v7624_v39, 0  ;;  %v1608_v26 = vsel %vm7627_vm15, %v1576_v27, 0.0  ;;  %v1056_v42 = vmul.f32 %v7563_v46, %v990_v57  ;;  %v5597_v33 = vmul.f32 %v1950_v48, %v5294_v9  ;;  %v7633_v27 = vld [vmem:[#allocation142_spill] sm:$0xff] }
 0x2fd   :  { %vm7630_vm6 = vcmp.lt.s32.totalorder %v7629_v34, 15  ;;  %v1925_v39 = vmul.f32 0.5, %v2740_v11  ;;  %v1955_v30 = vadd.f32 0.5, %v1931_v21  ;;  %v5604_v49 = vadd.f32 %v1084_v1, %v7631_v7  ;;  %v7645_v7 = vld [vmem:[#allocation12_spill] sm:$0xff] }
 0x2fe   :  { %7628 = vst [vmem:[#allocation117_spill] sm:$0xff] %v5597_v33  ;;  %v1609_v6 = vsel %vm7630_vm6, %v1577_v51, 0.0  ;;  %v5607_v43 = vadd.f32 %v1258_v4, %v7632_v47  ;;  %v5610_v18 = vadd.f32 %v1259_v35, %v7633_v27  ;;  %v1055_v57 = vmul.f32 %v7563_v46, %v996_v25  ;;  %v5628_v4 = vpop.permute.xlu1 %1489 }
 0x2ff   :  { %v7634_v9 = vshra.s32 %v7520_v0, 8  ;;  %v7635_v48 = vmov 0  ;;  %v5620_v11 = vadd.f32 %v1435_v37, %v5266_v59  ;;  %v5623_v51 = vadd.f32 %v1436_v55, %v5278_v58 }
 0x300   :  { %v5626_v1 = vmul.f32 %v1954_v2, %v5407_v54  ;;  %v1932_v35 = vmul.f32 0.5, %v2744_v38  ;;  %v1632_v46 = vadd.f32 %v1608_v26, %v5331_v63  ;;  %v5632_v21 = vadd.f32 %v1609_v6, %v5445_v19  ;;  %v1689_v54 = vpop.permute.xlu0 %1688  ;;  %v7643_v19 = vld [vmem:[#allocation144_spill] sm:$0xff]  ;;  %v7656_v6 = vld [vmem:[#allocation111_spill] sm:$0xff] }
 0x301   :  { %vm5615_vm15 = vcmp.eq.s32.totalorder %v7634_v9, 0  ;;  %v5635_v25 = vmul.f32 %v1953_v20, %v5368_v53  ;;  %v1088_v59 = vsel %vm7616_vm12, %v1056_v42, 0.0  ;;  %v1949_v37 = vadd.f32 0.5, %v1925_v39  ;;  %v7641_v53 = vld [vmem:[#allocation13_spill] sm:$0xff]  ;;  %v7649_v39 = vld [vmem:[#allocation167_spill] sm:$0xff] }
 0x302   :  { %v7636_v48 = vsel %vm5615_vm15, 4294967295, %v7635_v48  ;;  %7637 = vst [vmem:[#allocation115_spill] sm:$0xff] %v5626_v1  ;;  %v5640_v58 = vmul.f32 %v1955_v30, %v5420_v62  ;;  %v1087_v63 = vsel %vm3908_vm8, %v1055_v57, 0.0  ;;  %vm7640_vm6 = vcmp.lt.s32.totalorder %v3749_v17, 111  ;;  %v1512_v20 = vpop.permute.xlu1 %1511 }
 0x303   :  { %7638 = vst [vmem:[#allocation168_spill] sm:$0xff] %v5635_v25  ;;  %v1699_v31 = vsel %vm7640_vm6, %v5328_v16, %v1689_v54  ;;  %vm7642_vm12 = vmmov %vm7640_vm6  ;;  %v1956_v62 = vadd.f32 0.5, %v1932_v35  ;;  %v5657_v2 = vadd.f32 %v1088_v59, %v7643_v19  ;;  %vm7646_vm2 = vcmp.lt.s32.totalorder %v3749_v17, 127 }
 0x304   :  { %7639 = vst [vmem:[#allocation23_spill] sm:$0xff] %v5640_v58  ;;  %v1717_v30 = vsel %vm7642_vm12, %v1689_v54, %v7641_v53  ;;  %v1173_v38 = vsel %vm7646_vm2, %v5452_v32, %v7645_v7  ;;  %vm7648_vm8 = vmmov %vm7646_vm2  ;;  %v2018_v42 = vsel %vm5529_vm11, %v5626_v1, 0.0  ;;  %v1759_v47 = vmul.f32 %v7649_v39, %v1699_v31  ;;  %v7653_v31 = vld [vmem:[#allocation107_spill] sm:$0xff] }
 0x305   :  { %7644 = vst [vmem:[#allocation44_spill] sm:$0xff] %v5657_v2  ;;  %v1179_v26 = vsel %vm7648_vm8, %v7647_v15, %v5452_v32  ;;  %vm7650_vm6 = vcmp.lt.s32.totalorder %v3749_v17, 112  ;;  %v2017_v9 = vsel %vm5587_vm13, %v5635_v25, 0.0  ;;  %v1760_v32 = vmul.f32 %v7649_v39, %v1717_v30  ;;  %v7685_v2 = vld [vmem:[#allocation9_spill] sm:$0xff] }
 0x306   :  { %v1522_v27 = vsel %vm7650_vm6, %v7597_v3, %v1512_v20  ;;  %vm7651_vm12 = vmmov %vm7650_vm6  ;;  %v2019_v54 = vsel %vm5573_vm10, %v5640_v58, 0.0  ;;  %v5687_v3 = vmul.f32 %v1949_v37, %v5383_v12  ;;  %v5690_v19 = vadd.f32 %v1087_v63, %v7653_v31  ;;  %v1665_v12 = vpop.permute.xlu1 %1664 }
 0x307   :  { %v1540_v57 = vsel %vm7651_vm12, %v1512_v20, %v7593_v13  ;;  %v1578_v35 = vmul.f32 %v7613_v44, %v1522_v27  ;;  %v5693_v13 = vmul.f32 %v1956_v62, %v5423_v23  ;;  %v2042_v20 = vadd.f32 %v2018_v42, %v2017_v9 }
 0x308   :  { %v1579_v59 = vmul.f32 %v7613_v44, %v1540_v57  ;;  %7652 = vst [vmem:[#allocation5_spill] sm:$0xff] %v5687_v3  ;;  %7654 = vst [vmem:[#allocation118_spill] sm:$0xff] %v5690_v19  ;;  %v1230_v30 = vmul.f32 %v7656_v6, %v1179_v26  ;;  %v5697_v27 = vmul.f32 %v7656_v6, %v1173_v38  ;;  %vm7657_vm2 = vcmp.lt.s32.totalorder %v3854_v24, 15 }
 0x309   :  { %7655 = vst [vmem:[#allocation113_spill] sm:$0xff] %v5693_v13  ;;  %v1610_v44 = vsel %vm7657_vm2, %v1578_v35, 0.0  ;;  %vm7658_vm8 = vcmp.lt.s32.totalorder %v3888_v56, 15  ;;  %v1791_v37 = vsel %vm5363_vm14, %v1759_v47, 0.0  ;;  %v2043_v62 = vadd.f32 %v2042_v20, %v2019_v54  ;;  %v7664_v54 = vld [vmem:[#allocation119_spill] sm:$0xff]  ;;  %v7666_v20 = vld [vmem:[#allocation112_spill] sm:$0xff] }
 0x30a   :  { %v1611_v57 = vsel %vm7658_vm8, %v1579_v59, 0.0  ;;  %v1634_v63 = vadd.f32 %v1610_v44, %v5464_v5  ;;  %v1792_v26 = vsel %vm5374_vm5, %v1760_v32, 0.0  ;;  %v2020_v38 = vsel %vm5615_vm15, %v5693_v13, 0.0 }
 0x30b   :  { %v1635_v23 = vadd.f32 %v1611_v57, %v5470_v22  ;;  %v7659_v42 = vshra.s32 %v3749_v17, 8  ;;  %vm7662_vm12 = vcmp.lt.s32.totalorder %v3749_v17, 111  ;;  %v2044_v35 = vadd.f32 %v2043_v62, %v2020_v38  ;;  %v7671_v62 = vld [vmem:[#allocation16_spill] sm:$0xff] }
 0x30c   :  { %v1705_v5 = vsel %vm7662_vm12, %v1665_v12, %v5328_v16  ;;  %vm7663_vm2 = vmmov %vm7662_vm12  ;;  %v1815_v47 = vadd.f32 %v1791_v37, %v1634_v63  ;;  %v5727_v31 = vmul.f32 %v7664_v54, %v5475_v40  ;;  %v5731_v44 = vmul.f32 %v7664_v54, %v7666_v20  ;;  %v1685_v16 = vpop.permute.xlu1 %1684  ;;  %v7669_v40 = vld [vmem:[#allocation14_spill] sm:$0xff] }
 0x30d   :  { %vm5714_vm6 = vcmp.eq.s32.totalorder %v7659_v42, 1  ;;  %v1711_v22 = vsel %vm7663_vm2, %v7641_v53, %v1665_v12  ;;  %v1816_v32 = vadd.f32 %v1792_v26, %v1635_v23  ;;  %v1758_v57 = vmul.f32 %v7649_v39, %v1705_v5  ;;  %v7668_v12 = vld [vmem:[#allocation109_spill] sm:$0xff]  ;;  %2045 = vadd.xlane.f32.xlu1 %v2044_v35  ;;  %vm7672_vm12 = vmmov %vm7663_vm2  ;;  %v7674_v5 = vld [vmem:[#allocation140_spill] sm:$0xff] }
 0x30e   :  { %v1757_v59 = vmul.f32 %v7649_v39, %v1711_v22  ;;  %7665 = vst [vmem:[#allocation100_spill] sm:$0xff] %v5727_v31  ;;  %7667 = vst [vmem:[#allocation20_spill] sm:$0xff] %v5731_v44  ;;  %v5738_v37 = vadd.f32 %v7668_v12, %v1815_v47  ;;  %vm7670_vm8 = vnez %v7669_v40  ;;  %v1697_v26 = vsel %vm7672_vm12, %v7671_v62, %v1685_v16  ;;  %v7675_v47 = vld [vmem:[#allocation69_spill] sm:$0xff] }
 0x30f   :  { %v5741_v63 = vadd.f32 %v7668_v12, %v1816_v32  ;;  %v1790_v38 = vsel %vm5191_vm7, %v1758_v57, 0.0  ;;  %v1715_v22 = vsel %vm7663_vm2, %v1685_v16, %v7674_v5  ;;  %v1751_v20 = vmul.f32 %v7675_v47, %v1697_v26  ;;  %v7676_v53 = vld [vmem:[#allocation157_spill] sm:$0xff] }
 0x310   :  { %v1789_v23 = vsel %vm7670_vm8, %v1757_v59, 0.0  ;;  %v1887_v32 = vmul.f32 0.5, %v5738_v37  ;;  %v1814_v59 = vadd.f32 %v1790_v38, %v5632_v21  ;;  %v1752_v55 = vmul.f32 %v7675_v47, %v1715_v22  ;;  %v7677_v57 = vld [vmem:[#allocation85_spill] sm:$0xff]  ;;  %v5771_v5 = vpop.permute.xlu1 %1746  ;;  %v7681_v47 = vld [vmem:[#allocation150_spill] sm:$0xff] }
 0x311   :  { %v1813_v42 = vadd.f32 %v1789_v23, %v1632_v46  ;;  %v1888_v35 = vmul.f32 0.5, %v5741_v63  ;;  %v1262_v62 = vsel %vm7494_vm3, %v1230_v30, 0.0  ;;  %vm7678_vm12 = vcmp.lt.s32.totalorder %v3749_v17, 127  ;;  %v5764_v23 = vpop.permute.xlu0 %1336  ;;  %7679 = vst [vmem:[#allocation120_spill] sm:$0xff] %v5771_v5  ;;  %v7680_v30 = vld [vmem:[#allocation18_spill] sm:$0xff]  ;;  %v7727_v39 = vld [vmem:[#allocation93_spill] sm:$0xff] }
 0x312   :  { %v1166_v46 = vsel %vm7678_vm12, %v7677_v57, %v7676_v53  ;;  %v1783_v26 = vsel %vm5363_vm14, %v1751_v20, 0.0  ;;  %2745 = vtanh.f32 %v1887_v32  ;;  %v5774_v21 = vadd.f32 %v7668_v12, %v1814_v59  ;;  %v7682_v57 = vld [vmem:[#allocation74_spill] sm:$0xff]  ;;  %vm7683_vm3 = vmmov %vm7678_vm12  ;;  %v7684_v32 = vld [vmem:[#allocation36_spill] sm:$0xff] }
 0x313   :  { %v5767_v16 = vadd.f32 %v7668_v12, %v1813_v42  ;;  %v1784_v29 = vsel %vm5374_vm5, %v1752_v55, 0.0  ;;  %v1807_v38 = vadd.f32 %v1783_v26, %v7680_v30  ;;  %v1263_v22 = vsel %vm7479_vm1, %v5697_v27, 0.0  ;;  %v7686_v30 = vld [vmem:[#allocation97_spill] sm:$0xff]  ;;  %v7688_v27 = vld [vmem:[#allocation79_spill] sm:$0xff] }
 0x314   :  { %2747 = vtanh.f32 %v1888_v35  ;;  %v1808_v20 = vadd.f32 %v1784_v29, %v7681_v47  ;;  %v1184_v12 = vsel %vm7683_vm3, %v7676_v53, %v7682_v57  ;;  %v1228_v59 = vmul.f32 %v7684_v32, %v1166_v46  ;;  %v7693_v47 = vld [vmem:[#allocation114_spill] sm:$0xff] }
 0x315   :  { %v1885_v42 = vmul.f32 0.5, %v5767_v16  ;;  %v1886_v55 = vmul.f32 0.5, %v5774_v21  ;;  %v5791_v26 = vadd.f32 %v7685_v2, %v1807_v38  ;;  %vm7687_vm1 = vcmp.lt.s32.totalorder %v3749_v17, 113  ;;  %v5810_v38 = vpop.permute.xlu1 %1159  ;;  %v5827_v19 = vpop.permute.xlu0 %1493 }
 0x316   :  { %v1349_v36 = vsel %vm7687_vm1, %v5548_v45, %v7686_v30  ;;  %vm7689_vm2 = vmmov %vm7687_vm1  ;;  %v7690_v29 = vshra.s32 %v7508_v60, 8  ;;  %v5808_v46 = vadd.f32 %v7685_v2, %v1808_v20  ;;  %v5813_v57 = vadd.f32 %v1262_v62, %v7693_v47  ;;  %v7698_v2 = vld [vmem:[#allocation116_spill] sm:$0xff]  ;;  %7700 = vst [vmem:[#allocation122_spill] sm:$0xff] %v5827_v19  ;;  %v7706_v47 = vld [vmem:[#allocation102_spill] sm:$0xff] }
 0x317   :  { %v1355_v35 = vsel %vm7689_vm2, %v7688_v27, %v5548_v45  ;;  %2749 = vtanh.f32 %v1885_v42  ;;  %v1879_v30 = vmul.f32 0.5, %v5791_v26  ;;  %v2205_v60 = vsel %vm5714_vm6, %v5687_v3, 0.0  ;;  %v7695_v45 = vld [vmem:[#allocation94_spill] sm:$0xff]  ;;  %vm7699_vm3 = vmmov %vm7687_vm1 }
 0x318   :  { %vm5803_vm12 = vcmp.eq.s32.totalorder %v7690_v29, 1  ;;  %7694 = vst [vmem:[#allocation121_spill] sm:$0xff] %v5813_v57  ;;  %2751 = vtanh.f32 %v1886_v55  ;;  %v5820_v27 = vadd.f32 %v1263_v22, %v7695_v45  ;;  %v1229_v42 = vmul.f32 %v7684_v32, %v1184_v12  ;;  %v7697_v29 = vld [vmem:[#allocation73_spill] sm:$0xff]  ;;  %v7701_v55 = vld [vmem:[#allocation84_spill] sm:$0xff]  ;;  %v7702_v12 = vld [vmem:[#allocation95_spill] sm:$0xff] }
 0x319   :  { %v1360_v20 = vsel %vm7699_vm3, %v7698_v2, %v7697_v29  ;;  %v1880_v62 = vmul.f32 0.5, %v5808_v46  ;;  %v1407_v5 = vmul.f32 %v7664_v54, %v1355_v35  ;;  %v1408_v22 = vmul.f32 %v7664_v54, %v1349_v36  ;;  %v7703_v45 = vld [vmem:[#allocation161_spill] sm:$0xff]  ;;  %v5844_v19 = vpop.permute.xlu1 %1300  ;;  %v7711_v32 = vld [vmem:[#allocation99_spill] sm:$0xff] }
 0x31a   :  { %7696 = vst [vmem:[#allocation106_spill] sm:$0xff] %v5820_v27  ;;  %2753 = vtanh.f32 %v1879_v30  ;;  %vm7704_vm1 = vnez %v7703_v45  ;;  %v7705_v27 = vld [vmem:[#allocation15_spill] sm:$0xff]  ;;  %v7707_v35 = vld [vmem:[#allocation101_spill] sm:$0xff]  ;;  %vm7708_vm3 = vcmp.lt.s32.totalorder %v3749_v17, 112  ;;  %v7725_v45 = vld [vmem:[#allocation72_spill] sm:$0xff] }
 0x31b   :  { %v1260_v29 = vsel %vm7704_vm1, %v1228_v59, 0.0  ;;  %v1342_v57 = vsel %vm7689_vm2, %v7705_v27, %v7698_v2  ;;  %2755 = vtanh.f32 %v1880_v62  ;;  %v1523_v54 = vsel %vm7708_vm3, %v7707_v35, %v7706_v47  ;;  %v7709_v36 = vld [vmem:[#allocation33_spill] sm:$0xff]  ;;  %vm7710_vm14 = vmmov %vm7708_vm3  ;;  %v7713_v2 = vld [vmem:[#allocation163_spill] sm:$0xff] }
 0x31c   :  { %v1406_v30 = vmul.f32 %v7709_v36, %v1360_v20  ;;  %v1529_v59 = vsel %vm7710_vm14, %v5628_v4, %v7707_v35  ;;  %vm7712_vm1 = vmmov %vm7708_vm3  ;;  %vm7714_vm2 = vnez %v7713_v2  ;;  %v7716_v20 = vshra.s32 %v7520_v0, 8  ;;  %v2746_v0 = vpop.eup %2745 }
 0x31d   :  { %v1535_v27 = vsel %vm7712_vm1, %v7711_v32, %v5628_v4  ;;  %v1261_v62 = vsel %vm7714_vm2, %v1229_v42, 0.0  ;;  %vm7715_vm7 = vmmov %vm7712_vm1  ;;  %v7719_v35 = vsel %vm5587_vm13, %v5687_v3, 0.0  ;;  %v7720_v4 = vsel %vm5529_vm11, %v5597_v33, 0.0 }
 0x31e   :  { %v1541_v31 = vsel %vm7715_vm7, %v7706_v47, %v7711_v32  ;;  %vm5867_vm3 = vcmp.eq.s32.totalorder %v7716_v20, 1  ;;  %v5879_v42 = vadd.f32 %v7720_v4, %v7719_v35  ;;  %v7722_v47 = vsel %vm5535_vm9, %v5597_v33, 0.0  ;;  %v7723_v20 = vld [vmem:[#allocation82_spill] sm:$0xff]  ;;  %v2748_v4 = vpop.eup %2747  ;;  %v7729_v33 = vld [vmem:[#allocation165_spill] sm:$0xff] }
 0x31f   :  { %v5885_v32 = vadd.f32 %v7722_v47, %v2205_v60  ;;  %vm7724_vm7 = vnez %v7723_v20  ;;  %vm7726_vm14 = vnez %v7725_v45  ;;  %v1405_v3 = vmul.f32 %v7709_v36, %v1342_v57  ;;  %v5903_v45 = vpop.permute.xlu1 %1324 }
 0x320   :  { %7721 = vst [vmem:[#allocation124_spill] sm:$0xff] %v5879_v42  ;;  %v1439_v2 = vsel %vm7724_vm7, %v1407_v5, 0.0  ;;  %v1440_v8 = vsel %vm7726_vm14, %v1408_v22, 0.0  ;;  %v2210_v35 = vsel %vm5535_vm9, %v5626_v1, 0.0  ;;  %v5896_v42 = vadd.f32 %v1260_v29, %v7727_v39  ;;  %v5901_v5 = vpop.permute.xlu0 %1515 }
 0x321   :  { %v1582_v60 = vmul.f32 %v7729_v33, %v1523_v54  ;;  %v1580_v47 = vmul.f32 %v7729_v33, %v1535_v27  ;;  %v1581_v20 = vmul.f32 %v7729_v33, %v1529_v59  ;;  %v1583_v57 = vmul.f32 %v7729_v33, %v1541_v31  ;;  %v2750_v29 = vpop.eup %2749 }
 0x322   :  { %7728 = vst [vmem:[#allocation128_spill] sm:$0xff] %v5896_v42  ;;  %v1438_v22 = vsel %vm5056_vm0, %v1406_v30, 0.0  ;;  %v1935_v36 = vmul.f32 0.5, %v2746_v0  ;;  %v2209_v39 = vsel %vm5714_vm6, %v5635_v25, 0.0  ;;  %v5912_v54 = vadd.f32 %v1261_v62, %v5604_v49  ;;  %v2752_v33 = vpop.eup %2751  ;;  %v7732_v42 = vld [vmem:[#allocation40_spill] sm:$0xff] }
 0x323   :  { %v5915_v59 = vadd.f32 %v1439_v2, %v5607_v43  ;;  %v5918_v27 = vadd.f32 %v1440_v8, %v5610_v18  ;;  %v2234_v1 = vadd.f32 %v2210_v35, %v2209_v39  ;;  %v1437_v31 = vsel %vm5033_vm4, %v1405_v3, 0.0  ;;  %v5930_v2 = vpop.permute.xlu1 %1479 }
 0x324   :  { %v1933_v30 = vmul.f32 0.5, %v2750_v29  ;;  %v1936_v0 = vmul.f32 0.5, %v2748_v4  ;;  %v2211_v25 = vsel %vm5803_vm12, %v5640_v58, 0.0  ;;  %v1462_v49 = vadd.f32 %v1438_v22, %v7732_v42  ;;  %v2754_v62 = vpop.eup %2753  ;;  %v7737_v42 = vld [vmem:[#allocation98_spill] sm:$0xff] }
 0x325   :  { %7730 = vst [vmem:[#allocation49_spill] sm:$0xff] %v5915_v59  ;;  %7731 = vst [vmem:[#allocation152_spill] sm:$0xff] %v5918_v27  ;;  %vm7733_vm1 = vcmp.lt.s32.totalorder %v3878_v61, 15  ;;  %vm7734_vm0 = vcmp.lt.s32.totalorder %v7629_v34, 15  ;;  %v1934_v18 = vmul.f32 0.5, %v2752_v33  ;;  %vm7735_vm4 = vcmp.lt.s32.totalorder %v3854_v24, 15  ;;  %v2756_v29 = vpop.eup %2755  ;;  %v5937_v27 = vpop.permute.xlu0 %1668 }
 0x326   :  { %v1612_v43 = vsel %vm7733_vm1, %v1580_v47, 0.0  ;;  %v1613_v8 = vsel %vm7734_vm0, %v1581_v20, 0.0  ;;  %v1614_v3 = vsel %vm7735_vm4, %v1582_v60, 0.0  ;;  %vm7736_vm2 = vcmp.lt.s32.totalorder %v3888_v56, 15 }
 0x327   :  { %v1615_v35 = vsel %vm7736_vm2, %v1583_v57, 0.0  ;;  %v1957_v4 = vadd.f32 0.5, %v1933_v30  ;;  %v1959_v39 = vadd.f32 0.5, %v1935_v36  ;;  %v1461_v22 = vadd.f32 %v1437_v31, %v7737_v42  ;;  %v5949_v30 = vpop.permute.xlu1 %1503 }
 0x328   :  { %v1958_v58 = vadd.f32 0.5, %v1934_v18  ;;  %v1927_v47 = vmul.f32 0.5, %v2754_v62  ;;  %v2235_v20 = vadd.f32 %v2234_v1, %v2211_v25  ;;  %v1636_v33 = vadd.f32 %v1612_v43, %v5620_v11 }
 0x329   :  { %v5941_v59 = vadd.f32 %v1613_v8, %v5623_v51  ;;  %v5944_v60 = vmul.f32 %v1957_v4, %v5767_v16  ;;  %v1960_v24 = vadd.f32 0.5, %v1936_v0  ;;  %v1639_v31 = vadd.f32 %v1615_v35, %v1462_v49  ;;  %v1691_v8 = vpop.permute.xlu0 %1690 }
 0x32a   :  { %v5947_v57 = vmul.f32 %v1958_v58, %v5774_v21  ;;  %v1951_v36 = vadd.f32 0.5, %v1927_v47  ;;  %v1928_v18 = vmul.f32 0.5, %v2756_v29  ;;  %vm7740_vm4 = vcmp.lt.s32.totalorder %v3749_v17, 127  ;;  %v7743_v58 = vld [vmem:[#allocation110_spill] sm:$0xff]  ;;  %v7750_v29 = vld [vmem:[#allocation105_spill] sm:$0xff] }
 0x32b   :  { %7738 = vst [vmem:[#allocation155_spill] sm:$0xff] %v5944_v60  ;;  %v1167_v11 = vsel %vm7740_vm4, %v7645_v7, %v5810_v38  ;;  %vm7741_vm0 = vmmov %vm7740_vm4  ;;  %v5960_v1 = vmul.f32 %v1959_v39, %v5738_v37  ;;  %v2212_v25 = vsel %vm5867_vm3, %v5693_v13, 0.0  ;;  %vm7744_vm2 = vcmp.lt.s32.totalorder %v3749_v17, 113 }
 0x32c   :  { %7739 = vst [vmem:[#allocation22_spill] sm:$0xff] %v5947_v57  ;;  %v1185_v51 = vsel %vm7741_vm0, %v5810_v38, %v7647_v15  ;;  %v1356_v16 = vsel %vm7744_vm2, %v5844_v19, %v7743_v58  ;;  %vm7745_vm1 = vmmov %vm7744_vm2  ;;  %v1638_v21 = vadd.f32 %v1614_v3, %v1461_v22  ;;  %v5973_v0 = vadd.f32 %v2235_v20, %v2212_v25 }
 0x32d   :  { %7742 = vst [vmem:[#allocation135_spill] sm:$0xff] %v5960_v1  ;;  %v1362_v7 = vsel %vm7745_vm1, %v5764_v23, %v5844_v19  ;;  %v5976_v15 = vmul.f32 %v1951_v36, %v5791_v26  ;;  %v5979_v37 = vmul.f32 %v1960_v24, %v5741_v63  ;;  %v2021_v38 = vsel %vm5587_vm13, %v5944_v60, 0.0  ;;  %v1655_v26 = vpop.permute.xlu1 %1654  ;;  %v7747_v24 = vld [vmem:[#allocation41_spill] sm:$0xff]  ;;  %vm7751_vm2 = vmmov %vm7745_vm1 }
 0x32e   :  { %v2022_v49 = vsel %vm5529_vm11, %v5947_v57, 0.0  ;;  %v5988_v43 = vmul.f32 %v7656_v6, %v1167_v11  ;;  %v5991_v19 = vmul.f32 %v7656_v6, %v1185_v51  ;;  %v1952_v3 = vadd.f32 0.5, %v1928_v18 }
 0x32f   :  { %7746 = vst [vmem:[#allocation153_spill] sm:$0xff] %v5979_v37  ;;  %v2047_v62 = vadd.f32 %v2022_v49, %v2021_v38  ;;  %v5994_v63 = vmul.f32 %v7747_v24, %v1356_v16  ;;  %vm7748_vm4 = vcmp.lt.s32.totalorder %v3749_v17, 111  ;;  %v2023_v39 = vsel %vm5573_vm10, %v5960_v1, 0.0 }
 0x330   :  { %v1712_v35 = vsel %vm7748_vm4, %v1655_v26, %v5601_v50  ;;  %vm7749_vm0 = vmmov %vm7748_vm4  ;;  %v6005_v6 = vmul.f32 %v7747_v24, %v1362_v7  ;;  %v1350_v20 = vsel %vm7751_vm2, %v7743_v58, %v5903_v45  ;;  %v2024_v36 = vsel %vm5615_vm15, %v5979_v37, 0.0 }
 0x331   :  { %v1718_v4 = vsel %vm7749_vm0, %v1691_v8, %v1655_v26  ;;  %v1761_v42 = vmul.f32 %v7750_v29, %v1712_v35  ;;  %v2048_v47 = vadd.f32 %v2047_v62, %v2023_v39  ;;  %v6017_v18 = vmul.f32 %v1952_v3, %v5808_v46  ;;  %v1679_v7 = vpop.permute.xlu1 %1678  ;;  %vm7752_vm1 = vmmov %vm7749_vm0  ;;  %v7754_v35 = vld [vmem:[#allocation124_spill] sm:$0xff] }
 0x332   :  { %v1764_v22 = vmul.f32 %v7750_v29, %v1718_v4  ;;  %v2015_v11 = vsel %vm5573_vm10, %v5976_v15, 0.0  ;;  %v2207_v58 = vsel %vm5803_vm12, %v5976_v15, 0.0  ;;  %v1700_v46 = vsel %vm7752_vm1, %v1679_v7, %v1691_v8  ;;  %vm7753_vm4 = vmmov %vm7749_vm0 }
 0x333   :  { %v1793_v51 = vsel %vm7670_vm8, %v1761_v42, 0.0  ;;  %v2049_v16 = vadd.f32 %v2048_v47, %v2024_v36  ;;  %v1706_v26 = vsel %vm7753_vm4, %v5601_v50, %v1679_v7  ;;  %v1763_v3 = vmul.f32 %v7750_v29, %v1700_v46  ;;  %v6052_v42 = vpop.permute.xlu0 %1517  ;;  %v7758_v36 = vld [vmem:[#allocation38_spill] sm:$0xff] }
 0x334   :  { %v1796_v25 = vsel %vm5374_vm5, %v1764_v22, 0.0  ;;  %v1817_v38 = vadd.f32 %v1793_v51, %v1636_v33  ;;  %v1762_v62 = vmul.f32 %v7750_v29, %v1706_v26  ;;  %v2038_v4 = vadd.f32 %v7754_v35, %v2015_v11  ;;  %v7755_v33 = vld [vmem:[#allocation96_spill] sm:$0xff]  ;;  %v7756_v22 = vld [vmem:[#allocation145_spill] sm:$0xff] }
 0x335   :  { %v1820_v49 = vadd.f32 %v1796_v25, %v1639_v31  ;;  %2050 = vadd.xlane.f32.xlu1 %v2049_v16  ;;  %v2213_v39 = vsel %vm5714_vm6, %v5944_v60, 0.0  ;;  %v2016_v50 = vsel %vm5615_vm15, %v6017_v18, 0.0  ;;  %v2214_v29 = vsel %vm5535_vm9, %v5947_v57, 0.0  ;;  %v6058_v25 = vpop.permute.xlu1 %1846  ;;  %v7795_v60 = vld [vmem:[#allocation152_spill] sm:$0xff] }
 0x336   :  { %v6041_v31 = vadd.f32 %v7755_v33, %v1817_v38  ;;  %vm7757_vm0 = vnez %v7756_v22  ;;  %vm7759_vm2 = vnez %v7758_v36  ;;  %v2039_v51 = vadd.f32 %v2038_v4, %v2016_v50 }
 0x337   :  { %v6044_v8 = vadd.f32 %v7755_v33, %v1820_v49  ;;  %v1794_v47 = vsel %vm7757_vm0, %v1762_v62, 0.0  ;;  %v1795_v11 = vsel %vm7759_vm2, %v1763_v3, 0.0  ;;  %v2230_v16 = vadd.f32 %v5885_v32, %v2207_v58  ;;  %v7761_v3 = vld [vmem:[#allocation158_spill] sm:$0xff] }
 0x338   :  { %v1889_v7 = vmul.f32 0.5, %v6041_v31  ;;  %v1818_v49 = vadd.f32 %v1794_v47, %v5941_v59  ;;  %v1819_v46 = vadd.f32 %v1795_v11, %v1638_v21  ;;  %vm7760_vm1 = vcmp.lt.s32.totalorder %v3749_v17, 113  ;;  %2040 = vadd.xlane.f32.xlu0 %v2039_v51  ;;  %v7766_v47 = vld [vmem:[#allocation122_spill] sm:$0xff] }
 0x339   :  { %v1892_v38 = vmul.f32 0.5, %v6044_v8  ;;  %v1344_v26 = vsel %vm7760_vm1, %v5903_v45, %v5764_v23  ;;  %v1412_v62 = vmul.f32 %v7747_v24, %v1350_v20  ;;  %vm7762_vm4 = vcmp.lt.s32.totalorder %v3749_v17, 112 }
 0x33a   :  { %v1536_v35 = vsel %vm7762_vm4, %v5930_v2, %v7761_v3  ;;  %vm7763_vm15 = vmmov %vm7762_vm4  ;;  %2757 = vtanh.f32 %v1889_v7  ;;  %v6078_v59 = vadd.f32 %v7755_v33, %v1818_v49  ;;  %v6081_v21 = vadd.f32 %v7755_v33, %v1819_v46 }
 0x33b   :  { %v1542_v32 = vsel %vm7763_vm15, %v5901_v5, %v5930_v2  ;;  %v2208_v23 = vsel %vm5867_vm3, %v6017_v18, 0.0  ;;  %vm7764_vm1 = vmmov %vm7762_vm4  ;;  %2759 = vtanh.f32 %v1892_v38  ;;  %v1482_v2 = vpop.permute.xlu1 %1481  ;;  %v2239_v58 = vadd.f32 %v2214_v29, %v2213_v39  ;;  %v6105_v39 = vpop.permute.xlu0 %1670  ;;  %v7769_v29 = vld [vmem:[#allocation68_spill] sm:$0xff] }
 0x33c   :  { %v1530_v45 = vsel %vm7764_vm1, %v7761_v3, %v5949_v30  ;;  %v2231_v20 = vadd.f32 %v2230_v16, %v2208_v23  ;;  %vm7765_vm15 = vmmov %vm7764_vm1  ;;  %v1890_v33 = vmul.f32 0.5, %v6078_v59  ;;  %v1891_v50 = vmul.f32 0.5, %v6081_v21 }
 0x33d   :  { %v1524_v4 = vsel %vm7765_vm15, %v5949_v30, %v5901_v5  ;;  %vm7767_vm4 = vmmov %vm7764_vm1  ;;  %v1443_v7 = vsel %vm7724_vm7, %v5994_v63, 0.0  ;;  %v6103_v16 = vmul.f32 %v7747_v24, %v1344_v26  ;;  %v1584_v38 = vmul.f32 %v7769_v29, %v1536_v35  ;;  %v7771_v26 = vld [vmem:[#allocation136_spill] sm:$0xff] }
 0x33e   :  { %v1537_v11 = vsel %vm7767_vm4, %v1482_v2, %v7766_v47  ;;  %v1587_v5 = vmul.f32 %v7769_v29, %v1542_v32  ;;  %2232 = vadd.xlane.f32.xlu0 %v2231_v20  ;;  %v1444_v49 = vsel %vm7726_vm14, %v1412_v62, 0.0  ;;  %v1585_v46 = vmul.f32 %v7769_v29, %v1530_v45  ;;  %v7772_v32 = vld [vmem:[#allocation161_spill] sm:$0xff]  ;;  %v7774_v62 = vld [vmem:[#allocation163_spill] sm:$0xff] }
 0x33f   :  { %2761 = vtanh.f32 %v1890_v33  ;;  %v2215_v63 = vsel %vm5803_vm12, %v5960_v1, 0.0  ;;  %v1586_v24 = vmul.f32 %v7769_v29, %v1524_v4  ;;  %v1588_v3 = vmul.f32 %v7771_v26, %v1537_v11  ;;  %v1506_v23 = vpop.permute.xlu1 %1505  ;;  %v7777_v33 = vld [vmem:[#allocation20_spill] sm:$0xff] }
 0x340   :  { %2763 = vtanh.f32 %v1891_v50  ;;  %v2240_v35 = vadd.f32 %v2239_v58, %v2215_v63  ;;  %vm7776_vm1 = vnez %v7702_v12  ;;  %v7779_v4 = vld [vmem:[#allocation128_spill] sm:$0xff]  ;;  %vm7780_vm15 = vnez %v7701_v55  ;;  %v7783_v63 = vld [vmem:[#allocation121_spill] sm:$0xff] }
 0x341   :  { %v7778_v51 = vsel %vm7776_vm1, %v7777_v33, 0.0  ;;  %v7781_v50 = vld [vmem:[#allocation100_spill] sm:$0xff]  ;;  %v1467_v20 = vadd.f32 %v1443_v7, %v7783_v63  ;;  %vm7784_vm4 = vcmp.lt.s32.totalorder %v3878_v61, 15  ;;  %vm7785_vm14 = vcmp.lt.s32.totalorder %v3888_v56, 15  ;;  %v7786_v33 = vld [vmem:[#allocation106_spill] sm:$0xff] }
 0x342   :  { %v1466_v30 = vadd.f32 %v7778_v51, %v5912_v54  ;;  %v7782_v11 = vsel %vm7780_vm15, %v7781_v50, 0.0  ;;  %v1616_v45 = vsel %vm7784_vm4, %v1584_v38, 0.0  ;;  %v1619_v57 = vsel %vm7785_vm14, %v1587_v5, 0.0  ;;  %2237 = vadd.xlane.f32.xlu0 %v5973_v0  ;;  %v1693_v38 = vpop.permute.xlu0 %1692  ;;  %v7788_v50 = vld [vmem:[#allocation143_spill] sm:$0xff]  ;;  %v7792_v54 = vld [vmem:[#allocation49_spill] sm:$0xff] }
 0x343   :  { %v1465_v58 = vadd.f32 %v7782_v11, %v7779_v4  ;;  %v6146_v51 = vadd.f32 %v1444_v49, %v7786_v33  ;;  %vm7787_vm7 = vcmp.lt.s32.totalorder %v7629_v34, 15  ;;  %v2216_v7 = vsel %vm5867_vm3, %v5979_v37, 0.0  ;;  %v1657_v63 = vpop.permute.xlu1 %1656 }
 0x344   :  { %v1617_v4 = vsel %vm7787_vm7, %v1585_v46, 0.0  ;;  %vm7789_vm4 = vcmp.lt.s32.totalorder %v7788_v50, 15  ;;  %vm7790_vm14 = vcmp.lt.s32.totalorder %v3749_v17, 112  ;;  %vm7791_vm15 = vcmp.lt.s32.totalorder %v3878_v61, 15  ;;  %v2758_v33 = vpop.eup %2757  ;;  %v7796_v61 = vld [vmem:[#allocation83_spill] sm:$0xff] }
 0x345   :  { %v1618_v5 = vsel %vm7789_vm4, %v1586_v24, 0.0  ;;  %v1543_v0 = vsel %vm7790_vm14, %v6052_v42, %v1482_v2  ;;  %v1620_v11 = vsel %vm7791_vm15, %v1588_v3, 0.0  ;;  %v2241_v49 = vadd.f32 %v2240_v35, %v2216_v7  ;;  %v2760_v1 = vpop.eup %2759  ;;  %vm7797_vm15 = vmmov %vm7790_vm14 }
 0x346   :  { %v1640_v46 = vadd.f32 %v1616_v45, %v7792_v54  ;;  %v1643_v29 = vadd.f32 %v1619_v57, %v1466_v30  ;;  %vm7793_vm7 = vcmp.lt.s32.totalorder %v3749_v17, 111  ;;  %v1641_v13 = vadd.f32 %v1617_v4, %v7795_v60 }
 0x347   :  { %v1713_v37 = vsel %vm7793_vm7, %v1657_v63, %v5937_v27  ;;  %vm7794_vm1 = vmmov %vm7793_vm7  ;;  %v1937_v2 = vmul.f32 0.5, %v2758_v33  ;;  %2242 = vadd.xlane.f32.xlu0 %v2241_v49  ;;  %v1642_v7 = vadd.f32 %v1618_v5, %v1465_v58  ;;  %v6170_v45 = vmul.f32 %v7771_v26, %v1543_v0  ;;  %v1681_v4 = vpop.permute.xlu1 %1680 }
 0x348   :  { %v1719_v24 = vsel %vm7794_vm1, %v1693_v38, %v1657_v63  ;;  %v1765_v3 = vmul.f32 %v7796_v61, %v1713_v37  ;;  %v1644_v57 = vadd.f32 %v1620_v11, %v1467_v20  ;;  %v1525_v30 = vsel %vm7797_vm15, %v1506_v23, %v6052_v42  ;;  %vm7798_vm4 = vmmov %vm7794_vm1 }
 0x349   :  { %v1768_v35 = vmul.f32 %v7796_v61, %v1719_v24  ;;  %v1961_v54 = vadd.f32 0.5, %v1937_v2  ;;  %v1940_v37 = vmul.f32 0.5, %v2760_v1  ;;  %v2762_v49 = vpop.eup %2761  ;;  %v1701_v5 = vsel %vm7794_vm1, %v1681_v4, %v1693_v38  ;;  %vm7799_vm7 = vmmov %vm7794_vm1 }
 0x34a   :  { %v1797_v63 = vsel %vm7670_vm8, %v1765_v3, 0.0  ;;  %v1707_v20 = vsel %vm7798_vm4, %v5937_v27, %v1681_v4  ;;  %v2764_v42 = vpop.eup %2763  ;;  %v1938_v0 = vmul.f32 0.5, %v2762_v49  ;;  %v1531_v11 = vsel %vm7790_vm14, %v7766_v47, %v1506_v23 }
 0x34b   :  { %v1800_v60 = vsel %vm5374_vm5, %v1768_v35, 0.0  ;;  %v1821_v33 = vadd.f32 %v1797_v63, %v1640_v46  ;;  %v1766_v24 = vmul.f32 %v7796_v61, %v1707_v20  ;;  %v1767_v1 = vmul.f32 %v7796_v61, %v1701_v5  ;;  %v6202_v23 = vpop.permute.xlu1 %1850 }
 0x34c   :  { %v1824_v58 = vadd.f32 %v1800_v60, %v1643_v29  ;;  %v6190_v46 = vmul.f32 %v1961_v54, %v6041_v31  ;;  %v1939_v29 = vmul.f32 0.5, %v2764_v42  ;;  %v1962_v27 = vadd.f32 0.5, %v1938_v0  ;;  %v7800_v0 = vld [vmem:[#allocation120_spill] sm:$0xff] }
 0x34d   :  { %v6193_v38 = vadd.f32 %v6058_v25, %v1821_v33  ;;  %v1798_v3 = vsel %vm7757_vm0, %v1766_v24, 0.0  ;;  %v1799_v47 = vsel %vm7759_vm2, %v1767_v1, 0.0  ;;  %v1964_v61 = vadd.f32 0.5, %v1940_v37 }
 0x34e   :  { %v6196_v2 = vadd.f32 %v6058_v25, %v1824_v58  ;;  %v1963_v35 = vadd.f32 0.5, %v1939_v29  ;;  %v1822_v63 = vadd.f32 %v1798_v3, %v1641_v13  ;;  %v6207_v60 = vmul.f32 %v1962_v27, %v6078_v59 }
 0x34f   :  { %v1893_v31 = vmul.f32 0.5, %v6193_v38  ;;  %v1589_v4 = vmul.f32 %v7771_v26, %v1531_v11  ;;  %v1590_v49 = vmul.f32 %v7771_v26, %v1525_v30  ;;  %v1823_v33 = vadd.f32 %v1799_v47, %v1642_v7  ;;  %v1659_v59 = vpop.permute.xlu1 %1658 }
 0x350   :  { %v1896_v54 = vmul.f32 0.5, %v6196_v2  ;;  %v6212_v58 = vmul.f32 %v1963_v35, %v6081_v21  ;;  %v6215_v37 = vadd.f32 %v6058_v25, %v1822_v63  ;;  %v2217_v5 = vsel %vm5714_vm6, %v6190_v46, 0.0 }
 0x351   :  { %2765 = vtanh.f32 %v1893_v31  ;;  %v6221_v13 = vadd.f32 %v6058_v25, %v1823_v33  ;;  %v6224_v20 = vmul.f32 %v1964_v61, %v6044_v8  ;;  %v2218_v21 = vsel %vm5535_vm9, %v6207_v60, 0.0 }
 0x352   :  { %2767 = vtanh.f32 %v1896_v54  ;;  %v1894_v26 = vmul.f32 0.5, %v6215_v37  ;;  %v1714_v7 = vsel %vm7799_vm7, %v1659_v59, %v6105_v39  ;;  %v2244_v30 = vadd.f32 %v2218_v21, %v2217_v5  ;;  %v7805_v5 = vld [vmem:[#allocation44_spill] sm:$0xff] }
 0x353   :  { %v2025_v25 = vsel %vm5587_vm13, %v6190_v46, 0.0  ;;  %v1895_v42 = vmul.f32 0.5, %v6221_v13  ;;  %v1769_v8 = vmul.f32 %v7800_v0, %v1714_v7  ;;  %v2219_v11 = vsel %vm5803_vm12, %v6212_v58, 0.0  ;;  %v1683_v47 = vpop.permute.xlu1 %1682 }
 0x354   :  { %v2026_v24 = vsel %vm5529_vm11, %v6207_v60, 0.0  ;;  %vm7801_vm15 = vcmp.lt.s32.totalorder %v7629_v34, 15  ;;  %2769 = vtanh.f32 %v1894_v26  ;;  %v2245_v29 = vadd.f32 %v2244_v30, %v2219_v11 }
 0x355   :  { %v1621_v1 = vsel %vm7801_vm15, %v1589_v4, 0.0  ;;  %v2052_v27 = vadd.f32 %v2026_v24, %v2025_v25  ;;  %2771 = vtanh.f32 %v1895_v42  ;;  %v1801_v3 = vsel %vm7670_vm8, %v1769_v8, 0.0  ;;  %v7802_v4 = vld [vmem:[#allocation118_spill] sm:$0xff] }
 0x356   :  { %v2220_v61 = vsel %vm5867_vm3, %v6224_v20, 0.0  ;;  %v2027_v35 = vsel %vm5573_vm10, %v6212_v58, 0.0  ;;  %v1825_v31 = vadd.f32 %v1801_v3, %v1644_v57  ;;  %v1708_v34 = vsel %vm7794_vm1, %v6105_v39, %v1683_v47 }
 0x357   :  { %v2246_v54 = vadd.f32 %v2245_v29, %v2220_v61  ;;  %v2053_v63 = vadd.f32 %v2052_v27, %v2027_v35  ;;  %vm7803_vm4 = vnez %v7772_v32  ;;  %vm7806_vm8 = vnez %v7774_v62 }
 0x358   :  { %v7804_v40 = vsel %vm7803_vm4, %v5988_v43, 0.0  ;;  %v7807_v21 = vsel %vm7806_vm8, %v5991_v19, 0.0  ;;  %v1770_v57 = vmul.f32 %v7800_v0, %v1708_v34  ;;  %vm7808_vm14 = vnez %v7636_v48 }
 0x359   :  { %v1288_v33 = vadd.f32 %v7804_v40, %v7802_v4  ;;  %v1289_v26 = vadd.f32 %v7807_v21, %v7805_v5  ;;  %v2028_v39 = vsel %vm7808_vm14, %v6224_v20, 0.0  ;;  %vm7809_vm7 = vcmp.lt.s32.totalorder %v3888_v56, 15  ;;  %2247 = vadd.xlane.f32.xlu0 %v2246_v54 }
 0x35a   :  { %v1623_v7 = vsel %vm7809_vm7, %v6170_v45, 0.0  ;;  %v1645_v32 = vadd.f32 %v1621_v1, %v6146_v51  ;;  %v6276_v43 = vadd.f32 %v6202_v23, %v1825_v31  ;;  %v2054_v62 = vadd.f32 %v2053_v63, %v2028_v39  ;;  %v1695_v45 = vpop.permute.xlu1 %1694 }
 0x35b   :  { %vm7810_vm15 = vnez %v7702_v12  ;;  %vm7812_vm1 = vnez %v7701_v55  ;;  %vm7814_vm4 = vcmp.lt.s32.totalorder %v7788_v50, 15  ;;  %v1802_v51 = vsel %vm7757_vm0, %v1770_v57, 0.0  ;;  %v2766_v8 = vpop.eup %2765 }
 0x35c   :  { %v7811_v19 = vsel %vm7810_vm15, %v6005_v6, 0.0  ;;  %v7813_v25 = vsel %vm7812_vm1, %v6103_v16, 0.0  ;;  %v1622_v56 = vsel %vm7814_vm4, %v1590_v49, 0.0  ;;  %v1897_v11 = vmul.f32 0.5, %v6276_v43  ;;  %2055 = vadd.xlane.f32.xlu1 %v2054_v62  ;;  %v2768_v6 = vpop.eup %2767 }
 0x35d   :  { %v1470_v30 = vadd.f32 %v7811_v19, %v1289_v26  ;;  %v1469_v42 = vadd.f32 %v7813_v25, %v1288_v33  ;;  %v1826_v24 = vadd.f32 %v1802_v51, %v1645_v32  ;;  %vm7815_vm8 = vcmp.lt.s32.totalorder %v3749_v17, 111 }
 0x35e   :  { %v1702_v12 = vsel %vm7815_vm8, %v1683_v47, %v1695_v45  ;;  %vm7816_vm7 = vmmov %vm7815_vm8  ;;  %v1941_v1 = vmul.f32 0.5, %v2766_v8  ;;  %2773 = vtanh.f32 %v1897_v11  ;;  %v1944_v27 = vmul.f32 0.5, %v2768_v6 }
 0x35f   :  { %v1720_v55 = vsel %vm7816_vm7, %v1695_v45, %v1659_v59  ;;  %v1647_v16 = vadd.f32 %v1623_v7, %v1470_v30  ;;  %v1771_v50 = vmul.f32 %v7800_v0, %v1702_v12  ;;  %v1646_v49 = vadd.f32 %v1622_v56, %v1469_v42  ;;  %v2770_v59 = vpop.eup %2769 }
 0x360   :  { %v1772_v22 = vmul.f32 %v7800_v0, %v1720_v55  ;;  %v1874_v29 = vadd.f32 %v6202_v23, %v1826_v24  ;;  %v1965_v3 = vadd.f32 0.5, %v1941_v1  ;;  %v2772_v34 = vpop.eup %2771  ;;  %v1942_v0 = vmul.f32 0.5, %v2770_v59 }
 0x361   :  { %v1803_v61 = vsel %vm7759_vm2, %v1771_v50, 0.0  ;;  %v1968_v63 = vadd.f32 0.5, %v1944_v27  ;;  %v1943_v4 = vmul.f32 0.5, %v2772_v34 }
 0x362   :  { %v1804_v17 = vsel %vm5374_vm5, %v1772_v22, 0.0  ;;  %v1898_v47 = vmul.f32 0.5, %v1874_v29  ;;  %v1827_v35 = vadd.f32 %v1803_v61, %v1646_v49  ;;  %v6303_v54 = vmul.f32 %v1965_v3, %v6193_v38 }
 0x363   :  { %v1828_v31 = vadd.f32 %v1804_v17, %v1647_v16  ;;  %v1966_v33 = vadd.f32 0.5, %v1942_v0  ;;  %v1967_v5 = vadd.f32 0.5, %v1943_v4  ;;  %v6314_v38 = vmul.f32 %v1968_v63, %v6196_v2 }
 0x364   :  { %2775 = vtanh.f32 %v1898_v47  ;;  %v1875_v40 = vadd.f32 %v6202_v23, %v1827_v35  ;;  %v2221_v39 = vsel %vm5714_vm6, %v6303_v54, 0.0  ;;  %vm2079_vm5 = vcmask 179360  }
 0x365   :  { %v1876_v36 = vadd.f32 %v6202_v23, %v1828_v31  ;;  %v6308_v26 = vmul.f32 %v1966_v33, %v6215_v37  ;;  %v6311_v57 = vmul.f32 %v1967_v5, %v6221_v13  ;;  %v2029_v37 = vsel %vm5587_vm13, %v6303_v54, 0.0  ;;  %v6376_v33 = vld [vmem:[%s6569_s1] sm:$0xff] }
 0x366   :  { %v1899_v10 = vmul.f32 0.5, %v1875_v40  ;;  %v2224_v56 = vsel %vm5867_vm3, %v6314_v38, 0.0  ;;  %v2032_v51 = vsel %vm7808_vm14, %v6314_v38, 0.0 }
 0x367   :  { %v1900_v21 = vmul.f32 0.5, %v1876_v36  ;;  %v2222_v23 = vsel %vm5535_vm9, %v6308_v26, 0.0  ;;  %v2030_v13 = vsel %vm5529_vm11, %v6308_v26, 0.0  ;;  %v2223_v19 = vsel %vm5803_vm12, %v6311_v57, 0.0 }
 0x368   :  { %2777 = vtanh.f32 %v1899_v10  ;;  %v2774_v7 = vpop.eup %2773  ;;  %v2249_v2 = vadd.f32 %v2222_v23, %v2221_v39  ;;  %v2057_v32 = vadd.f32 %v2030_v13, %v2029_v37  ;;  %v2031_v30 = vsel %vm5573_vm10, %v6311_v57, 0.0 }
 0x369   :  { %2779 = vtanh.f32 %v1900_v21  ;;  %v1945_v62 = vmul.f32 0.5, %v2774_v7 }
 0x36a   :  { %v2250_v25 = vadd.f32 %v2249_v2, %v2223_v19  ;;  %v2058_v42 = vadd.f32 %v2057_v32, %v2031_v30  ;;  %v6384_v30 = vld [vmem:[%s6569_s1 + $0x8] sm:$0xff] }
 0x36b   :  { %v1969_v24 = vadd.f32 0.5, %v1945_v62 }
 0x36c   :  { %v2251_v8 = vadd.f32 %v2250_v25, %v2224_v56  ;;  %v2059_v11 = vadd.f32 %v2058_v42, %v2032_v51 }
 0x36d   :  { %v6341_v1 = vmul.f32 %v1969_v24, %v6276_v43 }
 0x36e   :  { %v2776_v45 = vpop.eup %2775  ;;  %2252 = vadd.xlane.f32.xlu0 %v2251_v8  ;;  %2060 = vadd.xlane.f32.xlu1 %v2059_v11 }
 0x36f   :  { %v1946_v12 = vmul.f32 0.5, %v2776_v45  ;;  %v2225_v43 = vsel %vm5714_vm6, %v6341_v1, 0.0 }
 0x371   :  { %v1970_v55 = vadd.f32 0.5, %v1946_v12 }
 0x372   :  { %v2778_v6 = vpop.eup %2777 }
 0x373   :  { %v2780_v16 = vpop.eup %2779  ;;  %v6343_v50 = vmul.f32 %v1970_v55, %v1874_v29  ;;  %v1947_v22 = vmul.f32 0.5, %v2778_v6  ;;  %v2033_v29 = vsel %vm5587_vm13, %v6341_v1, 0.0  ;;  %v6393_v55 = vld [vmem:[%s6569_s1 + $0x10] sm:$0xff] }
 0x374   :  { %v1948_v49 = vmul.f32 0.5, %v2780_v16 }
 0x375   :  { %v1971_v27 = vadd.f32 0.5, %v1947_v22  ;;  %v2226_v3 = vsel %vm5535_vm9, %v6343_v50, 0.0  ;;  %v2034_v61 = vsel %vm5529_vm11, %v6343_v50, 0.0  ;;  %vm2144_vm11 = vcmask 15360  }
 0x376   :  { %v1972_v17 = vadd.f32 0.5, %v1948_v49  ;;  %v2254_v35 = vadd.f32 %v2226_v3, %v2225_v43  ;;  %v2062_v31 = vadd.f32 %v2034_v61, %v2033_v29  ;;  %v6402_v61 = vld [vmem:[%s6569_s1 + $0x18] sm:$0xff] }
 0x377   :  { %v6351_v59 = vmul.f32 %v1971_v27, %v1875_v40 }
 0x378   :  { %v6359_v47 = vmul.f32 %v1972_v17, %v1876_v36 }
 0x379   :  { %v2227_v41 = vsel %vm5803_vm12, %v6351_v59, 0.0  ;;  %v2035_v34 = vsel %vm5573_vm10, %v6351_v59, 0.0 }
 0x37a   :  { %v2255_v0 = vadd.f32 %v2254_v35, %v2227_v41  ;;  %v2063_v63 = vadd.f32 %v2062_v31, %v2035_v34  ;;  %v2228_v4 = vsel %vm5867_vm3, %v6359_v47, 0.0  ;;  %v2036_v14 = vsel %vm7808_vm14, %v6359_v47, 0.0  ;;  %v6411_v41 = vld [vmem:[%s6569_s1 + $0x20] sm:$0xff] }
 0x37c   :  { %v2256_v40 = vadd.f32 %v2255_v0, %v2228_v4  ;;  %v2064_v36 = vadd.f32 %v2063_v63, %v2036_v14 }
 0x37e   :  { %2257 = vadd.xlane.f32.xlu0 %v2256_v40  ;;  %2065 = vadd.xlane.f32.xlu1 %v2064_v36 }
 0x38f   :  { %2097 = vrot.lane.b32.xlu1 %v6376_v33, %s2870_s10 }
 0x39a   :  { %v2046_v21 = vpop.xlane.xlu1 %2045 }
 0x39b   :  { %v2068_v37 = vmul.f32 0.00390625, %v2046_v21 }
 0x39d   :  { %v2074_v25 = vmul.f32 %v6384_v30, %v2068_v37 }
 0x39f   :  { %v2081_v49 = vsel %vm2079_vm5, %v2074_v25, 0.0 }
 0x3c2   :  { %v2051_v39 = vpop.xlane.xlu1 %2050 }
 0x3c3   :  { %v2069_v51 = vmul.f32 0.00390625, %v2051_v39 }
 0x3c5   :  { %v2041_v28 = vpop.xlane.xlu0 %2040  ;;  %v2075_v27 = vmul.f32 %v6393_v55, %v2069_v51 }
 0x3c6   :  { %v2067_v23 = vmul.f32 0.00390625, %v2041_v28 }
 0x3c7   :  { %v2083_v4 = vsel %vm2079_vm5, %v2075_v27, 0.0 }
 0x3c8   :  { %v2073_v32 = vmul.f32 %v6376_v33, %v2067_v23 }
 0x3ca   :  { %v2080_v24 = vsel %vm2079_vm5, %v2073_v32, 0.0 }
 0x3cb   :  { %v2233_v5 = vpop.xlane.xlu0 %2232  ;;  %v2082_v29 = vadd.f32 %v2081_v49, %v2080_v24 }
 0x3cc   :  { %v2259_v62 = vmul.f32 0.00390625, %v2233_v5 }
 0x3cd   :  { %v2084_v28 = vadd.f32 %v2083_v4, %v2082_v29 }
 0x3ce   :  { %v2265_v12 = vmul.f32 %v6376_v33, %v2259_v62 }
 0x3cf   :  { %v2238_v10 = vpop.xlane.xlu0 %2237 }
 0x3d0   :  { %v2260_v2 = vmul.f32 0.00390625, %v2238_v10  ;;  %v2271_v35 = vsel %vm2079_vm5, %v2265_v12, 0.0 }
 0x3d2   :  { %v2266_v45 = vmul.f32 %v6384_v30, %v2260_v2 }
 0x3d4   :  { %v2243_v48 = vpop.xlane.xlu0 %2242  ;;  %v2272_v3 = vsel %vm2079_vm5, %v2266_v45, 0.0 }
 0x3d5   :  { %v2261_v19 = vmul.f32 0.00390625, %v2243_v48  ;;  %v2273_v63 = vadd.f32 %v2272_v3, %v2271_v35 }
 0x3d7   :  { %v2267_v6 = vmul.f32 %v6393_v55, %v2261_v19 }
 0x3d9   :  { %v2274_v31 = vsel %vm2079_vm5, %v2267_v6, 0.0 }
 0x3da   :  { %v2275_v36 = vadd.f32 %v2274_v31, %v2273_v63 }
 0x3e6   :  { %v2248_v13 = vpop.xlane.xlu0 %2247 }
 0x3e7   :  { %v2262_v8 = vmul.f32 0.00390625, %v2248_v13 }
 0x3e9   :  { %v2056_v7 = vpop.xlane.xlu1 %2055  ;;  %v2268_v17 = vmul.f32 %v6402_v61, %v2262_v8 }
 0x3ea   :  { %v2070_v11 = vmul.f32 0.00390625, %v2056_v7  ;;  %v6423_v7 = vld [vmem:[%s6569_s1 + $0x28] sm:$0xff]  ;;  %s2871_s1 = smov 110  }
 0x3eb   :  { %v2276_v14 = vsel %vm2079_vm5, %v2268_v17, 0.0 }
 0x3ec   :  { %v2076_v43 = vmul.f32 %v6402_v61, %v2070_v11  ;;  %v2277_v37 = vadd.f32 %v2276_v14, %v2275_v36 }
 0x3ee   :  { %v2085_v40 = vsel %vm2079_vm5, %v2076_v43, 0.0 }
 0x3ef   :  { %v2086_v13 = vadd.f32 %v2085_v40, %v2084_v28 }
 0x3fb   :  { %v2253_v42 = vpop.xlane.xlu0 %2252  ;;  %v2061_v56 = vpop.xlane.xlu1 %2060 }
 0x3fc   :  { %v2263_v16 = vmul.f32 0.00390625, %v2253_v42  ;;  %v2071_v22 = vmul.f32 0.00390625, %v2061_v56 }
 0x3fe   :  { %v2269_v34 = vmul.f32 %v6411_v41, %v2263_v16  ;;  %v2077_v0 = vmul.f32 %v6411_v41, %v2071_v22 }
 0x400   :  { %v2278_v21 = vsel %vm2079_vm5, %v2269_v34, 0.0  ;;  %v2087_v39 = vsel %vm2079_vm5, %v2077_v0, 0.0  ;;  %v7817_v0 = vlaneseq }
 0x401   :  { %v2279_v62 = vadd.f32 %v2278_v21, %v2277_v37  ;;  %v2088_v19 = vadd.f32 %v2087_v39, %v2086_v13 }
 0x402   :  { %v2107_v63 = vshrl.u32 %v7817_v0, 7 }
 0x404   :  { %v2108_v28 = vsub.s32 0, %v2107_v63 }
 0x40b   :  { %v2258_v5 = vpop.xlane.xlu0 %2257  ;;  %v2066_v10 = vpop.xlane.xlu1 %2065 }
 0x40c   :  { %v2264_v48 = vmul.f32 0.00390625, %v2258_v5  ;;  %v2072_v23 = vmul.f32 0.00390625, %v2066_v10 }
 0x40e   :  { %v2270_v2 = vmul.f32 %v6423_v7, %v2264_v48  ;;  %v2078_v32 = vmul.f32 %v6423_v7, %v2072_v23 }
 0x40f   :  { %v2098_v3 = vpop.permute.xlu1 %2097 }
 0x410   :  { %v2280_v25 = vsel %vm2079_vm5, %v2270_v2, 0.0  ;;  %v2089_v42 = vsel %vm2079_vm5, %v2078_v32, 0.0 }
 0x411   :  { %v2281_v56 = vadd.f32 %v2280_v25, %v2279_v62  ;;  %v2090_v51 = vadd.f32 %v2089_v42, %v2088_v19 }
 0x413   :  { %v2282_v45 = vrot.slane %v2281_v56, 4  ;;  %v2091_v8 = vrot.slane %v2090_v51, 4 }
 0x415   :  { %v2283_v11 = vadd.f32 %v2282_v45, %v2281_v56  ;;  %v2092_v24 = vadd.f32 %v2091_v8, %v2090_v51 }
 0x417   :  { %v2093_v12 = vrot.slane %v2092_v24, 2  ;;  %v2284_v6 = vrot.slane %v2283_v11, 2 }
 0x419   :  { %v2094_v16 = vadd.f32 %v2093_v12, %v2092_v24  ;;  %v2285_v22 = vadd.f32 %v2284_v6, %v2283_v11 }
 0x41b   :  { %v2095_v49 = vrot.slane %v2094_v16, 1  ;;  %v2286_v27 = vrot.slane %v2285_v22, 1 }
 0x41d   :  { %v2096_v17 = vadd.f32 %v2095_v49, %v2094_v16  ;;  %v2287_v43 = vadd.f32 %v2286_v27, %v2285_v22 }
 0x41f   :  { %v2100_v29 = vadd.f32 %v2098_v3, %v2096_v17  ;;  %v2288_v35 = vadd.f32 %v2287_v43, %v2098_v3 }
 0x421   :  { %v2101_v31 = vmul.f32 0.5, %v2100_v29  ;;  %v2289_v34 = vmul.f32 0.5, %v2288_v35 }
 0x423   :  { %2781 = vtanh.f32 %v2101_v31 }
 0x424   :  { %2783 = vtanh.f32 %v2289_v34 }
 0x42d   :  { %v2782_v4 = vpop.eup %2781 }
 0x42e   :  { %v2784_v14 = vpop.eup %2783  ;;  %v2103_v40 = vmul.f32 0.5, %v2782_v4 }
 0x42f   :  { %v2291_v36 = vmul.f32 0.5, %v2784_v14 }
 0x430   :  { %v2104_v5 = vadd.f32 0.5, %v2103_v40 }
 0x431   :  { %v2292_v10 = vadd.f32 0.5, %v2291_v36 }
 0x432   :  { %v2105_v21 = vmul.f32 %v2104_v5, %v2100_v29 }
 0x433   :  { %v2293_v39 = vmul.f32 %v2292_v10, %v2288_v35 }
 0x434   :  { %v2109_v48 = vrot.slane %v2105_v21, %v2108_v28 }
 0x435   :  { %v2297_v23 = vrot.slane %v2293_v39, %v2108_v28 }
 0x436   :  { %2111 = vrot.lane.b32.xlu0 %v2109_v48, %s2870_s10  ;;  %v2872_v48 = vmov 25  }
 0x437   :  { %2299 = vrot.lane.b32.xlu1 %v2297_v23, %s2870_s10  ;;  %2681 = vset.pattern.permute.xlu0 %v2872_v48 }
 0x438   :  { %2682 = vset.pattern.permute.xlu1 %v2872_v48 }
 0x4a8   :  { %v2112_v37 = vpop.permute.xlu0 %2111 }
 0x4a9   :  { %v2115_v13 = vmul.f32 %v6384_v30, %v2112_v37  ;;  %v2114_v2 = vmul.f32 %v6376_v33, %v2112_v37  ;;  %v2300_v32 = vpop.permute.xlu1 %2299  ;;  %v2117_v25 = vmul.f32 %v6402_v61, %v2112_v37  ;;  %v2116_v42 = vmul.f32 %v6393_v55, %v2112_v37 }
 0x4aa   :  { %v2303_v62 = vmul.f32 %v6384_v30, %v2300_v32  ;;  %v2302_v19 = vmul.f32 %v6376_v33, %v2300_v32  ;;  %v2305_v56 = vmul.f32 %v6402_v61, %v2300_v32  ;;  %v2304_v51 = vmul.f32 %v6393_v55, %v2300_v32 }
 0x4ab   :  { %2128 = vrot.lane.b32.xlu0 %v2115_v13, %s2871_s1  ;;  %2126 = vrot.lane.b32.xlu1 %v2114_v2, %s2871_s1  ;;  %v2119_v45 = vmul.f32 %v6423_v7, %v2112_v37  ;;  %v2118_v8 = vmul.f32 %v6411_v41, %v2112_v37  ;;  %v2307_v11 = vmul.f32 %v6423_v7, %v2300_v32 }
 0x4ac   :  { %v2306_v24 = vmul.f32 %v6411_v41, %v2300_v32 }
 0x4af   :  { %2316 = vrot.lane.b32.xlu0 %v2303_v62, %s2871_s1  ;;  %2314 = vrot.lane.b32.xlu1 %v2302_v19, %s2871_s1 }
 0x4b3   :  { %2132 = vrot.lane.b32.xlu0 %v2117_v25, %s2871_s1  ;;  %2130 = vrot.lane.b32.xlu1 %v2116_v42, %s2871_s1 }
 0x4b7   :  { %2320 = vrot.lane.b32.xlu0 %v2305_v56, %s2871_s1  ;;  %2318 = vrot.lane.b32.xlu1 %v2304_v51, %s2871_s1 }
 0x4bb   :  { %2136 = vrot.lane.b32.xlu0 %v2119_v45, %s2871_s1  ;;  %2134 = vrot.lane.b32.xlu1 %v2118_v8, %s2871_s1 }
 0x4bf   :  { %2324 = vrot.lane.b32.xlu0 %v2307_v11, %s2871_s1  ;;  %2322 = vrot.lane.b32.xlu1 %v2306_v24, %s2871_s1 }
 0x51d   :  { %v2129_v12 = vpop.permute.xlu0 %2128  ;;  %v2127_v6 = vpop.permute.xlu1 %2126 }
 0x51e   :  { %v2148_v16 = vsel %vm2144_vm11, %v2129_v12, 0.0  ;;  %v2145_v22 = vsel %vm2144_vm11, %v2127_v6, 0.0 }
 0x51f   :  { %2149 = vadd.xlane.f32.xlu0 %v2148_v16  ;;  %2146 = vadd.xlane.f32.xlu1 %v2145_v22 }
 0x521   :  { %v2317_v49 = vpop.permute.xlu0 %2316  ;;  %v2315_v27 = vpop.permute.xlu1 %2314 }
 0x522   :  { %v2335_v3 = vsel %vm2144_vm11, %v2317_v49, 0.0  ;;  %v2332_v17 = vsel %vm2144_vm11, %v2315_v27, 0.0 }
 0x523   :  { %2336 = vadd.xlane.f32.xlu1 %v2335_v3  ;;  %2333 = vadd.xlane.f32.xlu0 %v2332_v17 }
 0x525   :  { %v2133_v43 = vpop.permute.xlu0 %2132  ;;  %v2131_v29 = vpop.permute.xlu1 %2130 }
 0x526   :  { %v2154_v35 = vsel %vm2144_vm11, %v2133_v43, 0.0  ;;  %v2151_v31 = vsel %vm2144_vm11, %v2131_v29, 0.0 }
 0x527   :  { %2155 = vadd.xlane.f32.xlu1 %v2154_v35  ;;  %2152 = vadd.xlane.f32.xlu0 %v2151_v31 }
 0x529   :  { %v2321_v34 = vpop.permute.xlu0 %2320  ;;  %v2319_v0 = vpop.permute.xlu1 %2318 }
 0x52a   :  { %v2341_v63 = vsel %vm2144_vm11, %v2321_v34, 0.0  ;;  %v2338_v4 = vsel %vm2144_vm11, %v2319_v0, 0.0 }
 0x52b   :  { %2342 = vadd.xlane.f32.xlu1 %v2341_v63  ;;  %2339 = vadd.xlane.f32.xlu0 %v2338_v4 }
 0x52d   :  { %v2137_v14 = vpop.permute.xlu0 %2136  ;;  %v2135_v40 = vpop.permute.xlu1 %2134 }
 0x52e   :  { %v2160_v36 = vsel %vm2144_vm11, %v2137_v14, 0.0  ;;  %v2157_v28 = vsel %vm2144_vm11, %v2135_v40, 0.0 }
 0x52f   :  { %2161 = vadd.xlane.f32.xlu1 %v2160_v36  ;;  %2158 = vadd.xlane.f32.xlu0 %v2157_v28 }
 0x531   :  { %v2325_v5 = vpop.permute.xlu0 %2324  ;;  %v2323_v10 = vpop.permute.xlu1 %2322 }
 0x532   :  { %v2347_v21 = vsel %vm2144_vm11, %v2325_v5, 0.0  ;;  %v2344_v39 = vsel %vm2144_vm11, %v2323_v10, 0.0 }
 0x533   :  { %2348 = vadd.xlane.f32.xlu1 %v2347_v21  ;;  %2345 = vadd.xlane.f32.xlu0 %v2344_v39 }
 0x5ac   :  { %v2150_v23 = vpop.xlane.xlu0 %2149  ;;  %v2147_v37 = vpop.xlane.xlu1 %2146 }
 0x5ad   :  { %v2163_v13 = vadd.f32 %v6376_v33, %v2147_v37  ;;  %v2164_v42 = vadd.f32 %v6384_v30, %v2150_v23 }
 0x5af   :  { %v2169_v2 = vmul.f32 0.5, %v2163_v13  ;;  %v2170_v11 = vmul.f32 0.5, %v2164_v42 }
 0x5b0   :  { %v2334_v32 = vpop.xlane.xlu0 %2333  ;;  %v2337_v62 = vpop.xlane.xlu1 %2336 }
 0x5b1   :  { %v2350_v19 = vadd.f32 %v6376_v33, %v2334_v32  ;;  %v2351_v25 = vadd.f32 %v6384_v30, %v2337_v62  ;;  %2785 = vtanh.f32 %v2169_v2 }
 0x5b3   :  { %v2356_v56 = vmul.f32 0.5, %v2350_v19  ;;  %v2357_v51 = vmul.f32 0.5, %v2351_v25 }
 0x5b4   :  { %v2153_v45 = vpop.xlane.xlu0 %2152  ;;  %v2156_v8 = vpop.xlane.xlu1 %2155 }
 0x5b5   :  { %2787 = vtanh.f32 %v2356_v56  ;;  %v2165_v49 = vadd.f32 %v6393_v55, %v2153_v45  ;;  %v2166_v36 = vadd.f32 %v6402_v61, %v2156_v8 }
 0x5b6   :  { %2789 = vtanh.f32 %v2357_v51 }
 0x5b7   :  { %2791 = vtanh.f32 %v2170_v11  ;;  %v2171_v34 = vmul.f32 0.5, %v2165_v49  ;;  %v2172_v39 = vmul.f32 0.5, %v2166_v36 }
 0x5b8   :  { %v2340_v24 = vpop.xlane.xlu0 %2339  ;;  %v2343_v12 = vpop.xlane.xlu1 %2342 }
 0x5b9   :  { %v2352_v6 = vadd.f32 %v6393_v55, %v2340_v24  ;;  %v2353_v16 = vadd.f32 %v6402_v61, %v2343_v12 }
 0x5bb   :  { %v2358_v22 = vmul.f32 0.5, %v2352_v6  ;;  %v2786_v17 = vpop.eup %2785  ;;  %v2359_v43 = vmul.f32 0.5, %v2353_v16 }
 0x5bc   :  { %v2162_v27 = vpop.xlane.xlu1 %2161  ;;  %v2159_v30 = vpop.xlane.xlu0 %2158  ;;  %v2181_v55 = vmul.f32 0.5, %v2786_v17 }
 0x5bd   :  { %v2168_v3 = vadd.f32 %v6423_v7, %v2162_v27  ;;  %2793 = vtanh.f32 %v2358_v22  ;;  %v2167_v61 = vadd.f32 %v6411_v41, %v2159_v30 }
 0x5be   :  { %2795 = vtanh.f32 %v2359_v43  ;;  %v2187_v37 = vadd.f32 0.5, %v2181_v55  ;;  %v7818_v55 = vld [vmem:[#allocation5_spill] sm:$0xff] }
 0x5bf   :  { %v2788_v29 = vpop.eup %2787  ;;  %v2174_v4 = vmul.f32 0.5, %v2168_v3  ;;  %2797 = vtanh.f32 %v2171_v34  ;;  %v2173_v25 = vmul.f32 0.5, %v2167_v61  ;;  %v7820_v61 = vld [vmem:[#allocation168_spill] sm:$0xff] }
 0x5c0   :  { %v2790_v35 = vpop.eup %2789  ;;  %v2368_v31 = vmul.f32 0.5, %v2788_v29  ;;  %v2349_v0 = vpop.xlane.xlu1 %2348 }
 0x5c1   :  { %v2369_v63 = vmul.f32 0.5, %v2790_v35  ;;  %v2355_v14 = vadd.f32 %v6423_v7, %v2349_v0  ;;  %v2346_v5 = vpop.xlane.xlu0 %2345  ;;  %v2792_v21 = vpop.eup %2791  ;;  %2799 = vtanh.f32 %v2174_v4 }
 0x5c2   :  { %v2374_v40 = vadd.f32 0.5, %v2368_v31  ;;  %v2354_v48 = vadd.f32 %v6411_v41, %v2346_v5  ;;  %v2182_v23 = vmul.f32 0.5, %v2792_v21  ;;  %v2873_v31 = vmov 26  }
 0x5c3   :  { %v2375_v28 = vadd.f32 0.5, %v2369_v63  ;;  %v2361_v10 = vmul.f32 0.5, %v2355_v14 }
 0x5c4   :  { %2382 = vperm.xlu0 %2681, %v2374_v40   ;;  %v2360_v13 = vmul.f32 0.5, %v2354_v48  ;;  %v2188_v2 = vadd.f32 0.5, %v2182_v23 }
 0x5c5   :  { %2387 = vperm.xlu1 %2682, %v2375_v28   ;;  %2801 = vtanh.f32 %v2361_v10  ;;  %v7819_v10 = vld [vmem:[#allocation117_spill] sm:$0xff] }
 0x5c6   :  { %2803 = vtanh.f32 %v2172_v39 }
 0x5c7   :  { %v2794_v7 = vpop.eup %2793  ;;  %2805 = vtanh.f32 %v2360_v13 }
 0x5c8   :  { %v2370_v32 = vmul.f32 0.5, %v2794_v7  ;;  %v2796_v62 = vpop.eup %2795  ;;  %2807 = vtanh.f32 %v2173_v25 }
 0x5c9   :  { %2412 = vperm.xlu1 %2682, %v2187_v37   ;;  %v2798_v19 = vpop.eup %2797  ;;  %v2371_v51 = vmul.f32 0.5, %v2796_v62 }
 0x5ca   :  { %v2376_v56 = vadd.f32 0.5, %v2370_v32  ;;  %v2183_v11 = vmul.f32 0.5, %v2798_v19  ;;  %v7822_v32 = vld [vmem:[#allocation115_spill] sm:$0xff]  ;;  %v7823_v19 = vld [vmem:[#allocation113_spill] sm:$0xff] }
 0x5cb   :  { %v2800_v42 = vpop.eup %2799  ;;  %v2377_v24 = vadd.f32 0.5, %v2371_v51 }
 0x5cc   :  { %v2186_v12 = vmul.f32 0.5, %v2800_v42  ;;  %v2189_v16 = vadd.f32 0.5, %v2183_v11 }
 0x5cd   :  { %2417 = vperm.xlu1 %2682, %v2188_v2  }
 0x5ce   :  { %v2192_v49 = vadd.f32 0.5, %v2186_v12 }
 0x5cf   :  { %v2802_v45 = vpop.eup %2801 }
 0x5d0   :  { %v2373_v8 = vmul.f32 0.5, %v2802_v45  ;;  %v2804_v41 = vpop.eup %2803 }
 0x5d1   :  { %2392 = vperm.xlu1 %2682, %v2376_v56   ;;  %v2184_v22 = vmul.f32 0.5, %v2804_v41  ;;  %v2806_v27 = vpop.eup %2805 }
 0x5d2   :  { %v2379_v6 = vadd.f32 0.5, %v2373_v8  ;;  %v2372_v3 = vmul.f32 0.5, %v2806_v27  ;;  %v2808_v17 = vpop.eup %2807  ;;  %v7825_v27 = vld [vmem:[#allocation135_spill] sm:$0xff] }
 0x5d3   :  { %v2190_v30 = vadd.f32 0.5, %v2184_v22  ;;  %v2185_v43 = vmul.f32 0.5, %v2808_v17  ;;  %v7824_v22 = vld [vmem:[#allocation155_spill] sm:$0xff]  ;;  %v7826_v17 = vld [vmem:[#allocation22_spill] sm:$0xff] }
 0x5d4   :  { %2407 = vperm.xlu0 %2681, %v2379_v6   ;;  %v2378_v29 = vadd.f32 0.5, %v2372_v3 }
 0x5d5   :  { %2397 = vperm.xlu1 %2682, %v2377_v24   ;;  %v2191_v35 = vadd.f32 0.5, %v2185_v43 }
 0x5d8   :  { %2437 = vperm.xlu0 %2681, %v2192_v49  }
 0x5d9   :  { %2422 = vperm.xlu1 %2682, %v2189_v16  }
 0x5dc   :  { %2684 = vset.pattern.permute.xlu0 %v2873_v31 }
 0x5dd   :  { %2427 = vperm.xlu1 %2682, %v2190_v30  }
 0x5e1   :  { %2402 = vperm.xlu1 %2682, %v2378_v29   ;;  %v7827_v29 = vld [vmem:[#allocation153_spill] sm:$0xff] }
 0x5e5   :  { %2432 = vperm.xlu1 %2682, %v2191_v35  }
 0x5e9   :  { %2683 = vset.pattern.permute.xlu1 %v2873_v31 }
 0x5ea   :  { %2501 = vperm.xlu1 %2683, %v6376_v33  }
 0x643   :  { %v2383_v0 = vpop.permute.xlu0 %2382 }
 0x644   :  { %v2388_v34 = vpop.permute.xlu1 %2387 }
 0x648   :  { %v2413_v63 = vpop.permute.xlu1 %2412 }
 0x649   :  { %v2440_v4 = vsel %vm5714_vm6, %v2383_v0, %v2413_v63  ;;  %v2441_v14 = vsel %vm5535_vm9, %v2383_v0, %v2413_v63  ;;  %v2442_v40 = vsel %vm5803_vm12, %v2383_v0, %v2413_v63  ;;  %v2443_v36 = vsel %vm5867_vm3, %v2383_v0, %v2413_v63 }
 0x64a   :  { %v2464_v28 = vmul.f32 %v2440_v4, %v7818_v55  ;;  %v2466_v5 = vmul.f32 %v2442_v40, %v5976_v15  ;;  %v2465_v21 = vmul.f32 %v2441_v14, %v7819_v10  ;;  %v2467_v39 = vmul.f32 %v2443_v36, %v6017_v18  ;;  %v7821_v15 = vld [vmem:[#allocation23_spill] sm:$0xff] }
 0x64c   :  { %v2418_v33 = vpop.permute.xlu1 %2417 }
 0x64d   :  { %v2444_v48 = vsel %vm5714_vm6, %v2388_v34, %v2418_v33  ;;  %v2445_v23 = vsel %vm5535_vm9, %v2388_v34, %v2418_v33  ;;  %v2446_v37 = vsel %vm5803_vm12, %v2388_v34, %v2418_v33  ;;  %v2447_v7 = vsel %vm5867_vm3, %v2388_v34, %v2418_v33 }
 0x64e   :  { %v2468_v13 = vmul.f32 %v2444_v48, %v7820_v61  ;;  %v2470_v2 = vmul.f32 %v2446_v37, %v7821_v15  ;;  %v2469_v62 = vmul.f32 %v2445_v23, %v7822_v32  ;;  %v2471_v18 = vmul.f32 %v2447_v7, %v7823_v19 }
 0x650   :  { %v2393_v25 = vpop.permute.xlu1 %2392  ;;  %v2489_v42 = vpack.c.bf16 %v2469_v62, %v2465_v21  ;;  %v2491_v56 = vpack.c.bf16 %v2471_v18, %v2467_v39  ;;  %v2488_v51 = vpack.c.bf16 %v2468_v13, %v2464_v28  ;;  %v2490_v45 = vpack.c.bf16 %v2470_v2, %v2466_v5 }
 0x652   :  { %2508 = vmatprep.subr.bf16.mxu0 %v2489_v42  ;;  %2549 = vmatprep.subr.bf16.mxu1 %v2491_v56 }
 0x653   :  { %2509 = vmatpush1.bf16.msra.mxu0 %v2488_v51  ;;  %2550 = vmatpush1.bf16.msra.mxu1 %v2490_v45  ;;  %v2408_v11 = vpop.permute.xlu0 %2407 }
 0x654   :  { %v2398_v8 = vpop.permute.xlu1 %2397 }
 0x657   :  { %v2438_v4 = vpop.permute.xlu0 %2437 }
 0x658   :  { %v2423_v24 = vpop.permute.xlu1 %2422  ;;  %v2460_v39 = vsel %vm5714_vm6, %v2408_v11, %v2438_v4  ;;  %v2461_v48 = vsel %vm5535_vm9, %v2408_v11, %v2438_v4 }
 0x659   :  { %v2448_v12 = vsel %vm5714_vm6, %v2393_v25, %v2423_v24  ;;  %v2449_v6 = vsel %vm5535_vm9, %v2393_v25, %v2423_v24  ;;  %v2450_v41 = vsel %vm5803_vm12, %v2393_v25, %v2423_v24  ;;  %v2451_v16 = vsel %vm5867_vm3, %v2393_v25, %v2423_v24 }
 0x65a   :  { %v2472_v49 = vmul.f32 %v2448_v12, %v7824_v22  ;;  %v2474_v30 = vmul.f32 %v2450_v41, %v7825_v27  ;;  %v2473_v43 = vmul.f32 %v2449_v6, %v7826_v17  ;;  %v2475_v35 = vmul.f32 %v2451_v16, %v7827_v29  ;;  %v2823_v12 = vld [vmem:[%s6568_s0 + $0x10] sm:$0xff]  ;;  %v2824_v41 = vld [vmem:[%s6568_s0 + $0x8] sm:$0xff]  ;;  %v2825_v22 = vld [vmem:[%s6568_s0 + $0x18] sm:$0xff] }
 0x65c   :  { %v2428_v3 = vpop.permute.xlu1 %2427 }
 0x65d   :  { %v2452_v31 = vsel %vm5714_vm6, %v2398_v8, %v2428_v3  ;;  %v2453_v34 = vsel %vm5535_vm9, %v2398_v8, %v2428_v3  ;;  %v2454_v0 = vsel %vm5803_vm12, %v2398_v8, %v2428_v3  ;;  %v2455_v63 = vsel %vm5867_vm3, %v2398_v8, %v2428_v3 }
 0x65e   :  { %v2476_v14 = vmul.f32 %v2452_v31, %v6190_v46  ;;  %v2478_v40 = vmul.f32 %v2454_v0, %v6212_v58  ;;  %v2477_v36 = vmul.f32 %v2453_v34, %v6207_v60  ;;  %v2479_v55 = vmul.f32 %v2455_v63, %v6224_v20 }
 0x65f   :  { %v2462_v46 = vsel %vm5803_vm12, %v2408_v11, %v2438_v4  ;;  %v2463_v58 = vsel %vm5867_vm3, %v2408_v11, %v2438_v4  ;;  %v2484_v60 = vmul.f32 %v2460_v39, %v6341_v1  ;;  %v2485_v20 = vmul.f32 %v2461_v48, %v6343_v50  ;;  %v2822_v11 = vld [vmem:[%s6568_s0] sm:$0xff] }
 0x660   :  { %v2403_v28 = vpop.permute.xlu1 %2402  ;;  %v2493_v5 = vpack.c.bf16 %v2477_v36, %v2473_v43  ;;  %v2495_v33 = vpack.c.bf16 %v2479_v55, %v2475_v35  ;;  %v2492_v10 = vpack.c.bf16 %v2476_v14, %v2472_v49  ;;  %v2494_v21 = vpack.c.bf16 %v2478_v40, %v2474_v30 }
 0x661   :  { %v2486_v23 = vmul.f32 %v2462_v46, %v6351_v59  ;;  %v2487_v37 = vmul.f32 %v2463_v58, %v6359_v47 }
 0x662   :  { %2510 = vmatprep.subr.bf16.mxu0 %v2493_v5  ;;  %2551 = vmatprep.subr.bf16.mxu1 %v2495_v33 }
 0x663   :  { %2511 = vmatpush1.bf16.msra.mxu0 %v2492_v10  ;;  %2552 = vmatpush1.bf16.msra.mxu1 %v2494_v21 }
 0x664   :  { %v2433_v7 = vpop.permute.xlu1 %2432 }
 0x665   :  { %v2456_v61 = vsel %vm5714_vm6, %v2403_v28, %v2433_v7  ;;  %v2457_v13 = vsel %vm5535_vm9, %v2403_v28, %v2433_v7  ;;  %v2458_v15 = vsel %vm5803_vm12, %v2403_v28, %v2433_v7  ;;  %v2459_v2 = vsel %vm5867_vm3, %v2403_v28, %v2433_v7 }
 0x666   :  { %v2480_v1 = vmul.f32 %v2456_v61, %v6303_v54  ;;  %v2482_v50 = vmul.f32 %v2458_v15, %v6311_v57  ;;  %v2481_v59 = vmul.f32 %v2457_v13, %v6308_v26  ;;  %v2483_v47 = vmul.f32 %v2459_v2, %v6314_v38 }
 0x667   :  { %vm2504_vm9 = vcmask 392192  }
 0x668   :  { %v2497_v32 = vpack.c.bf16 %v2485_v20, %v2481_v59  ;;  %v2499_v9 = vpack.c.bf16 %v2487_v37, %v2483_v47  ;;  %v2496_v62 = vpack.c.bf16 %v2484_v60, %v2480_v1  ;;  %v2498_v19 = vpack.c.bf16 %v2486_v23, %v2482_v50 }
 0x669   :  { %v2502_v44 = vpop.permute.xlu1 %2501 }
 0x66a   :  { %2512 = vmatprep.subr.bf16.mxu0 %v2497_v32  ;;  %2553 = vmatprep.subr.bf16.mxu1 %v2499_v9 }
 0x66b   :  { %2513 = vmatpush1.bf16.msra.mxu0 %v2496_v62  ;;  %2554 = vmatpush1.bf16.msra.mxu1 %v2498_v19 }
 0x66e   :  { %2618 = vmatmul.mubr.msk.bf16.vlgmr.msra.gmra.mrb[12].mxu0 %vm2504_vm9, %v30_v52  ;;  %2619 = vmatmul.mubr.msk.bf16.vlgmr.msra.gmra.mrb[12].mxu1 %vm2504_vm9, %v30_v52 }
 0x741   :  { %v2542_v53 = vpop.f32.mrb[12].mxu0  ;;  %v2583_v54 = vpop.f32.mrb[12].mxu1 }
 0x742   :  { %v2544_v26 = vpop.f32.mrb[13].mxu0  ;;  %v2585_v57 = vpop.f32.mrb[13].mxu1  ;;  %v2543_v38 = vadd.f32 %v2542_v53, %v2502_v44  ;;  %v2584_v18 = vadd.f32 %v2583_v54, %v2502_v44 }
 0x743   :  { %v2546_v25 = vpop.f32.mrb[14].mxu0  ;;  %v2587_v42 = vpop.f32.mrb[14].mxu1  ;;  %v2545_v56 = vadd.f32 %v2544_v26, %v2502_v44  ;;  %v2586_v51 = vadd.f32 %v2585_v57, %v2502_v44 }
 0x744   :  { %v2547_v45 = vpop.f32.mrb[15].mxu0  ;;  %v2588_v8 = vpop.f32.mrb[15].mxu1  ;;  %v2590_v24 = vadd.f32 %v2822_v11, %v2543_v38  ;;  %v2592_v6 = vadd.f32 %v2823_v12, %v2584_v18 }
 0x745   :  { %v2591_v16 = vadd.f32 %v2824_v41, %v2545_v56  ;;  %v2593_v49 = vadd.f32 %v2825_v22, %v2586_v51 }
 0x746   :  { %2594 = vst [vmem:[#allocation2] sm:$0xff] %v2590_v24  ;;  %2596 = vst [vmem:[#allocation2 + $0x10] sm:$0xff] %v2592_v6 }
 0x747   :  { %2595 = vst [vmem:[#allocation2 + $0x8] sm:$0xff] %v2591_v16  ;;  %2597 = vst [vmem:[#allocation2 + $0x18] sm:$0xff] %v2593_v49 }
 0x748   :  { %2837 = shalt.err (!%p2834_p4)
}
 0x749   :  { %s2838_s8 = scalar_lea.hbm %s6571_s3, 512 }
 0x74a   :  { %p2839_p5 = scmp.ne.s32.totalorder %s6571_s3, %s2838_s8  ;;  %p2842_p6 = scmp.lt.u32.totalorder %s2838_s8, %s6571_s3 }
 0x74c   :  { %p2844_p7 = pnand %p2842_p6, %p2839_p5 }
 0x74e   :  { %2847 = shalt.err (!%p2844_p7)
}
 0x74f   :  { %2607 = dma.vmem_to_hbm [thread:$0]  %s2605_s24, 512, %s6571_s3, [#allocation3]  }
 0x750   :  { %2848 = dma.done.wait [#allocation3], 512  }
 0x751   :  { %2849 = vsyncadd [#allocation3], 4294966784 }
 0x752   :  { %2611 = vsyncpa [#allocation3], 1 }

</bundles_post_ra>
